<compile_context>
chip_gen: v7x
topology: tpu7x:2x2x1
jax: 0.10.0
libtpu: 0.0.40
codegen_flags: <defaults>
</compile_context>

<pallas_src>
import functools

import jax
import jax.numpy as jnp
from jax.experimental import pallas as pl
from jax.experimental.pallas import tpu as pltpu


_H = _W = 16                      # spatial size implied by the model (4 pools -> 1x1)
_CHANS = [(1, 16), (16, 32), (32, 64), (64, 128)]


# ----------------------------------------------------------------------------
# Fused Pallas kernel
# ----------------------------------------------------------------------------
def _fused_cnn_kernel(x_ref, w1_ref, b1_ref, w2_ref, b2_ref, w3_ref, b3_ref,
                      w4_ref, b4_ref, fcw_ref, fcb_ref, o_ref,
                      lhs1_ref, lhs2_ref, lhs3_ref, lhs4_ref):
    """Whole CNN forward for one batch block; everything VMEM-resident.

    Steady-state activation layout: (H, W, Bblk, C) -- channels on lanes,
    batch on sublanes, so conv LHS reshapes / pooling touch leading dims only.
    """
    bblk = x_ref.shape[1]
    bf16 = jnp.bfloat16
    f32 = jnp.float32

    # ---- layer 1: row-band matmul, K = 3 rows x 18 cols = 54, N = (w, co) ---
    # x_ref: (18, bblk, 18) = (padded_row, batch, padded_col)
    x = x_ref[...]
    for dh in range(3):
        # LHS[(h, b), dh*18 + col] = xpad[h+dh, col, b]
        lhs1_ref[:, 18 * dh:18 * (dh + 1)] = x[dh:dh + _H].reshape(_H * bblk, 18)
    y = jnp.dot(lhs1_ref[...], w1_ref[...], preferred_element_type=f32)
    y = jnp.maximum(y + b1_ref[...], 0.0).astype(bf16)          # (16*bblk, 256)
    y = y.reshape(8, 2, bblk, 256)                               # split rows (h2, hp, b)
    y = jnp.maximum(y[:, 0], y[:, 1])                            # pool over rows
    # lanes are ordered (out_col, out_chan): pool columns pairwise + relayout
    cols = [y[:, :, 16 * w:16 * (w + 1)] for w in range(16)]     # each (8, bblk, 16)
    act = jnp.stack(
        [jnp.maximum(cols[2 * i], cols[2 * i + 1]) for i in range(8)],
        axis=1)                                                  # (8, 8, bblk, 16)

    # ---- layers 2..4: K-packed im2col -> ONE matmul -> ReLU -> pool ---------
    for lhs_ref, w_ref, b_ref, (cin, cout), h in (
            (lhs2_ref, w2_ref, b2_ref, (16, 32), 8),
            (lhs3_ref, w3_ref, b3_ref, (32, 64), 4),
            (lhs4_ref, w4_ref, b4_ref, (64, 128), 2)):
        m = h * h * bblk
        # zero halo via outer-dim concats (border strips only, no full zero sweep)
        zr = jnp.zeros((1, h, bblk, cin), bf16)
        p = jnp.concatenate([zr, act, zr], axis=0)               # (h+2, h, bblk, cin)
        zc = jnp.zeros((h + 2, 1, bblk, cin), bf16)
        p = jnp.concatenate([zc, p, zc], axis=1)                 # (h+2, h+2, bblk, cin)
        # im2col: 9 taps packed along K (lanes) of the scratch LHS
        t = 0
        for dh in range(3):
            for dw in range(3):
                lhs_ref[:, t * cin:(t + 1) * cin] = (
                    p[dh:dh + h, dw:dw + h].reshape(m, cin))
                t += 1
        y = jnp.dot(lhs_ref[...], w_ref[...], preferred_element_type=f32)
        y = jnp.maximum(y + b_ref[...], 0.0).astype(bf16)        # (m, cout)
        # 2x2 max-pool: leading-dim reshape + elementwise max
        y = y.reshape(h // 2, 2, h // 2, 2, bblk, cout)
        y = jnp.maximum(y[:, 0], y[:, 1])
        act = jnp.maximum(y[:, :, 0], y[:, :, 1])                # (h/2, h/2, bblk, cout)

    # ---- squeeze + fc (lane-dense, N padded to 128) -------------------------
    feat = act.reshape(bblk, 128)                                # (1,1,bblk,128) -> (bblk,128)
    o_ref[...] = (jnp.dot(feat, fcw_ref[...], preferred_element_type=f32)
                  + fcb_ref[...])


# ----------------------------------------------------------------------------
# Wrapper
# ----------------------------------------------------------------------------
def _round_up(n, m):
    return (n + m - 1) // m * m


def _layer1_weights(w1, b1):
    """Expand the (3,3,1,16) conv1 weights into the (54, 256) row-band matrix.

    W1big[(dh, ic), (w, co)] = w1[dh, ic - w, 0, co] if 0 <= ic - w <= 2 else 0.
    """
    w1r = w1.reshape(3, 3, 16).astype(jnp.float32)               # (dh, dw, co)
    wb = jnp.zeros((3, 18, 16, 16), jnp.float32)                 # (dh, ic, w, co)
    iw = jnp.arange(16)
    for dw in range(3):
        wb = wb.at[:, iw + dw, iw, :].set(
            jnp.broadcast_to(w1r[:, dw, None, :], (3, 16, 16)))
    w1big = wb.reshape(54, 256).astype(jnp.bfloat16)
    b1big = jnp.tile(b1.astype(jnp.float32), 16).reshape(1, 256)  # lanes = (w, co)
    return w1big, b1big


@functools.partial(jax.jit, static_argnames=("block_b",))
def cnn_forward(x_nchw, params, block_b=128):
    """Equivalent of CNN.forward(x): fc(conv(x).squeeze())."""
    b, c, h, w = x_nchw.shape
    assert (c, h, w) == (1, _H, _W), "model expects 1x16x16 inputs (4 pools -> 1x1)"

    block_b = _round_up(max(int(block_b), 8), 8)                 # (8,128) rule
    bblk = min(block_b, _round_up(b, 8))
    bpad = _round_up(b, bblk)

    # Lane-dense input: zero-padded raw image, laid out (rows, batch, cols).
    xs = x_nchw[:, 0].astype(jnp.float32)                        # (B, 16, 16)
    xp = jnp.pad(xs, ((0, bpad - b), (1, 1), (1, 1)))            # (Bpad, 18, 18)
    xrows = jnp.transpose(xp, (1, 0, 2)).astype(jnp.bfloat16)    # (18, Bpad, 18)

    (w1, b1), (w2, b2), (w3, b3), (w4, b4) = params["conv"]
    w1big, b1big = _layer1_weights(w1, b1)
    fcw = jnp.zeros((128, 128), jnp.float32).at[:, :10].set(params["fc_w"])
    fcb = jnp.zeros((1, 128), jnp.float32).at[:, :10].set(params["fc_b"])

    args = (
        xrows,
        w1big, b1big,
        w2.reshape(9 * 16, 32).astype(jnp.bfloat16), b2.reshape(1, 32).astype(jnp.float32),
        w3.reshape(9 * 32, 64).astype(jnp.bfloat16), b3.reshape(1, 64).astype(jnp.float32),
        w4.reshape(9 * 64, 128).astype(jnp.bfloat16), b4.reshape(1, 128).astype(jnp.float32),
        fcw.astype(jnp.bfloat16), fcb,
    )

    def full_spec(a):
        return pl.BlockSpec(a.shape, lambda i, nd=a.ndim: (0,) * nd)

    in_specs = [pl.BlockSpec((18, bblk, 18), lambda i: (0, i, 0))]
    in_specs += [full_spec(a) for a in args[1:]]

    out = pl.pallas_call(
        _fused_cnn_kernel,
        out_shape=jax.ShapeDtypeStruct((bpad, 128), jnp.float32),
        grid=(bpad // bblk,),
        in_specs=in_specs,
        out_specs=pl.BlockSpec((bblk, 128), lambda i: (i, 0)),
        scratch_shapes=[
            pltpu.VMEM((_H * bblk, 54), jnp.bfloat16),    # layer-1 row-band LHS
            pltpu.VMEM((64 * bblk, 144), jnp.bfloat16),   # layer-2 im2col LHS
            pltpu.VMEM((16 * bblk, 288), jnp.bfloat16),   # layer-3 im2col LHS
            pltpu.VMEM((4 * bblk, 576), jnp.bfloat16),    # layer-4 im2col LHS
        ],
        compiler_params=pltpu.CompilerParams(
            dimension_semantics=("parallel",),            # v7x: 2 TCs split batch blocks
            vmem_limit_bytes=32 * 1024 * 1024),
    )(*args)
    return out[:b, :10]


# ----------------------------------------------------------------------------
# Deterministic parameter init (glorot-ish normal; synthetic, no checkpoint)
# ----------------------------------------------------------------------------
def init_params(key):
    conv = []
    for cin, cout in _CHANS:
        key, kw, kb = jax.random.split(key, 3)
        fan_in, fan_out = cin * 9, cout * 9
        std = (2.0 / (fan_in + fan_out)) ** 0.5
        wgt = std * jax.random.normal(kw, (3, 3, cin, cout), dtype=jnp.float32)
        bias = 0.01 * jax.random.normal(kb, (cout,), dtype=jnp.float32)
        conv.append((wgt, bias))
    key, kw, kb = jax.random.split(key, 3)
    fc_w = (2.0 / (128 + 10)) ** 0.5 * jax.random.normal(
        kw, (128, 10), dtype=jnp.float32)
    fc_b = 0.01 * jax.random.normal(kb, (10,), dtype=jnp.float32)
    return {"conv": conv, "fc_w": fc_w, "fc_b": fc_b}


# ----------------------------------------------------------------------------
# Pure-JAX f32 reference for correctness check
# ----------------------------------------------------------------------------
def ref_forward(x_nchw, params):
    x = jnp.transpose(x_nchw, (0, 2, 3, 1))
    for w, b in params["conv"]:
        y = jax.lax.conv_general_dilated(
            x, w, window_strides=(1, 1), padding="SAME",
            dimension_numbers=("NHWC", "HWIO", "NHWC")) + b
        y = jnp.maximum(y, 0.0)
        x = jax.lax.reduce_window(y, -jnp.inf, jax.lax.max,
                                  (1, 2, 2, 1), (1, 2, 2, 1), "VALID")
    feat = x.reshape(x.shape[0], -1)
    return feat @ params["fc_w"] + params["fc_b"]


if __name__ == "__main__":
    key = jax.random.PRNGKey(0)
    key, kx = jax.random.split(key)
    # 16x16 input -> four 2x2 pools -> 1x1 spatial, matching .squeeze() -> (B,128)
    x = jax.random.normal(kx, (2, 1, 16, 16), dtype=jnp.float32)  # NCHW
    params = init_params(key)

    out = jax.block_until_ready(cnn_forward(x, params))
    ref = ref_forward(x, params)
    assert out.shape == (2, 10), out.shape
    err = float(jnp.max(jnp.abs(out - ref)))
    # bf16 matmul operands (f32 accumulation) -> relaxed parity vs f32 reference.
    assert jnp.allclose(out, ref, atol=3e-2, rtol=3e-2), err

    # Second shape: exercises a multi-step grid + batch padding (B=9, Bblk=8).
    key, kx2 = jax.random.split(key)
    x2 = jax.random.normal(kx2, (9, 1, 16, 16), dtype=jnp.float32)
    out2 = jax.block_until_ready(cnn_forward(x2, params, block_b=8))
    ref2 = ref_forward(x2, params)
    assert out2.shape == (9, 10), out2.shape
    err2 = float(jnp.max(jnp.abs(out2 - ref2)))
    assert jnp.allclose(out2, ref2, atol=3e-2, rtol=3e-2), err2

    print("KERNEL_OK")
</pallas_src>

<mosaic_0001>
module attributes {stable_mosaic.version = 11 : i64} {
  func.func @_fused_cnn_kernel(%arg0: i32, %arg1: memref<18x8x18xbf16, #tpu.memory_space<vmem>>, %arg2: memref<54x256xbf16, #tpu.memory_space<vmem>>, %arg3: memref<1x256xf32, #tpu.memory_space<vmem>>, %arg4: memref<144x32xbf16, #tpu.memory_space<vmem>>, %arg5: memref<1x32xf32, #tpu.memory_space<vmem>>, %arg6: memref<288x64xbf16, #tpu.memory_space<vmem>>, %arg7: memref<1x64xf32, #tpu.memory_space<vmem>>, %arg8: memref<576x128xbf16, #tpu.memory_space<vmem>>, %arg9: memref<1x128xf32, #tpu.memory_space<vmem>>, %arg10: memref<128x128xbf16, #tpu.memory_space<vmem>>, %arg11: memref<1x128xf32, #tpu.memory_space<vmem>>, %arg12: memref<8x128xf32, #tpu.memory_space<vmem>>, %arg13: memref<128x54xbf16, #tpu.memory_space<vmem>>, %arg14: memref<512x144xbf16, #tpu.memory_space<vmem>>, %arg15: memref<128x288xbf16, #tpu.memory_space<vmem>>, %arg16: memref<32x576xbf16, #tpu.memory_space<vmem>>) attributes {dimension_semantics = [#tpu.dimension_semantics<parallel>], iteration_bounds = array<i64: 1>, scalar_prefetch = 0 : i64, scratch_operands = 4 : i64, tpu.core_type = #tpu.core_type<tc>, window_params = [{transform_indices = @transform_0, window_bounds = array<i64: 18, 8, 18>}, {pipeline_mode = #tpu.pipeline_mode<synchronous>, transform_indices = @transform_1, window_bounds = array<i64: 54, 256>}, {pipeline_mode = #tpu.pipeline_mode<synchronous>, transform_indices = @transform_2, window_bounds = array<i64: 1, 256>}, {pipeline_mode = #tpu.pipeline_mode<synchronous>, transform_indices = @transform_3, window_bounds = array<i64: 144, 32>}, {pipeline_mode = #tpu.pipeline_mode<synchronous>, transform_indices = @transform_4, window_bounds = array<i64: 1, 32>}, {pipeline_mode = #tpu.pipeline_mode<synchronous>, transform_indices = @transform_5, window_bounds = array<i64: 288, 64>}, {pipeline_mode = #tpu.pipeline_mode<synchronous>, transform_indices = @transform_6, window_bounds = array<i64: 1, 64>}, {pipeline_mode = #tpu.pipeline_mode<synchronous>, transform_indices = @transform_7, window_bounds = array<i64: 576, 128>}, {pipeline_mode = #tpu.pipeline_mode<synchronous>, transform_indices = @transform_8, window_bounds = array<i64: 1, 128>}, {pipeline_mode = #tpu.pipeline_mode<synchronous>, transform_indices = @transform_9, window_bounds = array<i64: 128, 128>}, {pipeline_mode = #tpu.pipeline_mode<synchronous>, transform_indices = @transform_10, window_bounds = array<i64: 1, 128>}, {transform_indices = @transform_11, window_bounds = array<i64: 8, 128>}]} {
    %c0 = arith.constant 0 : index
    %c0_0 = arith.constant 0 : index
    %c0_1 = arith.constant 0 : index
    %0 = vector.load %arg1[%c0, %c0_0, %c0_1] : memref<18x8x18xbf16, #tpu.memory_space<vmem>>, vector<18x8x18xbf16>
    %1 = vector.extract_strided_slice %0 {offsets = [0, 0, 0], sizes = [16, 8, 18], strides = [1, 1, 1]} : vector<18x8x18xbf16> to vector<16x8x18xbf16>
    %2 = vector.shape_cast %1 : vector<16x8x18xbf16> to vector<128x18xbf16>
    %c0_2 = arith.constant 0 : index
    %c0_3 = arith.constant 0 : index
    %3 = vector.load %arg13[%c0_2, %c0_3] : memref<128x54xbf16, #tpu.memory_space<vmem>>, vector<128x18xbf16>
    tpu.vector_store %arg13[%c0_2, %c0_3], %2 {strides = array<i32>} : memref<128x54xbf16, #tpu.memory_space<vmem>>, vector<128x18xbf16>,
    %4 = vector.extract_strided_slice %0 {offsets = [1, 0, 0], sizes = [16, 8, 18], strides = [1, 1, 1]} : vector<18x8x18xbf16> to vector<16x8x18xbf16>
    %5 = vector.shape_cast %4 : vector<16x8x18xbf16> to vector<128x18xbf16>
    %c0_4 = arith.constant 0 : index
    %c18 = arith.constant 18 : index
    %6 = vector.load %arg13[%c0_4, %c18] : memref<128x54xbf16, #tpu.memory_space<vmem>>, vector<128x18xbf16>
    tpu.vector_store %arg13[%c0_4, %c18], %5 {strides = array<i32>} : memref<128x54xbf16, #tpu.memory_space<vmem>>, vector<128x18xbf16>,
    %7 = vector.extract_strided_slice %0 {offsets = [2, 0, 0], sizes = [16, 8, 18], strides = [1, 1, 1]} : vector<18x8x18xbf16> to vector<16x8x18xbf16>
    %8 = vector.shape_cast %7 : vector<16x8x18xbf16> to vector<128x18xbf16>
    %c0_5 = arith.constant 0 : index
    %c36 = arith.constant 36 : index
    %9 = vector.load %arg13[%c0_5, %c36] : memref<128x54xbf16, #tpu.memory_space<vmem>>, vector<128x18xbf16>
    tpu.vector_store %arg13[%c0_5, %c36], %8 {strides = array<i32>} : memref<128x54xbf16, #tpu.memory_space<vmem>>, vector<128x18xbf16>,
    %c0_6 = arith.constant 0 : index
    %c0_7 = arith.constant 0 : index
    %10 = vector.load %arg13[%c0_6, %c0_7] : memref<128x54xbf16, #tpu.memory_space<vmem>>, vector<128x54xbf16>
    %c0_8 = arith.constant 0 : index
    %c0_9 = arith.constant 0 : index
    %11 = vector.load %arg2[%c0_8, %c0_9] : memref<54x256xbf16, #tpu.memory_space<vmem>>, vector<54x256xbf16>
    %cst = arith.constant dense<0.000000e+00> : vector<128x256xf32>
    %12 = tpu.matmul %10, %11, %cst {dimension_numbers = #tpu.dot_dimension_numbers<[1], [0], [0], [1], [0, 0, 1, 1], [], []>} : vector<128x54xbf16>, vector<54x256xbf16>, vector<128x256xf32> -> vector<128x256xf32>
    %c0_10 = arith.constant 0 : index
    %c0_11 = arith.constant 0 : index
    %13 = vector.load %arg3[%c0_10, %c0_11] : memref<1x256xf32, #tpu.memory_space<vmem>>, vector<1x256xf32>
    %14 = vector.broadcast %13 : vector<1x256xf32> to vector<128x256xf32>
    %15 = arith.addf %12, %14 : vector<128x256xf32>
    %cst_12 = arith.constant 0.000000e+00 : f32
    %16 = vector.broadcast %cst_12 : f32 to vector<128x256xf32>
    %17 = arith.maximumf %15, %16 : vector<128x256xf32>
    %18 = arith.truncf %17 : vector<128x256xf32> to vector<128x256xbf16>
    %19 = vector.shape_cast %18 : vector<128x256xbf16> to vector<8x2x8x256xbf16>
    %20 = vector.extract_strided_slice %19 {offsets = [0, 0, 0, 0], sizes = [8, 1, 8, 256], strides = [1, 1, 1, 1]} : vector<8x2x8x256xbf16> to vector<8x1x8x256xbf16>
    %21 = vector.shape_cast %20 : vector<8x1x8x256xbf16> to vector<8x8x256xbf16>
    %22 = vector.extract_strided_slice %19 {offsets = [0, 1, 0, 0], sizes = [8, 1, 8, 256], strides = [1, 1, 1, 1]} : vector<8x2x8x256xbf16> to vector<8x1x8x256xbf16>
    %23 = vector.shape_cast %22 : vector<8x1x8x256xbf16> to vector<8x8x256xbf16>
    %24 = arith.maximumf %21, %23 : vector<8x8x256xbf16>
    %25 = vector.extract_strided_slice %24 {offsets = [0, 0, 0], sizes = [8, 8, 16], strides = [1, 1, 1]} : vector<8x8x256xbf16> to vector<8x8x16xbf16>
    %26 = vector.extract_strided_slice %24 {offsets = [0, 0, 16], sizes = [8, 8, 16], strides = [1, 1, 1]} : vector<8x8x256xbf16> to vector<8x8x16xbf16>
    %27 = vector.extract_strided_slice %24 {offsets = [0, 0, 32], sizes = [8, 8, 16], strides = [1, 1, 1]} : vector<8x8x256xbf16> to vector<8x8x16xbf16>
    %28 = vector.extract_strided_slice %24 {offsets = [0, 0, 48], sizes = [8, 8, 16], strides = [1, 1, 1]} : vector<8x8x256xbf16> to vector<8x8x16xbf16>
    %29 = vector.extract_strided_slice %24 {offsets = [0, 0, 64], sizes = [8, 8, 16], strides = [1, 1, 1]} : vector<8x8x256xbf16> to vector<8x8x16xbf16>
    %30 = vector.extract_strided_slice %24 {offsets = [0, 0, 80], sizes = [8, 8, 16], strides = [1, 1, 1]} : vector<8x8x256xbf16> to vector<8x8x16xbf16>
    %31 = vector.extract_strided_slice %24 {offsets = [0, 0, 96], sizes = [8, 8, 16], strides = [1, 1, 1]} : vector<8x8x256xbf16> to vector<8x8x16xbf16>
    %32 = vector.extract_strided_slice %24 {offsets = [0, 0, 112], sizes = [8, 8, 16], strides = [1, 1, 1]} : vector<8x8x256xbf16> to vector<8x8x16xbf16>
    %33 = vector.extract_strided_slice %24 {offsets = [0, 0, 128], sizes = [8, 8, 16], strides = [1, 1, 1]} : vector<8x8x256xbf16> to vector<8x8x16xbf16>
    %34 = vector.extract_strided_slice %24 {offsets = [0, 0, 144], sizes = [8, 8, 16], strides = [1, 1, 1]} : vector<8x8x256xbf16> to vector<8x8x16xbf16>
    %35 = vector.extract_strided_slice %24 {offsets = [0, 0, 160], sizes = [8, 8, 16], strides = [1, 1, 1]} : vector<8x8x256xbf16> to vector<8x8x16xbf16>
    %36 = vector.extract_strided_slice %24 {offsets = [0, 0, 176], sizes = [8, 8, 16], strides = [1, 1, 1]} : vector<8x8x256xbf16> to vector<8x8x16xbf16>
    %37 = vector.extract_strided_slice %24 {offsets = [0, 0, 192], sizes = [8, 8, 16], strides = [1, 1, 1]} : vector<8x8x256xbf16> to vector<8x8x16xbf16>
    %38 = vector.extract_strided_slice %24 {offsets = [0, 0, 208], sizes = [8, 8, 16], strides = [1, 1, 1]} : vector<8x8x256xbf16> to vector<8x8x16xbf16>
    %39 = vector.extract_strided_slice %24 {offsets = [0, 0, 224], sizes = [8, 8, 16], strides = [1, 1, 1]} : vector<8x8x256xbf16> to vector<8x8x16xbf16>
    %40 = vector.extract_strided_slice %24 {offsets = [0, 0, 240], sizes = [8, 8, 16], strides = [1, 1, 1]} : vector<8x8x256xbf16> to vector<8x8x16xbf16>
    %41 = arith.maximumf %25, %26 : vector<8x8x16xbf16>
    %42 = arith.maximumf %27, %28 : vector<8x8x16xbf16>
    %43 = arith.maximumf %29, %30 : vector<8x8x16xbf16>
    %44 = arith.maximumf %31, %32 : vector<8x8x16xbf16>
    %45 = arith.maximumf %33, %34 : vector<8x8x16xbf16>
    %46 = arith.maximumf %35, %36 : vector<8x8x16xbf16>
    %47 = arith.maximumf %37, %38 : vector<8x8x16xbf16>
    %48 = arith.maximumf %39, %40 : vector<8x8x16xbf16>
    %49 = vector.shape_cast %41 : vector<8x8x16xbf16> to vector<8x1x8x16xbf16>
    %50 = vector.shape_cast %42 : vector<8x8x16xbf16> to vector<8x1x8x16xbf16>
    %51 = vector.shape_cast %43 : vector<8x8x16xbf16> to vector<8x1x8x16xbf16>
    %52 = vector.shape_cast %44 : vector<8x8x16xbf16> to vector<8x1x8x16xbf16>
    %53 = vector.shape_cast %45 : vector<8x8x16xbf16> to vector<8x1x8x16xbf16>
    %54 = vector.shape_cast %46 : vector<8x8x16xbf16> to vector<8x1x8x16xbf16>
    %55 = vector.shape_cast %47 : vector<8x8x16xbf16> to vector<8x1x8x16xbf16>
    %56 = vector.shape_cast %48 : vector<8x8x16xbf16> to vector<8x1x8x16xbf16>
    %57 = tpu.concatenate %49, %50, %51, %52, %53, %54, %55, %56 in 1 : vector<8x1x8x16xbf16>, vector<8x1x8x16xbf16>, vector<8x1x8x16xbf16>, vector<8x1x8x16xbf16>, vector<8x1x8x16xbf16>, vector<8x1x8x16xbf16>, vector<8x1x8x16xbf16>, vector<8x1x8x16xbf16> -> vector<8x8x8x16xbf16>
    %cst_13 = arith.constant 0.000000e+00 : bf16
    %58 = vector.broadcast %cst_13 : bf16 to vector<1x8x8x16xbf16>
    %59 = tpu.concatenate %58, %57, %58 in 0 : vector<1x8x8x16xbf16>, vector<8x8x8x16xbf16>, vector<1x8x8x16xbf16> -> vector<10x8x8x16xbf16>
    %cst_14 = arith.constant 0.000000e+00 : bf16
    %60 = vector.broadcast %cst_14 : bf16 to vector<10x1x8x16xbf16>
    %61 = tpu.concatenate %60, %59, %60 in 1 : vector<10x1x8x16xbf16>, vector<10x8x8x16xbf16>, vector<10x1x8x16xbf16> -> vector<10x10x8x16xbf16>
    %62 = vector.extract_strided_slice %61 {offsets = [0, 0, 0, 0], sizes = [8, 8, 8, 16], strides = [1, 1, 1, 1]} : vector<10x10x8x16xbf16> to vector<8x8x8x16xbf16>
    %63 = vector.shape_cast %62 : vector<8x8x8x16xbf16> to vector<512x16xbf16>
    %c0_15 = arith.constant 0 : index
    %c0_16 = arith.constant 0 : index
    %64 = vector.load %arg14[%c0_15, %c0_16] : memref<512x144xbf16, #tpu.memory_space<vmem>>, vector<512x16xbf16>
    tpu.vector_store %arg14[%c0_15, %c0_16], %63 {strides = array<i32>} : memref<512x144xbf16, #tpu.memory_space<vmem>>, vector<512x16xbf16>,
    %65 = vector.extract_strided_slice %61 {offsets = [0, 1, 0, 0], sizes = [8, 8, 8, 16], strides = [1, 1, 1, 1]} : vector<10x10x8x16xbf16> to vector<8x8x8x16xbf16>
    %66 = vector.shape_cast %65 : vector<8x8x8x16xbf16> to vector<512x16xbf16>
    %c0_17 = arith.constant 0 : index
    %c16 = arith.constant 16 : index
    %67 = vector.load %arg14[%c0_17, %c16] : memref<512x144xbf16, #tpu.memory_space<vmem>>, vector<512x16xbf16>
    tpu.vector_store %arg14[%c0_17, %c16], %66 {strides = array<i32>} : memref<512x144xbf16, #tpu.memory_space<vmem>>, vector<512x16xbf16>,
    %68 = vector.extract_strided_slice %61 {offsets = [0, 2, 0, 0], sizes = [8, 8, 8, 16], strides = [1, 1, 1, 1]} : vector<10x10x8x16xbf16> to vector<8x8x8x16xbf16>
    %69 = vector.shape_cast %68 : vector<8x8x8x16xbf16> to vector<512x16xbf16>
    %c0_18 = arith.constant 0 : index
    %c32 = arith.constant 32 : index
    %70 = vector.load %arg14[%c0_18, %c32] : memref<512x144xbf16, #tpu.memory_space<vmem>>, vector<512x16xbf16>
    tpu.vector_store %arg14[%c0_18, %c32], %69 {strides = array<i32>} : memref<512x144xbf16, #tpu.memory_space<vmem>>, vector<512x16xbf16>,
    %71 = vector.extract_strided_slice %61 {offsets = [1, 0, 0, 0], sizes = [8, 8, 8, 16], strides = [1, 1, 1, 1]} : vector<10x10x8x16xbf16> to vector<8x8x8x16xbf16>
    %72 = vector.shape_cast %71 : vector<8x8x8x16xbf16> to vector<512x16xbf16>
    %c0_19 = arith.constant 0 : index
    %c48 = arith.constant 48 : index
    %73 = vector.load %arg14[%c0_19, %c48] : memref<512x144xbf16, #tpu.memory_space<vmem>>, vector<512x16xbf16>
    tpu.vector_store %arg14[%c0_19, %c48], %72 {strides = array<i32>} : memref<512x144xbf16, #tpu.memory_space<vmem>>, vector<512x16xbf16>,
    %74 = vector.extract_strided_slice %61 {offsets = [1, 1, 0, 0], sizes = [8, 8, 8, 16], strides = [1, 1, 1, 1]} : vector<10x10x8x16xbf16> to vector<8x8x8x16xbf16>
    %75 = vector.shape_cast %74 : vector<8x8x8x16xbf16> to vector<512x16xbf16>
    %c0_20 = arith.constant 0 : index
    %c64 = arith.constant 64 : index
    %76 = vector.load %arg14[%c0_20, %c64] : memref<512x144xbf16, #tpu.memory_space<vmem>>, vector<512x16xbf16>
    tpu.vector_store %arg14[%c0_20, %c64], %75 {strides = array<i32>} : memref<512x144xbf16, #tpu.memory_space<vmem>>, vector<512x16xbf16>,
    %77 = vector.extract_strided_slice %61 {offsets = [1, 2, 0, 0], sizes = [8, 8, 8, 16], strides = [1, 1, 1, 1]} : vector<10x10x8x16xbf16> to vector<8x8x8x16xbf16>
    %78 = vector.shape_cast %77 : vector<8x8x8x16xbf16> to vector<512x16xbf16>
    %c0_21 = arith.constant 0 : index
    %c80 = arith.constant 80 : index
    %79 = vector.load %arg14[%c0_21, %c80] : memref<512x144xbf16, #tpu.memory_space<vmem>>, vector<512x16xbf16>
    tpu.vector_store %arg14[%c0_21, %c80], %78 {strides = array<i32>} : memref<512x144xbf16, #tpu.memory_space<vmem>>, vector<512x16xbf16>,
    %80 = vector.extract_strided_slice %61 {offsets = [2, 0, 0, 0], sizes = [8, 8, 8, 16], strides = [1, 1, 1, 1]} : vector<10x10x8x16xbf16> to vector<8x8x8x16xbf16>
    %81 = vector.shape_cast %80 : vector<8x8x8x16xbf16> to vector<512x16xbf16>
    %c0_22 = arith.constant 0 : index
    %c96 = arith.constant 96 : index
    %82 = vector.load %arg14[%c0_22, %c96] : memref<512x144xbf16, #tpu.memory_space<vmem>>, vector<512x16xbf16>
    tpu.vector_store %arg14[%c0_22, %c96], %81 {strides = array<i32>} : memref<512x144xbf16, #tpu.memory_space<vmem>>, vector<512x16xbf16>,
    %83 = vector.extract_strided_slice %61 {offsets = [2, 1, 0, 0], sizes = [8, 8, 8, 16], strides = [1, 1, 1, 1]} : vector<10x10x8x16xbf16> to vector<8x8x8x16xbf16>
    %84 = vector.shape_cast %83 : vector<8x8x8x16xbf16> to vector<512x16xbf16>
    %c0_23 = arith.constant 0 : index
    %c112 = arith.constant 112 : index
    %85 = vector.load %arg14[%c0_23, %c112] : memref<512x144xbf16, #tpu.memory_space<vmem>>, vector<512x16xbf16>
    tpu.vector_store %arg14[%c0_23, %c112], %84 {strides = array<i32>} : memref<512x144xbf16, #tpu.memory_space<vmem>>, vector<512x16xbf16>,
    %86 = vector.extract_strided_slice %61 {offsets = [2, 2, 0, 0], sizes = [8, 8, 8, 16], strides = [1, 1, 1, 1]} : vector<10x10x8x16xbf16> to vector<8x8x8x16xbf16>
    %87 = vector.shape_cast %86 : vector<8x8x8x16xbf16> to vector<512x16xbf16>
    %c0_24 = arith.constant 0 : index
    %c128 = arith.constant 128 : index
    %88 = vector.load %arg14[%c0_24, %c128] : memref<512x144xbf16, #tpu.memory_space<vmem>>, vector<512x16xbf16>
    tpu.vector_store %arg14[%c0_24, %c128], %87 {strides = array<i32>} : memref<512x144xbf16, #tpu.memory_space<vmem>>, vector<512x16xbf16>,
    %c0_25 = arith.constant 0 : index
    %c0_26 = arith.constant 0 : index
    %89 = vector.load %arg14[%c0_25, %c0_26] : memref<512x144xbf16, #tpu.memory_space<vmem>>, vector<512x144xbf16>
    %c0_27 = arith.constant 0 : index
    %c0_28 = arith.constant 0 : index
    %90 = vector.load %arg4[%c0_27, %c0_28] : memref<144x32xbf16, #tpu.memory_space<vmem>>, vector<144x32xbf16>
    %cst_29 = arith.constant dense<0.000000e+00> : vector<512x32xf32>
    %91 = tpu.matmul %89, %90, %cst_29 {dimension_numbers = #tpu.dot_dimension_numbers<[1], [0], [0], [1], [0, 0, 1, 1], [], []>} : vector<512x144xbf16>, vector<144x32xbf16>, vector<512x32xf32> -> vector<512x32xf32>
    %c0_30 = arith.constant 0 : index
    %c0_31 = arith.constant 0 : index
    %92 = vector.load %arg5[%c0_30, %c0_31] : memref<1x32xf32, #tpu.memory_space<vmem>>, vector<1x32xf32>
    %93 = vector.broadcast %92 : vector<1x32xf32> to vector<512x32xf32>
    %94 = arith.addf %91, %93 : vector<512x32xf32>
    %cst_32 = arith.constant 0.000000e+00 : f32
    %95 = vector.broadcast %cst_32 : f32 to vector<512x32xf32>
    %96 = arith.maximumf %94, %95 : vector<512x32xf32>
    %97 = arith.truncf %96 : vector<512x32xf32> to vector<512x32xbf16>
    %98 = vector.shape_cast %97 : vector<512x32xbf16> to vector<4x2x4x2x8x32xbf16>
    %99 = vector.extract_strided_slice %98 {offsets = [0, 0, 0, 0, 0, 0], sizes = [4, 1, 4, 2, 8, 32], strides = [1, 1, 1, 1, 1, 1]} : vector<4x2x4x2x8x32xbf16> to vector<4x1x4x2x8x32xbf16>
    %100 = vector.shape_cast %99 : vector<4x1x4x2x8x32xbf16> to vector<4x4x2x8x32xbf16>
    %101 = vector.extract_strided_slice %98 {offsets = [0, 1, 0, 0, 0, 0], sizes = [4, 1, 4, 2, 8, 32], strides = [1, 1, 1, 1, 1, 1]} : vector<4x2x4x2x8x32xbf16> to vector<4x1x4x2x8x32xbf16>
    %102 = vector.shape_cast %101 : vector<4x1x4x2x8x32xbf16> to vector<4x4x2x8x32xbf16>
    %103 = arith.maximumf %100, %102 : vector<4x4x2x8x32xbf16>
    %104 = vector.extract_strided_slice %103 {offsets = [0, 0, 0, 0, 0], sizes = [4, 4, 1, 8, 32], strides = [1, 1, 1, 1, 1]} : vector<4x4x2x8x32xbf16> to vector<4x4x1x8x32xbf16>
    %105 = vector.shape_cast %104 : vector<4x4x1x8x32xbf16> to vector<4x4x8x32xbf16>
    %106 = vector.extract_strided_slice %103 {offsets = [0, 0, 1, 0, 0], sizes = [4, 4, 1, 8, 32], strides = [1, 1, 1, 1, 1]} : vector<4x4x2x8x32xbf16> to vector<4x4x1x8x32xbf16>
    %107 = vector.shape_cast %106 : vector<4x4x1x8x32xbf16> to vector<4x4x8x32xbf16>
    %108 = arith.maximumf %105, %107 : vector<4x4x8x32xbf16>
    %cst_33 = arith.constant 0.000000e+00 : bf16
    %109 = vector.broadcast %cst_33 : bf16 to vector<1x4x8x32xbf16>
    %110 = tpu.concatenate %109, %108, %109 in 0 : vector<1x4x8x32xbf16>, vector<4x4x8x32xbf16>, vector<1x4x8x32xbf16> -> vector<6x4x8x32xbf16>
    %cst_34 = arith.constant 0.000000e+00 : bf16
    %111 = vector.broadcast %cst_34 : bf16 to vector<6x1x8x32xbf16>
    %112 = tpu.concatenate %111, %110, %111 in 1 : vector<6x1x8x32xbf16>, vector<6x4x8x32xbf16>, vector<6x1x8x32xbf16> -> vector<6x6x8x32xbf16>
    %113 = vector.extract_strided_slice %112 {offsets = [0, 0, 0, 0], sizes = [4, 4, 8, 32], strides = [1, 1, 1, 1]} : vector<6x6x8x32xbf16> to vector<4x4x8x32xbf16>
    %114 = vector.shape_cast %113 : vector<4x4x8x32xbf16> to vector<128x32xbf16>
    %c0_35 = arith.constant 0 : index
    %c0_36 = arith.constant 0 : index
    %115 = vector.load %arg15[%c0_35, %c0_36] : memref<128x288xbf16, #tpu.memory_space<vmem>>, vector<128x32xbf16>
    tpu.vector_store %arg15[%c0_35, %c0_36], %114 {strides = array<i32>} : memref<128x288xbf16, #tpu.memory_space<vmem>>, vector<128x32xbf16>,
    %116 = vector.extract_strided_slice %112 {offsets = [0, 1, 0, 0], sizes = [4, 4, 8, 32], strides = [1, 1, 1, 1]} : vector<6x6x8x32xbf16> to vector<4x4x8x32xbf16>
    %117 = vector.shape_cast %116 : vector<4x4x8x32xbf16> to vector<128x32xbf16>
    %c0_37 = arith.constant 0 : index
    %c32_38 = arith.constant 32 : index
    %118 = vector.load %arg15[%c0_37, %c32_38] : memref<128x288xbf16, #tpu.memory_space<vmem>>, vector<128x32xbf16>
    tpu.vector_store %arg15[%c0_37, %c32_38], %117 {strides = array<i32>} : memref<128x288xbf16, #tpu.memory_space<vmem>>, vector<128x32xbf16>,
    %119 = vector.extract_strided_slice %112 {offsets = [0, 2, 0, 0], sizes = [4, 4, 8, 32], strides = [1, 1, 1, 1]} : vector<6x6x8x32xbf16> to vector<4x4x8x32xbf16>
    %120 = vector.shape_cast %119 : vector<4x4x8x32xbf16> to vector<128x32xbf16>
    %c0_39 = arith.constant 0 : index
    %c64_40 = arith.constant 64 : index
    %121 = vector.load %arg15[%c0_39, %c64_40] : memref<128x288xbf16, #tpu.memory_space<vmem>>, vector<128x32xbf16>
    tpu.vector_store %arg15[%c0_39, %c64_40], %120 {strides = array<i32>} : memref<128x288xbf16, #tpu.memory_space<vmem>>, vector<128x32xbf16>,
    %122 = vector.extract_strided_slice %112 {offsets = [1, 0, 0, 0], sizes = [4, 4, 8, 32], strides = [1, 1, 1, 1]} : vector<6x6x8x32xbf16> to vector<4x4x8x32xbf16>
    %123 = vector.shape_cast %122 : vector<4x4x8x32xbf16> to vector<128x32xbf16>
    %c0_41 = arith.constant 0 : index
    %c96_42 = arith.constant 96 : index
    %124 = vector.load %arg15[%c0_41, %c96_42] : memref<128x288xbf16, #tpu.memory_space<vmem>>, vector<128x32xbf16>
    tpu.vector_store %arg15[%c0_41, %c96_42], %123 {strides = array<i32>} : memref<128x288xbf16, #tpu.memory_space<vmem>>, vector<128x32xbf16>,
    %125 = vector.extract_strided_slice %112 {offsets = [1, 1, 0, 0], sizes = [4, 4, 8, 32], strides = [1, 1, 1, 1]} : vector<6x6x8x32xbf16> to vector<4x4x8x32xbf16>
    %126 = vector.shape_cast %125 : vector<4x4x8x32xbf16> to vector<128x32xbf16>
    %c0_43 = arith.constant 0 : index
    %c128_44 = arith.constant 128 : index
    %127 = vector.load %arg15[%c0_43, %c128_44] : memref<128x288xbf16, #tpu.memory_space<vmem>>, vector<128x32xbf16>
    tpu.vector_store %arg15[%c0_43, %c128_44], %126 {strides = array<i32>} : memref<128x288xbf16, #tpu.memory_space<vmem>>, vector<128x32xbf16>,
    %128 = vector.extract_strided_slice %112 {offsets = [1, 2, 0, 0], sizes = [4, 4, 8, 32], strides = [1, 1, 1, 1]} : vector<6x6x8x32xbf16> to vector<4x4x8x32xbf16>
    %129 = vector.shape_cast %128 : vector<4x4x8x32xbf16> to vector<128x32xbf16>
    %c0_45 = arith.constant 0 : index
    %c160 = arith.constant 160 : index
    %130 = vector.load %arg15[%c0_45, %c160] : memref<128x288xbf16, #tpu.memory_space<vmem>>, vector<128x32xbf16>
    tpu.vector_store %arg15[%c0_45, %c160], %129 {strides = array<i32>} : memref<128x288xbf16, #tpu.memory_space<vmem>>, vector<128x32xbf16>,
    %131 = vector.extract_strided_slice %112 {offsets = [2, 0, 0, 0], sizes = [4, 4, 8, 32], strides = [1, 1, 1, 1]} : vector<6x6x8x32xbf16> to vector<4x4x8x32xbf16>
    %132 = vector.shape_cast %131 : vector<4x4x8x32xbf16> to vector<128x32xbf16>
    %c0_46 = arith.constant 0 : index
    %c192 = arith.constant 192 : index
    %133 = vector.load %arg15[%c0_46, %c192] : memref<128x288xbf16, #tpu.memory_space<vmem>>, vector<128x32xbf16>
    tpu.vector_store %arg15[%c0_46, %c192], %132 {strides = array<i32>} : memref<128x288xbf16, #tpu.memory_space<vmem>>, vector<128x32xbf16>,
    %134 = vector.extract_strided_slice %112 {offsets = [2, 1, 0, 0], sizes = [4, 4, 8, 32], strides = [1, 1, 1, 1]} : vector<6x6x8x32xbf16> to vector<4x4x8x32xbf16>
    %135 = vector.shape_cast %134 : vector<4x4x8x32xbf16> to vector<128x32xbf16>
    %c0_47 = arith.constant 0 : index
    %c224 = arith.constant 224 : index
    %136 = vector.load %arg15[%c0_47, %c224] : memref<128x288xbf16, #tpu.memory_space<vmem>>, vector<128x32xbf16>
    tpu.vector_store %arg15[%c0_47, %c224], %135 {strides = array<i32>} : memref<128x288xbf16, #tpu.memory_space<vmem>>, vector<128x32xbf16>,
    %137 = vector.extract_strided_slice %112 {offsets = [2, 2, 0, 0], sizes = [4, 4, 8, 32], strides = [1, 1, 1, 1]} : vector<6x6x8x32xbf16> to vector<4x4x8x32xbf16>
    %138 = vector.shape_cast %137 : vector<4x4x8x32xbf16> to vector<128x32xbf16>
    %c0_48 = arith.constant 0 : index
    %c256 = arith.constant 256 : index
    %139 = vector.load %arg15[%c0_48, %c256] : memref<128x288xbf16, #tpu.memory_space<vmem>>, vector<128x32xbf16>
    tpu.vector_store %arg15[%c0_48, %c256], %138 {strides = array<i32>} : memref<128x288xbf16, #tpu.memory_space<vmem>>, vector<128x32xbf16>,
    %c0_49 = arith.constant 0 : index
    %c0_50 = arith.constant 0 : index
    %140 = vector.load %arg15[%c0_49, %c0_50] : memref<128x288xbf16, #tpu.memory_space<vmem>>, vector<128x288xbf16>
    %c0_51 = arith.constant 0 : index
    %c0_52 = arith.constant 0 : index
    %141 = vector.load %arg6[%c0_51, %c0_52] : memref<288x64xbf16, #tpu.memory_space<vmem>>, vector<288x64xbf16>
    %cst_53 = arith.constant dense<0.000000e+00> : vector<128x64xf32>
    %142 = tpu.matmul %140, %141, %cst_53 {dimension_numbers = #tpu.dot_dimension_numbers<[1], [0], [0], [1], [0, 0, 1, 1], [], []>} : vector<128x288xbf16>, vector<288x64xbf16>, vector<128x64xf32> -> vector<128x64xf32>
    %c0_54 = arith.constant 0 : index
    %c0_55 = arith.constant 0 : index
    %143 = vector.load %arg7[%c0_54, %c0_55] : memref<1x64xf32, #tpu.memory_space<vmem>>, vector<1x64xf32>
    %144 = vector.broadcast %143 : vector<1x64xf32> to vector<128x64xf32>
    %145 = arith.addf %142, %144 : vector<128x64xf32>
    %cst_56 = arith.constant 0.000000e+00 : f32
    %146 = vector.broadcast %cst_56 : f32 to vector<128x64xf32>
    %147 = arith.maximumf %145, %146 : vector<128x64xf32>
    %148 = arith.truncf %147 : vector<128x64xf32> to vector<128x64xbf16>
    %149 = vector.shape_cast %148 : vector<128x64xbf16> to vector<2x2x2x2x8x64xbf16>
    %150 = vector.extract_strided_slice %149 {offsets = [0, 0, 0, 0, 0, 0], sizes = [2, 1, 2, 2, 8, 64], strides = [1, 1, 1, 1, 1, 1]} : vector<2x2x2x2x8x64xbf16> to vector<2x1x2x2x8x64xbf16>
    %151 = vector.shape_cast %150 : vector<2x1x2x2x8x64xbf16> to vector<2x2x2x8x64xbf16>
    %152 = vector.extract_strided_slice %149 {offsets = [0, 1, 0, 0, 0, 0], sizes = [2, 1, 2, 2, 8, 64], strides = [1, 1, 1, 1, 1, 1]} : vector<2x2x2x2x8x64xbf16> to vector<2x1x2x2x8x64xbf16>
    %153 = vector.shape_cast %152 : vector<2x1x2x2x8x64xbf16> to vector<2x2x2x8x64xbf16>
    %154 = arith.maximumf %151, %153 : vector<2x2x2x8x64xbf16>
    %155 = vector.extract_strided_slice %154 {offsets = [0, 0, 0, 0, 0], sizes = [2, 2, 1, 8, 64], strides = [1, 1, 1, 1, 1]} : vector<2x2x2x8x64xbf16> to vector<2x2x1x8x64xbf16>
    %156 = vector.shape_cast %155 : vector<2x2x1x8x64xbf16> to vector<2x2x8x64xbf16>
    %157 = vector.extract_strided_slice %154 {offsets = [0, 0, 1, 0, 0], sizes = [2, 2, 1, 8, 64], strides = [1, 1, 1, 1, 1]} : vector<2x2x2x8x64xbf16> to vector<2x2x1x8x64xbf16>
    %158 = vector.shape_cast %157 : vector<2x2x1x8x64xbf16> to vector<2x2x8x64xbf16>
    %159 = arith.maximumf %156, %158 : vector<2x2x8x64xbf16>
    %cst_57 = arith.constant 0.000000e+00 : bf16
    %160 = vector.broadcast %cst_57 : bf16 to vector<1x2x8x64xbf16>
    %161 = tpu.concatenate %160, %159, %160 in 0 : vector<1x2x8x64xbf16>, vector<2x2x8x64xbf16>, vector<1x2x8x64xbf16> -> vector<4x2x8x64xbf16>
    %cst_58 = arith.constant 0.000000e+00 : bf16
    %162 = vector.broadcast %cst_58 : bf16 to vector<4x1x8x64xbf16>
    %163 = tpu.concatenate %162, %161, %162 in 1 : vector<4x1x8x64xbf16>, vector<4x2x8x64xbf16>, vector<4x1x8x64xbf16> -> vector<4x4x8x64xbf16>
    %164 = vector.extract_strided_slice %163 {offsets = [0, 0, 0, 0], sizes = [2, 2, 8, 64], strides = [1, 1, 1, 1]} : vector<4x4x8x64xbf16> to vector<2x2x8x64xbf16>
    %165 = vector.shape_cast %164 : vector<2x2x8x64xbf16> to vector<32x64xbf16>
    %c0_59 = arith.constant 0 : index
    %c0_60 = arith.constant 0 : index
    %166 = vector.load %arg16[%c0_59, %c0_60] : memref<32x576xbf16, #tpu.memory_space<vmem>>, vector<32x64xbf16>
    tpu.vector_store %arg16[%c0_59, %c0_60], %165 {strides = array<i32>} : memref<32x576xbf16, #tpu.memory_space<vmem>>, vector<32x64xbf16>,
    %167 = vector.extract_strided_slice %163 {offsets = [0, 1, 0, 0], sizes = [2, 2, 8, 64], strides = [1, 1, 1, 1]} : vector<4x4x8x64xbf16> to vector<2x2x8x64xbf16>
    %168 = vector.shape_cast %167 : vector<2x2x8x64xbf16> to vector<32x64xbf16>
    %c0_61 = arith.constant 0 : index
    %c64_62 = arith.constant 64 : index
    %169 = vector.load %arg16[%c0_61, %c64_62] : memref<32x576xbf16, #tpu.memory_space<vmem>>, vector<32x64xbf16>
    tpu.vector_store %arg16[%c0_61, %c64_62], %168 {strides = array<i32>} : memref<32x576xbf16, #tpu.memory_space<vmem>>, vector<32x64xbf16>,
    %170 = vector.extract_strided_slice %163 {offsets = [0, 2, 0, 0], sizes = [2, 2, 8, 64], strides = [1, 1, 1, 1]} : vector<4x4x8x64xbf16> to vector<2x2x8x64xbf16>
    %171 = vector.shape_cast %170 : vector<2x2x8x64xbf16> to vector<32x64xbf16>
    %c0_63 = arith.constant 0 : index
    %c128_64 = arith.constant 128 : index
    %172 = vector.load %arg16[%c0_63, %c128_64] : memref<32x576xbf16, #tpu.memory_space<vmem>>, vector<32x64xbf16>
    tpu.vector_store %arg16[%c0_63, %c128_64], %171 {strides = array<i32>} : memref<32x576xbf16, #tpu.memory_space<vmem>>, vector<32x64xbf16>,
    %173 = vector.extract_strided_slice %163 {offsets = [1, 0, 0, 0], sizes = [2, 2, 8, 64], strides = [1, 1, 1, 1]} : vector<4x4x8x64xbf16> to vector<2x2x8x64xbf16>
    %174 = vector.shape_cast %173 : vector<2x2x8x64xbf16> to vector<32x64xbf16>
    %c0_65 = arith.constant 0 : index
    %c192_66 = arith.constant 192 : index
    %175 = vector.load %arg16[%c0_65, %c192_66] : memref<32x576xbf16, #tpu.memory_space<vmem>>, vector<32x64xbf16>
    tpu.vector_store %arg16[%c0_65, %c192_66], %174 {strides = array<i32>} : memref<32x576xbf16, #tpu.memory_space<vmem>>, vector<32x64xbf16>,
    %176 = vector.extract_strided_slice %163 {offsets = [1, 1, 0, 0], sizes = [2, 2, 8, 64], strides = [1, 1, 1, 1]} : vector<4x4x8x64xbf16> to vector<2x2x8x64xbf16>
    %177 = vector.shape_cast %176 : vector<2x2x8x64xbf16> to vector<32x64xbf16>
    %c0_67 = arith.constant 0 : index
    %c256_68 = arith.constant 256 : index
    %178 = vector.load %arg16[%c0_67, %c256_68] : memref<32x576xbf16, #tpu.memory_space<vmem>>, vector<32x64xbf16>
    tpu.vector_store %arg16[%c0_67, %c256_68], %177 {strides = array<i32>} : memref<32x576xbf16, #tpu.memory_space<vmem>>, vector<32x64xbf16>,
    %179 = vector.extract_strided_slice %163 {offsets = [1, 2, 0, 0], sizes = [2, 2, 8, 64], strides = [1, 1, 1, 1]} : vector<4x4x8x64xbf16> to vector<2x2x8x64xbf16>
    %180 = vector.shape_cast %179 : vector<2x2x8x64xbf16> to vector<32x64xbf16>
    %c0_69 = arith.constant 0 : index
    %c320 = arith.constant 320 : index
    %181 = vector.load %arg16[%c0_69, %c320] : memref<32x576xbf16, #tpu.memory_space<vmem>>, vector<32x64xbf16>
    tpu.vector_store %arg16[%c0_69, %c320], %180 {strides = array<i32>} : memref<32x576xbf16, #tpu.memory_space<vmem>>, vector<32x64xbf16>,
    %182 = vector.extract_strided_slice %163 {offsets = [2, 0, 0, 0], sizes = [2, 2, 8, 64], strides = [1, 1, 1, 1]} : vector<4x4x8x64xbf16> to vector<2x2x8x64xbf16>
    %183 = vector.shape_cast %182 : vector<2x2x8x64xbf16> to vector<32x64xbf16>
    %c0_70 = arith.constant 0 : index
    %c384 = arith.constant 384 : index
    %184 = vector.load %arg16[%c0_70, %c384] : memref<32x576xbf16, #tpu.memory_space<vmem>>, vector<32x64xbf16>
    tpu.vector_store %arg16[%c0_70, %c384], %183 {strides = array<i32>} : memref<32x576xbf16, #tpu.memory_space<vmem>>, vector<32x64xbf16>,
    %185 = vector.extract_strided_slice %163 {offsets = [2, 1, 0, 0], sizes = [2, 2, 8, 64], strides = [1, 1, 1, 1]} : vector<4x4x8x64xbf16> to vector<2x2x8x64xbf16>
    %186 = vector.shape_cast %185 : vector<2x2x8x64xbf16> to vector<32x64xbf16>
    %c0_71 = arith.constant 0 : index
    %c448 = arith.constant 448 : index
    %187 = vector.load %arg16[%c0_71, %c448] : memref<32x576xbf16, #tpu.memory_space<vmem>>, vector<32x64xbf16>
    tpu.vector_store %arg16[%c0_71, %c448], %186 {strides = array<i32>} : memref<32x576xbf16, #tpu.memory_space<vmem>>, vector<32x64xbf16>,
    %188 = vector.extract_strided_slice %163 {offsets = [2, 2, 0, 0], sizes = [2, 2, 8, 64], strides = [1, 1, 1, 1]} : vector<4x4x8x64xbf16> to vector<2x2x8x64xbf16>
    %189 = vector.shape_cast %188 : vector<2x2x8x64xbf16> to vector<32x64xbf16>
    %c0_72 = arith.constant 0 : index
    %c512 = arith.constant 512 : index
    %190 = vector.load %arg16[%c0_72, %c512] : memref<32x576xbf16, #tpu.memory_space<vmem>>, vector<32x64xbf16>
    tpu.vector_store %arg16[%c0_72, %c512], %189 {strides = array<i32>} : memref<32x576xbf16, #tpu.memory_space<vmem>>, vector<32x64xbf16>,
    %c0_73 = arith.constant 0 : index
    %c0_74 = arith.constant 0 : index
    %191 = vector.load %arg16[%c0_73, %c0_74] : memref<32x576xbf16, #tpu.memory_space<vmem>>, vector<32x576xbf16>
    %c0_75 = arith.constant 0 : index
    %c0_76 = arith.constant 0 : index
    %192 = vector.load %arg8[%c0_75, %c0_76] : memref<576x128xbf16, #tpu.memory_space<vmem>>, vector<576x128xbf16>
    %cst_77 = arith.constant dense<0.000000e+00> : vector<32x128xf32>
    %193 = tpu.matmul %191, %192, %cst_77 {dimension_numbers = #tpu.dot_dimension_numbers<[1], [0], [0], [1], [0, 0, 1, 1], [], []>} : vector<32x576xbf16>, vector<576x128xbf16>, vector<32x128xf32> -> vector<32x128xf32>
    %c0_78 = arith.constant 0 : index
    %c0_79 = arith.constant 0 : index
    %194 = vector.load %arg9[%c0_78, %c0_79] : memref<1x128xf32, #tpu.memory_space<vmem>>, vector<1x128xf32>
    %195 = vector.broadcast %194 : vector<1x128xf32> to vector<32x128xf32>
    %196 = arith.addf %193, %195 : vector<32x128xf32>
    %cst_80 = arith.constant 0.000000e+00 : f32
    %197 = vector.broadcast %cst_80 : f32 to vector<32x128xf32>
    %198 = arith.maximumf %196, %197 : vector<32x128xf32>
    %199 = arith.truncf %198 : vector<32x128xf32> to vector<32x128xbf16>
    %200 = vector.shape_cast %199 : vector<32x128xbf16> to vector<1x2x1x2x8x128xbf16>
    %201 = vector.extract_strided_slice %200 {offsets = [0, 0, 0, 0, 0, 0], sizes = [1, 1, 1, 2, 8, 128], strides = [1, 1, 1, 1, 1, 1]} : vector<1x2x1x2x8x128xbf16> to vector<1x1x1x2x8x128xbf16>
    %202 = vector.shape_cast %201 : vector<1x1x1x2x8x128xbf16> to vector<1x1x2x8x128xbf16>
    %203 = vector.extract_strided_slice %200 {offsets = [0, 1, 0, 0, 0, 0], sizes = [1, 1, 1, 2, 8, 128], strides = [1, 1, 1, 1, 1, 1]} : vector<1x2x1x2x8x128xbf16> to vector<1x1x1x2x8x128xbf16>
    %204 = vector.shape_cast %203 : vector<1x1x1x2x8x128xbf16> to vector<1x1x2x8x128xbf16>
    %205 = arith.maximumf %202, %204 : vector<1x1x2x8x128xbf16>
    %206 = vector.extract_strided_slice %205 {offsets = [0, 0, 0, 0, 0], sizes = [1, 1, 1, 8, 128], strides = [1, 1, 1, 1, 1]} : vector<1x1x2x8x128xbf16> to vector<1x1x1x8x128xbf16>
    %207 = vector.shape_cast %206 : vector<1x1x1x8x128xbf16> to vector<1x1x8x128xbf16>
    %208 = vector.extract_strided_slice %205 {offsets = [0, 0, 1, 0, 0], sizes = [1, 1, 1, 8, 128], strides = [1, 1, 1, 1, 1]} : vector<1x1x2x8x128xbf16> to vector<1x1x1x8x128xbf16>
    %209 = vector.shape_cast %208 : vector<1x1x1x8x128xbf16> to vector<1x1x8x128xbf16>
    %210 = arith.maximumf %207, %209 : vector<1x1x8x128xbf16>
    %211 = vector.shape_cast %210 : vector<1x1x8x128xbf16> to vector<8x128xbf16>
    %c0_81 = arith.constant 0 : index
    %c0_82 = arith.constant 0 : index
    %212 = vector.load %arg10[%c0_81, %c0_82] : memref<128x128xbf16, #tpu.memory_space<vmem>>, vector<128x128xbf16>
    %cst_83 = arith.constant dense<0.000000e+00> : vector<8x128xf32>
    %213 = tpu.matmul %211, %212, %cst_83 {dimension_numbers = #tpu.dot_dimension_numbers<[1], [0], [0], [1], [0, 0, 1, 1], [], []>} : vector<8x128xbf16>, vector<128x128xbf16>, vector<8x128xf32> -> vector<8x128xf32>
    %c0_84 = arith.constant 0 : index
    %c0_85 = arith.constant 0 : index
    %214 = vector.load %arg11[%c0_84, %c0_85] : memref<1x128xf32, #tpu.memory_space<vmem>>, vector<1x128xf32>
    %215 = vector.broadcast %214 : vector<1x128xf32> to vector<8x128xf32>
    %216 = arith.addf %213, %215 : vector<8x128xf32>
    %c0_86 = arith.constant 0 : index
    %c0_87 = arith.constant 0 : index
    %217 = vector.load %arg12[%c0_86, %c0_87] : memref<8x128xf32, #tpu.memory_space<vmem>>, vector<8x128xf32>
    tpu.vector_store %arg12[%c0_86, %c0_87], %216 {strides = array<i32>} : memref<8x128xf32, #tpu.memory_space<vmem>>, vector<8x128xf32>,
    return
  }
  func.func @transform_0(%arg0: i32) -> (i32, i32, i32) {
    %c0_i32 = arith.constant 0 : i32
    %c0_i32_0 = arith.constant 0 : i32
    %c0_i32_1 = arith.constant 0 : i32
    return %c0_i32, %arg0, %c0_i32_0 : i32, i32, i32
  }
  func.func @transform_1(%arg0: i32) -> (i32, i32) {
    %c0_i32 = arith.constant 0 : i32
    %c0_i32_0 = arith.constant 0 : i32
    %c0_i32_1 = arith.constant 0 : i32
    return %c0_i32, %c0_i32_0 : i32, i32
  }
  func.func @transform_2(%arg0: i32) -> (i32, i32) {
    %c0_i32 = arith.constant 0 : i32
    %c0_i32_0 = arith.constant 0 : i32
    %c0_i32_1 = arith.constant 0 : i32
    return %c0_i32, %c0_i32_0 : i32, i32
  }
  func.func @transform_3(%arg0: i32) -> (i32, i32) {
    %c0_i32 = arith.constant 0 : i32
    %c0_i32_0 = arith.constant 0 : i32
    %c0_i32_1 = arith.constant 0 : i32
    return %c0_i32, %c0_i32_0 : i32, i32
  }
  func.func @transform_4(%arg0: i32) -> (i32, i32) {
    %c0_i32 = arith.constant 0 : i32
    %c0_i32_0 = arith.constant 0 : i32
    %c0_i32_1 = arith.constant 0 : i32
    return %c0_i32, %c0_i32_0 : i32, i32
  }
  func.func @transform_5(%arg0: i32) -> (i32, i32) {
    %c0_i32 = arith.constant 0 : i32
    %c0_i32_0 = arith.constant 0 : i32
    %c0_i32_1 = arith.constant 0 : i32
    return %c0_i32, %c0_i32_0 : i32, i32
  }
  func.func @transform_6(%arg0: i32) -> (i32, i32) {
    %c0_i32 = arith.constant 0 : i32
    %c0_i32_0 = arith.constant 0 : i32
    %c0_i32_1 = arith.constant 0 : i32
    return %c0_i32, %c0_i32_0 : i32, i32
  }
  func.func @transform_7(%arg0: i32) -> (i32, i32) {
    %c0_i32 = arith.constant 0 : i32
    %c0_i32_0 = arith.constant 0 : i32
    %c0_i32_1 = arith.constant 0 : i32
    return %c0_i32, %c0_i32_0 : i32, i32
  }
  func.func @transform_8(%arg0: i32) -> (i32, i32) {
    %c0_i32 = arith.constant 0 : i32
    %c0_i32_0 = arith.constant 0 : i32
    %c0_i32_1 = arith.constant 0 : i32
    return %c0_i32, %c0_i32_0 : i32, i32
  }
  func.func @transform_9(%arg0: i32) -> (i32, i32) {
    %c0_i32 = arith.constant 0 : i32
    %c0_i32_0 = arith.constant 0 : i32
    %c0_i32_1 = arith.constant 0 : i32
    return %c0_i32, %c0_i32_0 : i32, i32
  }
  func.func @transform_10(%arg0: i32) -> (i32, i32) {
    %c0_i32 = arith.constant 0 : i32
    %c0_i32_0 = arith.constant 0 : i32
    %c0_i32_1 = arith.constant 0 : i32
    return %c0_i32, %c0_i32_0 : i32, i32
  }
  func.func @transform_11(%arg0: i32) -> (i32, i32) {
    %c0_i32 = arith.constant 0 : i32
    %c0_i32_0 = arith.constant 0 : i32
    return %arg0, %c0_i32 : i32, i32
  }
}

</mosaic_0001>

<bundles_post_ra>
// kernel: tile.8
= control target key start
LH: loop header
LB: loop body
LE: loop exit
PB: predicated region body
PF: predicated region fallthrough
CT: control target
= control target key end

     0   :  { %s28_s0 = inlined_call_operand.vmem [shape: f32[16], index: 0, kind: input, shape index: {}]   ;;  %s29_s1 = inlined_call_operand.vmem [shape: f32[16,16], index: 1, kind: output, shape index: {}]  }
   0x1   :  { %v4_v0 = vld [vmem:[%s28_s0] ss:$0 sm:$0xff] }
   0x2   :  { %5 = vst [vmem:[%s29_s1] sm:$0xff] %v4_v0  ;;  %8 = vst [vmem:[%s29_s1 + $0x8] sm:$0xff] %v4_v0 }

// kernel: tile.9
= control target key start
LH: loop header
LB: loop body
LE: loop exit
PB: predicated region body
PF: predicated region fallthrough
CT: control target
= control target key end

     0   :  { %s7_s6 = smov 3  ;;  %s21_s9 = smov 3  ;;  %vm4_vm0 = vcmask 130048   ;;  %vm11_vm1 = vcmask 1048448   ;;  %vm18_vm2 = vcmask 917248   ;;  %vm25_vm3 = vcmask 786048   ;;  %s128_s0 = inlined_call_operand.vmem [shape: f32[16,16], index: 0, kind: input, shape index: {}]   ;;  %s129_s1 = inlined_call_operand.vmem [shape: f32[1,256], index: 1, kind: output, shape index: {}]  }
   0x1   :  { %v66_v0 = vld [vmem:[%s128_s0 + $0x7] ss:$8 sm:%s7_s6]   ;;  %s81_s10 = smov 112   ;;  %v68_v1 = vld [vmem:[%s128_s0 + $0x5] ss:$8 sm:%s21_s9]   ;;  %s14_s13 = smov 3 }
   0x2   :  { %9 = vrot.lane.b32.xlu0 %v66_v0, %s81_s10  ;;  %s82_s14 = smov 80   ;;  %v67_v2 = vld [vmem:[%s128_s0 + $0x6] ss:$8 sm:%s14_s13]   ;;  %s28_s17 = smov 3  ;;  %vm32_vm4 = vcmask 654848   ;;  %vm39_vm5 = vcmask 523648  }
   0x3   :  { %23 = vrot.lane.b32.xlu1 %v68_v1, %s82_s14  ;;  %v69_v3 = vld [vmem:[%s128_s0 + $0x4] ss:$8 sm:%s28_s17]   ;;  %s35_s20 = smov 3  ;;  %s42_s21 = smov 3  ;;  %vm46_vm6 = vcmask 392448   ;;  %vm53_vm7 = vcmask 261248  }
   0x4   :  { %s83_s22 = smov 96   ;;  %s84_s23 = smov 64   ;;  %v70_v4 = vld [vmem:[%s128_s0 + $0x3] ss:$8 sm:%s35_s20]   ;;  %v71_v5 = vld [vmem:[%s128_s0 + $0x2] ss:$8 sm:%s42_s21]  }
   0x5   :  { %s2_s26 = smov 3  ;;  %s49_s29 = smov 3 }
   0x6   :  { %16 = vrot.lane.b32.xlu0 %v67_v2, %s83_s22  ;;  %v3_v6 = vld [vmem:[%s128_s0] ss:$8 sm:%s2_s26]   ;;  %s85_s3 = smov 48   ;;  %s86_s4 = smov 32  }
   0x7   :  { %30 = vrot.lane.b32.xlu1 %v69_v3, %s84_s23  ;;  %5 = vst.msk [vmem:[#allocation0] ss:$8 sm:$0x3] %vm4_vm0, %v3_v6   ;;  %v72_v7 = vld [vmem:[%s128_s0 + $0x1] ss:$8 sm:%s49_s29]   ;;  %s87_s0 = smov 16  }
   0xa   :  { %37 = vrot.lane.b32.xlu0 %v70_v4, %s85_s3 }
   0xb   :  { %44 = vrot.lane.b32.xlu1 %v71_v5, %s86_s4 }
   0xe   :  { %51 = vrot.lane.b32.xlu0 %v72_v7, %s87_s0 }
  0x74   :  { %v10_v8 = vpop.permute.xlu0 %9  }
  0x75   :  { %12 = vst.msk [vmem:[#allocation0] ss:$8 sm:$0x3] %vm11_vm1, %v10_v8   ;;  %v24_v9 = vpop.permute.xlu1 %23  }
  0x78   :  { %v17_v10 = vpop.permute.xlu0 %16  }
  0x79   :  { %19 = vst.msk [vmem:[#allocation0] ss:$8 sm:$0x3] %vm18_vm2, %v17_v10   ;;  %v31_v11 = vpop.permute.xlu1 %30  }
  0x7a   :  { %26 = vst.msk [vmem:[#allocation0] ss:$8 sm:$0x3] %vm25_vm3, %v24_v9  }
  0x7b   :  { %33 = vst.msk [vmem:[#allocation0] ss:$8 sm:$0x3] %vm32_vm4, %v31_v11  }
  0x7c   :  { %v38_v12 = vpop.permute.xlu0 %37  }
  0x7d   :  { %40 = vst.msk [vmem:[#allocation0] ss:$8 sm:$0x3] %vm39_vm5, %v38_v12   ;;  %v45_v13 = vpop.permute.xlu1 %44  }
  0x7e   :  { %47 = vst.msk [vmem:[#allocation0] ss:$8 sm:$0x3] %vm46_vm6, %v45_v13  }
  0x80   :  { %v52_v14 = vpop.permute.xlu0 %51  }
  0x81   :  { %54 = vst.msk [vmem:[#allocation0] ss:$8 sm:$0x3] %vm53_vm7, %v52_v14  }
  0x88   :  { %v58_v15 = vld [vmem:[#allocation0] sm:$0x1]  ;;  %v62_v16 = vld [vmem:[#allocation0 + $0x8] sm:$0x1] }
  0x89   :  { %60 = vst [vmem:[%s129_s1] sm:$0x1] %v58_v15  ;;  %73 = vst [vmem:[%s129_s1 + $0x1] sm:$0x1] %v62_v16 }

// kernel: cnn_forward.1
= control target key start
LH: loop header
LB: loop body
LE: loop exit
PB: predicated region body
PF: predicated region fallthrough
CT: control target
= control target key end

     0   :  { %vm105_vm0 = vcmask 146432   ;;  %s5088_s16 = smov 18   ;;  %s5089_s14 = smov 36   ;;  %v7388_v29 = vmov 0   ;;  %vm280_vm1 = vcmask 1042432   ;;  %vm148_vm2 = vcmask 294032   ;;  %s7375_s0 = inlined_call_operand.vmem [shape: bf16[18,8,18], index: 0, kind: input, shape index: {}]   ;;  %s7376_s1 = inlined_call_operand.vmem [shape: bf16[54,256], index: 1, kind: input, shape index: {}]   ;;  %s7377_s2 = inlined_call_operand.vmem [shape: f32[1,256], index: 2, kind: input, shape index: {}]   ;;  %s7378_s3 = inlined_call_operand.vmem [shape: bf16[144,32], index: 3, kind: input, shape index: {}]   ;;  %s7379_s4 = inlined_call_operand.vmem [shape: f32[1,32], index: 4, kind: input, shape index: {}]   ;;  %s7380_s5 = inlined_call_operand.vmem [shape: bf16[288,64], index: 5, kind: input, shape index: {}]   ;;  %s7381_s7 = inlined_call_operand.vmem [shape: bf16[576,128], index: 7, kind: input, shape index: {}]   ;;  %s7382_s6 = inlined_call_operand.vmem [shape: f32[1,64], index: 6, kind: input, shape index: {}]   ;;  %s7383_s9 = inlined_call_operand.vmem [shape: bf16[128,128], index: 9, kind: input, shape index: {}]   ;;  %s7384_s8 = inlined_call_operand.vmem [shape: f32[1,128], index: 8, kind: input, shape index: {}]   ;;  %s7385_s10 = inlined_call_operand.vmem [shape: f32[1,128], index: 10, kind: input, shape index: {}]   ;;  %s7386_s11 = inlined_call_operand.vmem [shape: f32[8,128], index: 11, kind: output, shape index: {}]  }
   0x1   :  { %v40_v0 = vld [vmem:[%s7375_s0 + $0x4] sm:$0xf]  ;;  %v41_v1 = vld [vmem:[%s7375_s0 + $0x8] sm:$0xf]  ;;  %v42_v2 = vld [vmem:[%s7375_s0 + $0xc] sm:$0xf]  ;;  %319 = vmatprep.mubr.bf16.mxu0 %v7388_v29  ;;  %2269 = vmatprep.subr.bf16.mxu1 %v7388_v29 }
   0x2   :  { %v4330_v3 = vcombine.low %v41_v1, %v42_v2  ;;  %v4337_v4 = vcombine.low %v40_v0, %v41_v1  ;;  %v39_v5 = vld [vmem:[%s7375_s0] sm:$0xf]  ;;  %v43_v6 = vld [vmem:[%s7375_s0 + $0x10] sm:$0xf]  ;;  %v44_v7 = vld [vmem:[%s7375_s0 + $0x14] sm:$0xf] }
   0x3   :  { %v4329_v8 = vcombine.low %v39_v5, %v40_v0  ;;  %v4331_v9 = vcombine.low %v43_v6, %v44_v7  ;;  %v4338_v10 = vcombine.low %v42_v2, %v43_v6  ;;  %v45_v11 = vld [vmem:[%s7375_s0 + $0x18] sm:$0xf]  ;;  %v46_v12 = vld [vmem:[%s7375_s0 + $0x1c] sm:$0xf]  ;;  %v47_v13 = vld [vmem:[%s7375_s0 + $0x20] sm:$0xf]  ;;  %v5294_v6 = vcombine.low %v7388_v29, %v7388_v29 }
   0x4   :  { %124 = vrot.lane.b32.xlu0 %v4337_v4, %s5088_s16  ;;  %v4332_v14 = vcombine.low %v45_v11, %v46_v12  ;;  %v48_v15 = vld [vmem:[%s7375_s0 + $0x24] sm:$0xf]  ;;  %v49_v16 = vld [vmem:[%s7375_s0 + $0x28] sm:$0xf]  ;;  %v50_v17 = vld [vmem:[%s7375_s0 + $0x2c] sm:$0xf]  ;;  %v4339_v27 = vcombine.low %v44_v7, %v45_v11  ;;  %v4340_v33 = vcombine.low %v46_v12, %v47_v13  ;;  %v210_v7 = vlaneseq }
   0x5   :  { %107 = vst.msk [vmem:[#allocation2 + $0x8] sm:$0xff] %vm105_vm0, %v4330_v3  ;;  %126 = vrot.lane.b32.xlu1 %v4338_v10, %s5088_s16  ;;  %v4333_v18 = vcombine.low %v47_v13, %v48_v15  ;;  %v4334_v19 = vcombine.low %v49_v16, %v50_v17  ;;  %v51_v20 = vld [vmem:[%s7375_s0 + $0x30] sm:$0xf]  ;;  %v52_v21 = vld [vmem:[%s7375_s0 + $0x34] sm:$0xf]  ;;  %106 = vst.msk [vmem:[#allocation2] sm:$0xff] %vm105_vm0, %v4329_v8  ;;  %v4341_v38 = vcombine.low %v48_v15, %v49_v16 }
   0x6   :  { %v53_v22 = vld [vmem:[%s7375_s0 + $0x38] sm:$0xf]  ;;  %108 = vst.msk [vmem:[#allocation2 + $0x10] sm:$0xff] %vm105_vm0, %v4331_v9  ;;  %v4335_v23 = vcombine.low %v51_v20, %v52_v21  ;;  %v54_v24 = vld [vmem:[%s7375_s0 + $0x3c] sm:$0xf]  ;;  %109 = vst.msk [vmem:[#allocation2 + $0x18] sm:$0xff] %vm105_vm0, %v4332_v14  ;;  %v4342_v40 = vcombine.low %v50_v17, %v51_v20 }
   0x7   :  { %v4336_v25 = vcombine.low %v53_v22, %v54_v24  ;;  %v5005_v26 = vld [vmem:[%s7376_s1 + $0x4] ss:$8 sps:$4 sm:$0xff]   ;;  %110 = vst.msk [vmem:[#allocation2 + $0x20] sm:$0xff] %vm105_vm0, %v4333_v18  ;;  %111 = vst.msk [vmem:[#allocation2 + $0x28] sm:$0xff] %vm105_vm0, %v4334_v19  ;;  %v5007_v28 = vld [vmem:[%s7376_s1] ss:$8 sps:$4 sm:$0xff]   ;;  %v4343_v41 = vcombine.low %v52_v21, %v53_v22 }
   0x8   :  { %160 = vrot.lane.b32.xlu0 %v4330_v3, %s5089_s14  ;;  %112 = vst.msk [vmem:[#allocation2 + $0x30] sm:$0xff] %vm105_vm0, %v4335_v23  ;;  %287 = vmatprep.subr.bf16.mxu0 %v5005_v26  ;;  %v5008_v30 = vld [vmem:[%s7376_s1 + $0x14] ss:$8 sps:$4 sm:$0xff]   ;;  %v5010_v31 = vld [vmem:[%s7376_s1 + $0x10] ss:$8 sps:$4 sm:$0xff]   ;;  %vm184_vm3 = vcmask 441632  }
   0x9   :  { %162 = vrot.lane.b32.xlu1 %v4331_v9, %s5089_s14  ;;  %113 = vst.msk [vmem:[#allocation2 + $0x38] sm:$0xff] %vm105_vm0, %v4336_v25  ;;  %288 = vmatpush1.bf16.msra.mxu0 %v5007_v28  ;;  %v5011_v32 = vld [vmem:[%s7376_s1 + $0x24] ss:$8 sps:$4 sm:$0xff]   ;;  %v207_v34 = vld [vmem:[%s7376_s1 + $0x30] sm:$0x77]  ;;  %vm255_vm4 = vcmask 441344  }
   0xa   :  { %289 = vmatprep.subr.bf16.mxu0 %v5008_v30  ;;  %v5013_v35 = vld [vmem:[%s7376_s1 + $0x20] ss:$8 sps:$4 sm:$0xff]   ;;  %v4353_v36 = vcombine.high %v207_v34, %v207_v34  ;;  %v4352_v37 = vcombine.low %v207_v34, %v207_v34  ;;  %v56_v43 = vld [vmem:[%s7375_s0 + $0x44] sm:$0xf]  ;;  %v211_v8 = vshrl.u32 %v210_v7, 7  ;;  %vm1018_vm5 = vcmask 130048  }
   0xb   :  { %v55_v42 = vld [vmem:[%s7375_s0 + $0x40] sm:$0xf]  ;;  %s5091_s0 = smov 32   ;;  %1019 = vst.msk [vmem:[#allocation3] sm:$0xff] %vm1018_vm5, %v5294_v6  ;;  %1020 = vst.msk [vmem:[#allocation3 + $0x10] sm:$0xff] %vm1018_vm5, %v5294_v6  ;;  %vm1180_vm6 = vcmask 261248  }
   0xc   :  { %128 = vrot.lane.b32.xlu0 %v4339_v27, %s5088_s16  ;;  %v282_v39 = vsel %vm280_vm1, %v4352_v37, 0  ;;  %v4344_v44 = vcombine.low %v54_v24, %v55_v42  ;;  %v4345_v45 = vcombine.low %v55_v42, %v56_v43  ;;  %v212_v9 = vsub.s32 0, %v211_v8  ;;  %v208_v10 = vld [vmem:[%s7377_s2] sm:$0x3]  ;;  %1021 = vst.msk [vmem:[#allocation3 + $0x20] sm:$0xff] %vm1018_vm5, %v5294_v6  ;;  %1022 = vst.msk [vmem:[#allocation3 + $0x30] sm:$0xff] %vm1018_vm5, %v5294_v6 }
   0xd   :  { %164 = vrot.lane.b32.xlu1 %v4332_v14, %s5089_s14  ;;  %290 = vmatpush1.bf16.msra.mxu0 %v5010_v31  ;;  %v216_v11 = vsub.s32 1, %v211_v8  ;;  %2026 = vst.msk [vmem:[#allocation3 + $0x1c8] sm:$0xff] %vm1018_vm5, %v5294_v6  ;;  %2027 = vst.msk [vmem:[#allocation3 + $0x1d8] sm:$0xff] %vm1018_vm5, %v5294_v6  ;;  %vm2956_vm7 = vcmask 261120   ;;  %vm1307_vm8 = vcmask 392448   ;;  %vm2995_vm9 = vcmask 523520  }
   0xe   :  { %291 = vmatprep.subr.bf16.mxu0 %v5011_v32  ;;  %2028 = vst.msk [vmem:[#allocation3 + $0x1e8] sm:$0xff] %vm1018_vm5, %v5294_v6  ;;  %2029 = vst.msk [vmem:[#allocation3 + $0x1f8] sm:$0xff] %vm1018_vm5, %v5294_v6  ;;  %v5323_v13 = vrot.slane %v208_v10, %v212_v9  ;;  %s5093_s2 = smov 80   ;;  %s5095_s15 = smov 48   ;;  %vm1450_vm10 = vcmask 523648   ;;  %vm1585_vm11 = vcmask 654848  }
   0xf   :  { %v5325_v14 = vrot.slane %v208_v10, %v216_v11  ;;  %2957 = vst.msk [vmem:[#allocation4] sm:$0xff] %vm2956_vm7, %v5294_v6  ;;  %2958 = vst.msk [vmem:[#allocation4 + $0x18] sm:$0xff] %vm2956_vm7, %v5294_v6  ;;  %s5096_s17 = smov 96   ;;  %s5097_s18 = smov 64   ;;  %vm1715_vm12 = vcmask 786048   ;;  %vm1835_vm13 = vcmask 917248  }
  0x10   :  { %130 = vrot.lane.b32.xlu0 %v4340_v33, %s5088_s16  ;;  %3187 = vst.msk [vmem:[#allocation4 + $0xa0] sm:$0xff] %vm2956_vm7, %v5294_v6  ;;  %3188 = vst.msk [vmem:[#allocation4 + $0xb8] sm:$0xff] %vm2956_vm7, %v5294_v6  ;;  %vm1955_vm14 = vcmask 1048448   ;;  %vm3678_vm15 = vcmask 523264   ;;  %vm3687_vm0 = vcmask 1048064  }
  0x11   :  { %166 = vrot.lane.b32.xlu1 %v4333_v18, %s5089_s14  ;;  %292 = vmatpush1.bf16.msra.mxu0 %v5013_v35  ;;  %3679 = vst.msk [vmem:[#allocation5] sm:$0xff] %vm3678_vm15, %v5294_v6  ;;  %3723 = vst.msk [vmem:[#allocation5 + $0x40] sm:$0xff] %vm3678_vm15, %v5294_v6 }
  0x12   :  { %4354 = vmatprep.subr.msk.bf16.mxu0 %vm280_vm1, %v4353_v36  ;;  %3692 = vst.msk [vmem:[#allocation5 + $0x8] sm:$0xff] %vm3678_vm15, %v5294_v6  ;;  %3731 = vst.msk [vmem:[#allocation5 + $0x48] sm:$0xff] %vm3678_vm15, %v5294_v6  ;;  %vm3028_vm1 = vcmask 785920  }
  0x14   :  { %132 = vrot.lane.b32.xlu0 %v4341_v38, %s5088_s16 }
  0x15   :  { %168 = vrot.lane.b32.xlu1 %v4334_v19, %s5089_s14  ;;  %294 = vmatpush1.bf16.msra.mxu0 %v282_v39 }
  0x18   :  { %134 = vrot.lane.b32.xlu0 %v4342_v40, %s5088_s16 }
  0x19   :  { %170 = vrot.lane.b32.xlu1 %v4335_v23, %s5089_s14 }
  0x1c   :  { %136 = vrot.lane.b32.xlu0 %v4343_v41, %s5088_s16 }
  0x1d   :  { %172 = vrot.lane.b32.xlu1 %v4336_v25, %s5089_s14 }
  0x20   :  { %138 = vrot.lane.b32.xlu0 %v4344_v44, %s5088_s16  ;;  %s5092_s16 = smov 16  }
  0x21   :  { %174 = vrot.lane.b32.xlu1 %v4345_v45, %s5089_s14  ;;  %s5094_s14 = smov 112  }
  0x24   :  { %1093 = vrot.lane.b32.xlu0 %v5294_v6, %s5092_s16 }
  0x25   :  { %1220 = vrot.lane.b32.xlu1 %v5294_v6, %s5091_s0 }
  0x76   :  { %v125_v46 = vpop.permute.xlu0 %124 }
  0x77   :  { %149 = vst.msk [vmem:[#allocation2] sm:$0xff] %vm148_vm2, %v125_v46  ;;  %v127_v47 = vpop.permute.xlu1 %126 }
  0x78   :  { %150 = vst.msk [vmem:[#allocation2 + $0x8] sm:$0xff] %vm148_vm2, %v127_v47 }
  0x7a   :  { %v161_v48 = vpop.permute.xlu0 %160 }
  0x7b   :  { %185 = vst.msk [vmem:[#allocation2] sm:$0xff] %vm184_vm3, %v161_v48  ;;  %v163_v49 = vpop.permute.xlu1 %162 }
  0x7c   :  { %186 = vst.msk [vmem:[#allocation2 + $0x8] sm:$0xff] %vm184_vm3, %v163_v49 }
  0x7e   :  { %v129_v50 = vpop.permute.xlu0 %128 }
  0x7f   :  { %151 = vst.msk [vmem:[#allocation2 + $0x10] sm:$0xff] %vm148_vm2, %v129_v50  ;;  %v165_v51 = vpop.permute.xlu1 %164 }
  0x80   :  { %187 = vst.msk [vmem:[#allocation2 + $0x10] sm:$0xff] %vm184_vm3, %v165_v51 }
  0x82   :  { %v193_v52 = vld [vmem:[#allocation2] sm:$0xff]  ;;  %v131_v53 = vpop.permute.xlu0 %130 }
  0x83   :  { %4355 = vmatmul.mubr.msk.bf16.vlgmr.msra.gmra.mrb[0].mxu0 %vm255_vm4, %v193_v52  ;;  %152 = vst.msk [vmem:[#allocation2 + $0x18] sm:$0xff] %vm148_vm2, %v131_v53  ;;  %v167_v54 = vpop.permute.xlu1 %166  ;;  %v194_v57 = vld [vmem:[#allocation2 + $0x8] sm:$0xff] }
  0x84   :  { %329 = vmatprep.mubr.bf16.mxu0 %v7388_v29  ;;  %188 = vst.msk [vmem:[#allocation2 + $0x18] sm:$0xff] %vm184_vm3, %v167_v54 }
  0x86   :  { %v133_v55 = vpop.permute.xlu0 %132 }
  0x87   :  { %153 = vst.msk [vmem:[#allocation2 + $0x20] sm:$0xff] %vm148_vm2, %v133_v55  ;;  %v169_v56 = vpop.permute.xlu1 %168  ;;  %v195_v62 = vld [vmem:[#allocation2 + $0x10] sm:$0xff] }
  0x88   :  { %189 = vst.msk [vmem:[#allocation2 + $0x20] sm:$0xff] %vm184_vm3, %v169_v56 }
  0x8a   :  { %v135_v58 = vpop.permute.xlu0 %134 }
  0x8b   :  { %4356 = vmatmul.mubr.msk.bf16.gmra.mrb[4].mxu0 %vm255_vm4, %v194_v57  ;;  %154 = vst.msk [vmem:[#allocation2 + $0x28] sm:$0xff] %vm148_vm2, %v135_v58  ;;  %v171_v59 = vpop.permute.xlu1 %170  ;;  %v196_v1 = vld [vmem:[#allocation2 + $0x18] sm:$0xff] }
  0x8c   :  { %339 = vmatprep.mubr.bf16.mxu0 %v7388_v29  ;;  %190 = vst.msk [vmem:[#allocation2 + $0x28] sm:$0xff] %vm184_vm3, %v171_v59 }
  0x8e   :  { %v137_v60 = vpop.permute.xlu0 %136 }
  0x8f   :  { %155 = vst.msk [vmem:[#allocation2 + $0x30] sm:$0xff] %vm148_vm2, %v137_v60  ;;  %v173_v61 = vpop.permute.xlu1 %172  ;;  %v197_v2 = vld [vmem:[#allocation2 + $0x20] sm:$0xff] }
  0x90   :  { %191 = vst.msk [vmem:[#allocation2 + $0x30] sm:$0xff] %vm184_vm3, %v173_v61 }
  0x92   :  { %v139_v63 = vpop.permute.xlu0 %138 }
  0x93   :  { %4357 = vmatmul.mubr.msk.bf16.gmra.mrb[8].mxu0 %vm255_vm4, %v195_v62  ;;  %156 = vst.msk [vmem:[#allocation2 + $0x38] sm:$0xff] %vm148_vm2, %v139_v63  ;;  %v175_v0 = vpop.permute.xlu1 %174  ;;  %v198_v3 = vld [vmem:[#allocation2 + $0x28] sm:$0xff]  ;;  %vm3069_vm2 = vcmask 1048320  }
  0x94   :  { %349 = vmatprep.mubr.bf16.mxu0 %v7388_v29  ;;  %192 = vst.msk [vmem:[#allocation2 + $0x38] sm:$0xff] %vm184_vm3, %v175_v0  ;;  %vm5099_vm3 = vmmov 0  }
  0x96   :  { %v1094_v12 = vpop.permute.xlu0 %1093 }
  0x97   :  { %v199_v4 = vld [vmem:[#allocation2 + $0x30] sm:$0xff]  ;;  %1181 = vst.msk [vmem:[#allocation3] sm:$0xff] %vm1180_vm6, %v1094_v12  ;;  %1182 = vst.msk [vmem:[#allocation3 + $0x10] sm:$0xff] %vm1180_vm6, %v1094_v12  ;;  %v1221_v15 = vpop.permute.xlu1 %1220 }
  0x98   :  { %1183 = vst.msk [vmem:[#allocation3 + $0x20] sm:$0xff] %vm1180_vm6, %v1094_v12  ;;  %1184 = vst.msk [vmem:[#allocation3 + $0x30] sm:$0xff] %vm1180_vm6, %v1094_v12 }
  0x99   :  { %1308 = vst.msk [vmem:[#allocation3] sm:$0xff] %vm1307_vm8, %v1221_v15  ;;  %1309 = vst.msk [vmem:[#allocation3 + $0x10] sm:$0xff] %vm1307_vm8, %v1221_v15 }
  0x9a   :  { %1310 = vst.msk [vmem:[#allocation3 + $0x20] sm:$0xff] %vm1307_vm8, %v1221_v15  ;;  %1311 = vst.msk [vmem:[#allocation3 + $0x30] sm:$0xff] %vm1307_vm8, %v1221_v15 }
  0x9b   :  { %4358 = vmatmul.mubr.msk.bf16.gmra.mrb[12].mxu0 %vm255_vm4, %v196_v1  ;;  %v200_v5 = vld [vmem:[#allocation2 + $0x38] sm:$0xff]  ;;  %2996 = vst.msk [vmem:[#allocation4] sm:$0xff] %vm2995_vm9, %v1221_v15  ;;  %2997 = vst.msk [vmem:[#allocation4 + $0x18] sm:$0xff] %vm2995_vm9, %v1221_v15 }
  0x9c   :  { %359 = vmatprep.mubr.bf16.mxu0 %v7388_v29 }
  0xa3   :  { %4359 = vmatmul.mubr.msk.bf16.gmra.mrb[16].mxu0 %vm255_vm4, %v197_v2 }
  0xa4   :  { %369 = vmatprep.mubr.bf16.mxu0 %v7388_v29 }
  0xab   :  { %4360 = vmatmul.mubr.msk.bf16.gmra.mrb[20].mxu0 %vm255_vm4, %v198_v3 }
  0xac   :  { %379 = vmatprep.mubr.bf16.mxu0 %v7388_v29 }
  0xb3   :  { %4361 = vmatmul.mubr.msk.bf16.gmra.mrb[24].mxu0 %vm255_vm4, %v199_v4 }
  0xb4   :  { %389 = vmatprep.mubr.bf16.mxu0 %v7388_v29 }
  0xbb   :  { %4362 = vmatmul.mubr.msk.bf16.gmra.mrb[28].mxu0 %vm255_vm4, %v200_v5 }
 0x156   :  { %v321_v16 = vpop.f32.mrb[0].mxu0 }
 0x157   :  { %v322_v17 = vadd.f32 %v321_v16, %v5323_v13  ;;  %v323_v18 = vpop.f32.mrb[1].mxu0 }
 0x158   :  { %v324_v19 = vadd.f32 %v323_v18, %v5325_v14  ;;  %v325_v20 = vpop.f32.mrb[2].mxu0 }
 0x159   :  { %v400_v21 = vmax.f32 %v322_v17, 0.0  ;;  %v326_v22 = vadd.f32 %v325_v20, %v5323_v13  ;;  %v327_v23 = vpop.f32.mrb[3].mxu0 }
 0x15a   :  { %v401_v24 = vmax.f32 %v324_v19, 0.0  ;;  %v328_v25 = vadd.f32 %v327_v23, %v5325_v14 }
 0x15b   :  { %v402_v26 = vmax.f32 %v326_v22, 0.0 }
 0x15c   :  { %v4679_v27 = vpack.c.bf16 %v401_v24, %v400_v21  ;;  %v403_v28 = vmax.f32 %v328_v25, 0.0 }
 0x15e   :  { %v4680_v30 = vpack.c.bf16 %v403_v28, %v402_v26  ;;  %v331_v31 = vpop.f32.mrb[4].mxu0 }
 0x15f   :  { %v332_v32 = vadd.f32 %v331_v31, %v5323_v13  ;;  %v333_v33 = vpop.f32.mrb[5].mxu0 }
 0x160   :  { %v5346_v34 = vmax.bf16 %v4680_v30, %v4679_v27  ;;  %v334_v35 = vadd.f32 %v333_v33, %v5325_v14  ;;  %v335_v36 = vpop.f32.mrb[6].mxu0 }
 0x161   :  { %v404_v37 = vmax.f32 %v332_v32, 0.0  ;;  %v336_v38 = vadd.f32 %v335_v36, %v5323_v13  ;;  %v337_v39 = vpop.f32.mrb[7].mxu0 }
 0x162   :  { %648 = vrot.lane.b32.xlu1 %v5346_v34, %s5093_s2  ;;  %544 = vrot.lane.b32.xlu0 %v5346_v34, %s5094_s14  ;;  %v405_v40 = vmax.f32 %v334_v35, 0.0  ;;  %v338_v41 = vadd.f32 %v337_v39, %v5325_v14 }
 0x163   :  { %v406_v42 = vmax.f32 %v336_v38, 0.0 }
 0x164   :  { %v4681_v43 = vpack.c.bf16 %v405_v40, %v404_v37  ;;  %v407_v44 = vmax.f32 %v338_v41, 0.0 }
 0x166   :  { %v4682_v45 = vpack.c.bf16 %v407_v44, %v406_v42  ;;  %720 = vrot.lane.b32.xlu1 %v5346_v34, %s5095_s15  ;;  %616 = vrot.lane.b32.xlu0 %v5346_v34, %s5096_s17  ;;  %v341_v46 = vpop.f32.mrb[8].mxu0 }
 0x167   :  { %v342_v47 = vadd.f32 %v341_v46, %v5323_v13  ;;  %v343_v48 = vpop.f32.mrb[9].mxu0 }
 0x168   :  { %v5360_v49 = vmax.bf16 %v4682_v45, %v4681_v43  ;;  %v344_v50 = vadd.f32 %v343_v48, %v5325_v14  ;;  %v345_v51 = vpop.f32.mrb[10].mxu0 }
 0x169   :  { %v408_v52 = vmax.f32 %v342_v47, 0.0  ;;  %v346_v53 = vadd.f32 %v345_v51, %v5323_v13  ;;  %v347_v54 = vpop.f32.mrb[11].mxu0 }
 0x16a   :  { %792 = vrot.lane.b32.xlu1 %v5346_v34, %s5092_s16  ;;  %688 = vrot.lane.b32.xlu0 %v5346_v34, %s5097_s18  ;;  %v409_v55 = vmax.f32 %v344_v50, 0.0  ;;  %v348_v56 = vadd.f32 %v347_v54, %v5325_v14 }
 0x16b   :  { %v410_v57 = vmax.f32 %v346_v53, 0.0 }
 0x16c   :  { %v4683_v58 = vpack.c.bf16 %v409_v55, %v408_v52  ;;  %v411_v59 = vmax.f32 %v348_v56, 0.0 }
 0x16e   :  { %546 = vrot.lane.b32.xlu1 %v5360_v49, %s5094_s14  ;;  %760 = vrot.lane.b32.xlu0 %v5346_v34, %s5091_s0  ;;  %v4684_v60 = vpack.c.bf16 %v411_v59, %v410_v57  ;;  %v351_v61 = vpop.f32.mrb[12].mxu0 }
 0x16f   :  { %v352_v62 = vadd.f32 %v351_v61, %v5323_v13  ;;  %v353_v63 = vpop.f32.mrb[13].mxu0 }
 0x170   :  { %v5374_v0 = vmax.bf16 %v4684_v60, %v4683_v58  ;;  %v354_v1 = vadd.f32 %v353_v63, %v5325_v14  ;;  %v355_v2 = vpop.f32.mrb[14].mxu0 }
 0x171   :  { %v412_v3 = vmax.f32 %v352_v62, 0.0  ;;  %v356_v4 = vadd.f32 %v355_v2, %v5323_v13  ;;  %v357_v5 = vpop.f32.mrb[15].mxu0 }
 0x172   :  { %650 = vrot.lane.b32.xlu1 %v5360_v49, %s5093_s2  ;;  %618 = vrot.lane.b32.xlu0 %v5360_v49, %s5096_s17  ;;  %v413_v7 = vmax.f32 %v354_v1, 0.0  ;;  %v358_v8 = vadd.f32 %v357_v5, %v5325_v14 }
 0x173   :  { %v414_v9 = vmax.f32 %v356_v4, 0.0 }
 0x174   :  { %v4685_v10 = vpack.c.bf16 %v413_v7, %v412_v3  ;;  %v415_v11 = vmax.f32 %v358_v8, 0.0 }
 0x176   :  { %722 = vrot.lane.b32.xlu1 %v5360_v49, %s5095_s15  ;;  %690 = vrot.lane.b32.xlu0 %v5360_v49, %s5097_s18  ;;  %v4686_v12 = vpack.c.bf16 %v415_v11, %v414_v9  ;;  %v361_v15 = vpop.f32.mrb[16].mxu0 }
 0x177   :  { %v362_v16 = vadd.f32 %v361_v15, %v5323_v13  ;;  %v363_v17 = vpop.f32.mrb[17].mxu0 }
 0x178   :  { %v5388_v18 = vmax.bf16 %v4686_v12, %v4685_v10  ;;  %v364_v19 = vadd.f32 %v363_v17, %v5325_v14  ;;  %v365_v20 = vpop.f32.mrb[18].mxu0 }
 0x179   :  { %v416_v21 = vmax.f32 %v362_v16, 0.0  ;;  %v366_v22 = vadd.f32 %v365_v20, %v5323_v13  ;;  %v367_v23 = vpop.f32.mrb[19].mxu0 }
 0x17a   :  { %794 = vrot.lane.b32.xlu1 %v5360_v49, %s5092_s16  ;;  %762 = vrot.lane.b32.xlu0 %v5360_v49, %s5091_s0  ;;  %v417_v24 = vmax.f32 %v364_v19, 0.0  ;;  %v368_v25 = vadd.f32 %v367_v23, %v5325_v14 }
 0x17b   :  { %v418_v26 = vmax.f32 %v366_v22, 0.0 }
 0x17c   :  { %v4687_v27 = vpack.c.bf16 %v417_v24, %v416_v21  ;;  %v419_v28 = vmax.f32 %v368_v25, 0.0 }
 0x17e   :  { %652 = vrot.lane.b32.xlu1 %v5374_v0, %s5093_s2  ;;  %548 = vrot.lane.b32.xlu0 %v5374_v0, %s5094_s14  ;;  %v4688_v30 = vpack.c.bf16 %v419_v28, %v418_v26  ;;  %v371_v31 = vpop.f32.mrb[20].mxu0  ;;  %v576_v26 = vrot.slane %v5346_v34, 4 }
 0x17f   :  { %v372_v32 = vadd.f32 %v371_v31, %v5323_v13  ;;  %v373_v33 = vpop.f32.mrb[21].mxu0 }
 0x180   :  { %v5402_v35 = vmax.bf16 %v4688_v30, %v4687_v27  ;;  %v374_v36 = vadd.f32 %v373_v33, %v5325_v14  ;;  %v375_v37 = vpop.f32.mrb[22].mxu0 }
 0x181   :  { %v420_v38 = vmax.f32 %v372_v32, 0.0  ;;  %v376_v39 = vadd.f32 %v375_v37, %v5323_v13  ;;  %v377_v40 = vpop.f32.mrb[23].mxu0 }
 0x182   :  { %724 = vrot.lane.b32.xlu1 %v5374_v0, %s5095_s15  ;;  %620 = vrot.lane.b32.xlu0 %v5374_v0, %s5096_s17  ;;  %v421_v41 = vmax.f32 %v374_v36, 0.0  ;;  %v378_v42 = vadd.f32 %v377_v40, %v5325_v14 }
 0x183   :  { %v422_v43 = vmax.f32 %v376_v39, 0.0 }
 0x184   :  { %v4689_v44 = vpack.c.bf16 %v421_v41, %v420_v38  ;;  %v423_v45 = vmax.f32 %v378_v42, 0.0 }
 0x186   :  { %796 = vrot.lane.b32.xlu1 %v5374_v0, %s5092_s16  ;;  %692 = vrot.lane.b32.xlu0 %v5374_v0, %s5097_s18  ;;  %v4690_v46 = vpack.c.bf16 %v423_v45, %v422_v43  ;;  %v381_v47 = vpop.f32.mrb[24].mxu0 }
 0x187   :  { %v382_v48 = vadd.f32 %v381_v47, %v5323_v13  ;;  %v383_v50 = vpop.f32.mrb[25].mxu0 }
 0x188   :  { %v5416_v51 = vmax.bf16 %v4690_v46, %v4689_v44  ;;  %v384_v52 = vadd.f32 %v383_v50, %v5325_v14  ;;  %v385_v53 = vpop.f32.mrb[26].mxu0 }
 0x189   :  { %v424_v54 = vmax.f32 %v382_v48, 0.0  ;;  %v386_v55 = vadd.f32 %v385_v53, %v5323_v13  ;;  %v387_v56 = vpop.f32.mrb[27].mxu0 }
 0x18a   :  { %654 = vrot.lane.b32.xlu1 %v5388_v18, %s5093_s2  ;;  %764 = vrot.lane.b32.xlu0 %v5374_v0, %s5091_s0  ;;  %v425_v57 = vmax.f32 %v384_v52, 0.0  ;;  %v388_v58 = vadd.f32 %v387_v56, %v5325_v14 }
 0x18b   :  { %v426_v59 = vmax.f32 %v386_v55, 0.0 }
 0x18c   :  { %v4691_v60 = vpack.c.bf16 %v425_v57, %v424_v54  ;;  %v427_v61 = vmax.f32 %v388_v58, 0.0 }
 0x18e   :  { %726 = vrot.lane.b32.xlu1 %v5388_v18, %s5095_s15  ;;  %550 = vrot.lane.b32.xlu0 %v5388_v18, %s5094_s14  ;;  %v4692_v62 = vpack.c.bf16 %v427_v61, %v426_v59  ;;  %v391_v63 = vpop.f32.mrb[28].mxu0 }
 0x18f   :  { %v392_v1 = vadd.f32 %v391_v63, %v5323_v13  ;;  %v393_v2 = vpop.f32.mrb[29].mxu0 }
 0x190   :  { %v5430_v3 = vmax.bf16 %v4692_v62, %v4691_v60  ;;  %v394_v4 = vadd.f32 %v393_v2, %v5325_v14  ;;  %v395_v5 = vpop.f32.mrb[30].mxu0 }
 0x191   :  { %v428_v7 = vmax.f32 %v392_v1, 0.0  ;;  %v396_v8 = vadd.f32 %v395_v5, %v5323_v13  ;;  %v397_v9 = vpop.f32.mrb[31].mxu0 }
 0x192   :  { %766 = vrot.lane.b32.xlu1 %v5388_v18, %s5091_s0  ;;  %622 = vrot.lane.b32.xlu0 %v5388_v18, %s5096_s17  ;;  %v429_v10 = vmax.f32 %v394_v4, 0.0  ;;  %v398_v11 = vadd.f32 %v397_v9, %v5325_v14 }
 0x193   :  { %v430_v12 = vmax.f32 %v396_v8, 0.0 }
 0x194   :  { %v4693_v15 = vpack.c.bf16 %v429_v10, %v428_v7  ;;  %v431_v16 = vmax.f32 %v398_v11, 0.0 }
 0x196   :  { %552 = vrot.lane.b32.xlu1 %v5402_v35, %s5094_s14  ;;  %694 = vrot.lane.b32.xlu0 %v5388_v18, %s5097_s18  ;;  %v4694_v13 = vpack.c.bf16 %v431_v16, %v430_v12 }
 0x198   :  { %v5443_v17 = vmax.bf16 %v4694_v13, %v4693_v15 }
 0x19a   :  { %656 = vrot.lane.b32.xlu1 %v5402_v35, %s5093_s2  ;;  %798 = vrot.lane.b32.xlu0 %v5388_v18, %s5092_s16 }
 0x19e   :  { %728 = vrot.lane.b32.xlu1 %v5402_v35, %s5095_s15  ;;  %624 = vrot.lane.b32.xlu0 %v5402_v35, %s5096_s17 }
 0x1a2   :  { %768 = vrot.lane.b32.xlu1 %v5402_v35, %s5091_s0  ;;  %696 = vrot.lane.b32.xlu0 %v5402_v35, %s5097_s18 }
 0x1a6   :  { %800 = vrot.lane.b32.xlu0 %v5402_v35, %s5092_s16  ;;  %658 = vrot.lane.b32.xlu1 %v5416_v51, %s5093_s2 }
 0x1aa   :  { %554 = vrot.lane.b32.xlu0 %v5416_v51, %s5094_s14  ;;  %730 = vrot.lane.b32.xlu1 %v5416_v51, %s5095_s15 }
 0x1ae   :  { %626 = vrot.lane.b32.xlu0 %v5416_v51, %s5096_s17  ;;  %770 = vrot.lane.b32.xlu1 %v5416_v51, %s5091_s0 }
 0x1b2   :  { %698 = vrot.lane.b32.xlu0 %v5416_v51, %s5097_s18  ;;  %628 = vrot.lane.b32.xlu1 %v5430_v3, %s5096_s17 }
 0x1b6   :  { %802 = vrot.lane.b32.xlu0 %v5416_v51, %s5092_s16  ;;  %700 = vrot.lane.b32.xlu1 %v5430_v3, %s5097_s18 }
 0x1ba   :  { %556 = vrot.lane.b32.xlu0 %v5430_v3, %s5094_s14  ;;  %804 = vrot.lane.b32.xlu1 %v5430_v3, %s5092_s16 }
 0x1be   :  { %660 = vrot.lane.b32.xlu0 %v5430_v3, %s5093_s2  ;;  %662 = vrot.lane.b32.xlu1 %v5443_v17, %s5093_s2 }
 0x1c2   :  { %732 = vrot.lane.b32.xlu0 %v5430_v3, %s5095_s15  ;;  %734 = vrot.lane.b32.xlu1 %v5443_v17, %s5095_s15 }
 0x1c6   :  { %772 = vrot.lane.b32.xlu0 %v5430_v3, %s5091_s0  ;;  %774 = vrot.lane.b32.xlu1 %v5443_v17, %s5091_s0 }
 0x1ca   :  { %558 = vrot.lane.b32.xlu0 %v5443_v17, %s5094_s14 }
 0x1ce   :  { %630 = vrot.lane.b32.xlu0 %v5443_v17, %s5096_s17 }
 0x1d2   :  { %702 = vrot.lane.b32.xlu0 %v5443_v17, %s5097_s18 }
 0x1d4   :  { %v649_v14 = vpop.permute.xlu1 %648  ;;  %v545_v19 = vpop.permute.xlu0 %544 }
 0x1d5   :  { %v5500_v20 = vmax.bf16 %v545_v19, %v5346_v34  ;;  %v592_v21 = vrot.slane %v545_v19, 4  ;;  %v664_v25 = vrot.slane %v649_v14, 4 }
 0x1d6   :  { %806 = vrot.lane.b32.xlu0 %v5443_v17, %s5092_s16 }
 0x1d7   :  { %840 = vrot.lane.b32.xlu1 %v5500_v20, %s5096_s17  ;;  %v4380_v22 = vcombine.low %v7388_v29, %v5500_v20  ;;  %v5512_v28 = vmax.bf16 %v592_v21, %v576_v26  ;;  %v577_v21 = vrot.slane %v5360_v49, 4 }
 0x1d8   :  { %v721_v23 = vpop.permute.xlu1 %720  ;;  %v617_v24 = vpop.permute.xlu0 %616 }
 0x1d9   :  { %v632_v27 = vrot.slane %v617_v24, 4  ;;  %1023 = vst.msk [vmem:[#allocation3 + $0x40] sm:$0xff] %vm1018_vm5, %v4380_v22  ;;  %v736_v33 = vrot.slane %v721_v23, 4 }
 0x1da   :  { %856 = vrot.lane.b32.xlu0 %v5500_v20, %s5097_s18 }
 0x1db   :  { %v680_v30 = vmax.bf16 %v664_v25, %v632_v27  ;;  %872 = vrot.lane.b32.xlu1 %v5500_v20, %s5091_s0 }
 0x1dc   :  { %v793_v31 = vpop.permute.xlu1 %792  ;;  %v689_v32 = vpop.permute.xlu0 %688 }
 0x1dd   :  { %v704_v36 = vrot.slane %v689_v32, 4  ;;  %v4410_v37 = vcombine.low %v5512_v28, %v680_v30  ;;  %v808_v40 = vrot.slane %v793_v31, 4 }
 0x1de   :  { %1354 = vrot.lane.b32.xlu0 %v4380_v22, %s5095_s15 }
 0x1df   :  { %v752_v34 = vmax.bf16 %v736_v33, %v704_v36  ;;  %1493 = vrot.lane.b32.xlu1 %v4410_v37, %s5097_s18 }
 0x1e0   :  { %v547_v38 = vpop.permute.xlu1 %546  ;;  %v761_v39 = vpop.permute.xlu0 %760 }
 0x1e1   :  { %v4383_v41 = vcombine.low %v680_v30, %v752_v34  ;;  %v5520_v42 = vmax.bf16 %v547_v38, %v5360_v49  ;;  %v776_v43 = vrot.slane %v761_v39, 4  ;;  %v593_v12 = vrot.slane %v547_v38, 4 }
 0x1e3   :  { %v824_v44 = vmax.bf16 %v808_v40, %v776_v43  ;;  %1623 = vrot.lane.b32.xlu0 %v4383_v41, %s5093_s2  ;;  %1360 = vrot.lane.b32.xlu1 %v4383_v41, %s5095_s15  ;;  %1026 = vst.msk [vmem:[#allocation3 + $0x70] sm:$0xff] %vm1018_vm5, %v4383_v41  ;;  %v4384_v45 = vcombine.low %v7388_v29, %v5520_v42 }
 0x1e4   :  { %v651_v46 = vpop.permute.xlu1 %650  ;;  %v619_v47 = vpop.permute.xlu0 %618  ;;  %v5566_v24 = vmax.bf16 %v593_v12, %v577_v21 }
 0x1e5   :  { %v4411_v48 = vcombine.low %v752_v34, %v824_v44  ;;  %v4436_v50 = vcombine.low %v824_v44, %v7388_v29  ;;  %1027 = vst.msk [vmem:[#allocation3 + $0x80] sm:$0xff] %vm1018_vm5, %v4384_v45  ;;  %v665_v52 = vrot.slane %v651_v46, 4  ;;  %v633_v53 = vrot.slane %v619_v47, 4 }
 0x1e7   :  { %1495 = vrot.lane.b32.xlu0 %v4411_v48, %s5097_s18  ;;  %1625 = vrot.lane.b32.xlu1 %v4436_v50, %s5093_s2  ;;  %v681_v58 = vmax.bf16 %v665_v52, %v633_v53 }
 0x1e8   :  { %v723_v54 = vpop.permute.xlu1 %722  ;;  %v691_v55 = vpop.permute.xlu0 %690 }
 0x1e9   :  { %v737_v56 = vrot.slane %v723_v54, 4  ;;  %v705_v57 = vrot.slane %v691_v55, 4  ;;  %v4414_v49 = vcombine.low %v5566_v24, %v681_v58 }
 0x1eb   :  { %v753_v59 = vmax.bf16 %v737_v56, %v705_v57  ;;  %1099 = vrot.lane.b32.xlu0 %v4410_v37, %s5092_s16  ;;  %1101 = vrot.lane.b32.xlu1 %v4411_v48, %s5092_s16 }
 0x1ec   :  { %v795_v60 = vpop.permute.xlu1 %794  ;;  %v763_v61 = vpop.permute.xlu0 %762 }
 0x1ed   :  { %v5533_v62 = vcombine.low %v681_v58, %v753_v59  ;;  %v809_v63 = vrot.slane %v795_v60, 4  ;;  %v777_v1 = vrot.slane %v763_v61, 4 }
 0x1ef   :  { %2000 = vst.msk [vmem:[#allocation3 + $0x28] sm:$0xff] %vm1018_vm5, %v5533_v62  ;;  %1030 = vst.msk [vmem:[#allocation3 + $0xb0] sm:$0xff] %vm1018_vm5, %v5533_v62  ;;  %v825_v2 = vmax.bf16 %v809_v63, %v777_v1  ;;  %1226 = vrot.lane.b32.xlu0 %v4383_v41, %s5091_s0  ;;  %842 = vrot.lane.b32.xlu1 %v5520_v42, %s5096_s17 }
 0x1f0   :  { %v653_v4 = vpop.permute.xlu1 %652  ;;  %v5542_v5 = vpop.permute.xlu0 %548 }
 0x1f1   :  { %v5546_v7 = vmax.bf16 %v5542_v5, %v5374_v0  ;;  %v5549_v8 = vcombine.low %v825_v2, %v7388_v29  ;;  %v666_v15 = vrot.slane %v653_v4, 4  ;;  %v4415_v23 = vcombine.low %v753_v59, %v825_v2 }
 0x1f2   :  { %v594_v4 = vrot.slane %v5542_v5, 4 }
 0x1f3   :  { %1228 = vrot.lane.b32.xlu0 %v4436_v50, %s5091_s0  ;;  %874 = vrot.lane.b32.xlu1 %v5520_v42, %s5091_s0  ;;  %v5556_v9 = vcombine.low %v7388_v29, %v5546_v7  ;;  %2001 = vst.msk [vmem:[#allocation3 + $0x38] sm:$0xff] %vm1018_vm5, %v5549_v8 }
 0x1f4   :  { %v725_v10 = vpop.permute.xlu1 %724  ;;  %v621_v11 = vpop.permute.xlu0 %620 }
 0x1f5   :  { %1031 = vst.msk [vmem:[#allocation3 + $0xc0] sm:$0xff] %vm1018_vm5, %v5556_v9  ;;  %v738_v16 = vrot.slane %v725_v10, 4  ;;  %v634_v13 = vrot.slane %v621_v11, 4 }
 0x1f7   :  { %858 = vrot.lane.b32.xlu0 %v5520_v42, %s5097_s18  ;;  %1748 = vrot.lane.b32.xlu1 %v4384_v45, %s5096_s17  ;;  %v5568_v25 = vmax.bf16 %v666_v15, %v634_v13 }
 0x1f8   :  { %v797_v14 = vpop.permute.xlu1 %796  ;;  %v693_v19 = vpop.permute.xlu0 %692 }
 0x1f9   :  { %v706_v22 = vrot.slane %v693_v19, 4  ;;  %v810_v31 = vrot.slane %v797_v14, 4 }
 0x1fb   :  { %v754_v26 = vmax.bf16 %v738_v16, %v706_v22  ;;  %1362 = vrot.lane.b32.xlu0 %v4384_v45, %s5095_s15  ;;  %1874 = vrot.lane.b32.xlu1 %v4415_v23, %s5094_s14  ;;  %v578_v16 = vrot.slane %v5374_v0, 4 }
 0x1fc   :  { %v655_v27 = vpop.permute.xlu1 %654  ;;  %v765_v30 = vpop.permute.xlu0 %764 }
 0x1fd   :  { %v5573_v32 = vcombine.low %v5568_v25, %v754_v26  ;;  %v778_v33 = vrot.slane %v765_v30, 4  ;;  %v667_v44 = vrot.slane %v655_v27, 4  ;;  %v5652_v5 = vmax.bf16 %v594_v4, %v578_v16 }
 0x1ff   :  { %2004 = vst.msk [vmem:[#allocation3 + $0x68] sm:$0xff] %vm1018_vm5, %v5573_v32  ;;  %1034 = vst.msk [vmem:[#allocation3 + $0xf0] sm:$0xff] %vm1018_vm5, %v5573_v32  ;;  %v826_v36 = vmax.bf16 %v810_v31, %v778_v33  ;;  %1872 = vrot.lane.b32.xlu0 %v4414_v49, %s5094_s14  ;;  %1501 = vrot.lane.b32.xlu1 %v4414_v49, %s5097_s18  ;;  %v4418_v0 = vcombine.low %v5652_v5, %v5568_v25 }
 0x200   :  { %v727_v37 = vpop.permute.xlu1 %726  ;;  %v5582_v34 = vpop.permute.xlu0 %550 }
 0x201   :  { %v5585_v38 = vcombine.low %v826_v36, %v7388_v29  ;;  %v5589_v39 = vmax.bf16 %v5582_v34, %v5388_v18  ;;  %v739_v48 = vrot.slane %v727_v37, 4  ;;  %v5650_v13 = vcombine.low %v754_v26, %v826_v36 }
 0x203   :  { %2005 = vst.msk [vmem:[#allocation3 + $0x78] sm:$0xff] %vm1018_vm5, %v5585_v38  ;;  %1754 = vrot.lane.b32.xlu0 %v5533_v62, %s5096_s17  ;;  %1368 = vrot.lane.b32.xlu1 %v5533_v62, %s5095_s15  ;;  %v5599_v40 = vcombine.low %v7388_v29, %v5589_v39 }
 0x204   :  { %v767_v41 = vpop.permute.xlu1 %766  ;;  %v623_v43 = vpop.permute.xlu0 %622 }
 0x205   :  { %1035 = vst.msk [vmem:[#allocation3 + $0x100] sm:$0xff] %vm1018_vm5, %v5599_v40  ;;  %v635_v45 = vrot.slane %v623_v43, 4  ;;  %v779_v58 = vrot.slane %v767_v41, 4 }
 0x207   :  { %1631 = vrot.lane.b32.xlu0 %v5533_v62, %s5093_s2  ;;  %1633 = vrot.lane.b32.xlu1 %v5549_v8, %s5093_s2  ;;  %v5613_v53 = vmax.bf16 %v667_v44, %v635_v45 }
 0x208   :  { %v5607_v46 = vpop.permute.xlu1 %552  ;;  %v695_v47 = vpop.permute.xlu0 %694 }
 0x209   :  { %v5611_v50 = vmax.bf16 %v5607_v46, %v5402_v35  ;;  %v707_v52 = vrot.slane %v695_v47, 4 }
 0x20b   :  { %v5615_v54 = vmax.bf16 %v739_v48, %v707_v52  ;;  %1503 = vrot.lane.b32.xlu0 %v4415_v23, %s5097_s18  ;;  %1109 = vrot.lane.b32.xlu1 %v4415_v23, %s5092_s16  ;;  %v5621_v55 = vcombine.low %v7388_v29, %v5611_v50 }
 0x20c   :  { %v657_v56 = vpop.permute.xlu1 %656  ;;  %v799_v57 = vpop.permute.xlu0 %798 }
 0x20d   :  { %v5625_v59 = vcombine.low %v5613_v53, %v5615_v54  ;;  %v811_v60 = vrot.slane %v799_v57, 4  ;;  %1039 = vst.msk [vmem:[#allocation3 + $0x140] sm:$0xff] %vm1018_vm5, %v5621_v55  ;;  %v668_v10 = vrot.slane %v657_v56, 4 }
 0x20f   :  { %2008 = vst.msk [vmem:[#allocation3 + $0xa8] sm:$0xff] %vm1018_vm5, %v5625_v59  ;;  %1038 = vst.msk [vmem:[#allocation3 + $0x130] sm:$0xff] %vm1018_vm5, %v5625_v59  ;;  %v5633_v61 = vmax.bf16 %v811_v60, %v779_v58  ;;  %1107 = vrot.lane.b32.xlu0 %v4414_v49, %s5092_s16  ;;  %876 = vrot.lane.b32.xlu1 %v5546_v7, %s5091_s0 }
 0x210   :  { %v729_v63 = vpop.permute.xlu1 %728  ;;  %v625_v1 = vpop.permute.xlu0 %624 }
 0x211   :  { %v5640_v2 = vcombine.low %v5633_v61, %v7388_v29  ;;  %v636_v11 = vrot.slane %v625_v1, 4  ;;  %v740_v14 = vrot.slane %v729_v63, 4 }
 0x213   :  { %2009 = vst.msk [vmem:[#allocation3 + $0xb8] sm:$0xff] %vm1018_vm5, %v5640_v2  ;;  %1234 = vrot.lane.b32.xlu0 %v5533_v62, %s5091_s0  ;;  %1756 = vrot.lane.b32.xlu1 %v5556_v9, %s5096_s17  ;;  %v5654_v21 = vmax.bf16 %v668_v10, %v636_v11 }
 0x214   :  { %v769_v12 = vpop.permute.xlu1 %768  ;;  %v697_v15 = vpop.permute.xlu0 %696 }
 0x215   :  { %v708_v19 = vrot.slane %v697_v15, 4  ;;  %v780_v26 = vrot.slane %v769_v12, 4 }
 0x217   :  { %v756_v22 = vmax.bf16 %v740_v14, %v708_v19  ;;  %1236 = vrot.lane.b32.xlu0 %v5549_v8, %s5091_s0  ;;  %1882 = vrot.lane.b32.xlu1 %v5650_v13, %s5094_s14 }
 0x218   :  { %v801_v62 = vpop.permute.xlu0 %800  ;;  %v659_v23 = vpop.permute.xlu1 %658 }
 0x219   :  { %v5663_v27 = vcombine.low %v5654_v21, %v756_v22  ;;  %v812_v30 = vrot.slane %v801_v62, 4  ;;  %v669_v44 = vrot.slane %v659_v23, 4 }
 0x21b   :  { %2012 = vst.msk [vmem:[#allocation3 + $0xe8] sm:$0xff] %vm1018_vm5, %v5663_v27  ;;  %1042 = vst.msk [vmem:[#allocation3 + $0x170] sm:$0xff] %vm1018_vm5, %v5663_v27  ;;  %v828_v8 = vmax.bf16 %v812_v30, %v780_v26  ;;  %844 = vrot.lane.b32.xlu0 %v5546_v7, %s5096_s17  ;;  %1509 = vrot.lane.b32.xlu1 %v4418_v0, %s5097_s18 }
 0x21c   :  { %v5672_v31 = vpop.permute.xlu0 %554  ;;  %v731_v25 = vpop.permute.xlu1 %730 }
 0x21d   :  { %v5674_v33 = vcombine.low %v756_v22, %v828_v8  ;;  %v5677_v49 = vcombine.low %v828_v8, %v7388_v29  ;;  %v5681_v36 = vmax.bf16 %v5672_v31, %v5416_v51  ;;  %v741_v48 = vrot.slane %v731_v25, 4 }
 0x21f   :  { %2013 = vst.msk [vmem:[#allocation3 + $0xf8] sm:$0xff] %vm1018_vm5, %v5677_v49  ;;  %860 = vrot.lane.b32.xlu0 %v5546_v7, %s5097_s18  ;;  %1376 = vrot.lane.b32.xlu1 %v5573_v32, %s5095_s15  ;;  %v5691_v37 = vcombine.low %v7388_v29, %v5681_v36 }
 0x220   :  { %v627_v41 = vpop.permute.xlu0 %626  ;;  %v771_v43 = vpop.permute.xlu1 %770 }
 0x221   :  { %1043 = vst.msk [vmem:[#allocation3 + $0x180] sm:$0xff] %vm1018_vm5, %v5691_v37  ;;  %v637_v45 = vrot.slane %v627_v41, 4  ;;  %v781_v63 = vrot.slane %v771_v43, 4 }
 0x223   :  { %1370 = vrot.lane.b32.xlu0 %v5556_v9, %s5095_s15  ;;  %1641 = vrot.lane.b32.xlu1 %v5585_v38, %s5093_s2  ;;  %v5699_v56 = vmax.bf16 %v669_v44, %v637_v45  ;;  %v595_v45 = vrot.slane %v5582_v34, 4  ;;  %v4423_v34 = vcombine.low %v5615_v54, %v5633_v61 }
 0x224   :  { %v699_v47 = vpop.permute.xlu0 %698  ;;  %v629_v58 = vpop.permute.xlu1 %628 }
 0x225   :  { %v709_v52 = vrot.slane %v699_v47, 4  ;;  %v638_v23 = vrot.slane %v629_v58, 4 }
 0x227   :  { %v757_v57 = vmax.bf16 %v741_v48, %v709_v52  ;;  %1880 = vrot.lane.b32.xlu0 %v4418_v0, %s5094_s14  ;;  %1115 = vrot.lane.b32.xlu1 %v4418_v0, %s5092_s16  ;;  %v579_v48 = vrot.slane %v5388_v18, 4 }
 0x228   :  { %v803_v60 = vpop.permute.xlu0 %802  ;;  %v701_v15 = vpop.permute.xlu1 %700 }
 0x229   :  { %v5704_v1 = vcombine.low %v5699_v56, %v757_v57  ;;  %v813_v9 = vrot.slane %v803_v60, 4  ;;  %v710_v0 = vrot.slane %v701_v15, 4  ;;  %v5769_v58 = vmax.bf16 %v595_v45, %v579_v48 }
 0x22b   :  { %2016 = vst.msk [vmem:[#allocation3 + $0x128] sm:$0xff] %vm1018_vm5, %v5704_v1  ;;  %1046 = vst.msk [vmem:[#allocation3 + $0x1b0] sm:$0xff] %vm1018_vm5, %v5704_v1  ;;  %v829_v4 = vmax.bf16 %v813_v9, %v781_v63  ;;  %1762 = vrot.lane.b32.xlu0 %v5573_v32, %s5096_s17  ;;  %1242 = vrot.lane.b32.xlu1 %v5573_v32, %s5091_s0  ;;  %v4422_v54 = vcombine.low %v5769_v58, %v5613_v53 }
 0x22c   :  { %v5714_v10 = vpop.permute.xlu0 %556  ;;  %v805_v22 = vpop.permute.xlu1 %804 }
 0x22d   :  { %v5716_v11 = vcombine.low %v757_v57, %v829_v4  ;;  %v5719_v12 = vcombine.low %v829_v4, %v7388_v29  ;;  %v5723_v16 = vmax.bf16 %v5714_v10, %v5430_v3  ;;  %v814_v25 = vrot.slane %v805_v22, 4 }
 0x22f   :  { %2017 = vst.msk [vmem:[#allocation3 + $0x138] sm:$0xff] %vm1018_vm5, %v5719_v12  ;;  %1639 = vrot.lane.b32.xlu0 %v5573_v32, %s5093_s2  ;;  %1244 = vrot.lane.b32.xlu1 %v5585_v38, %s5091_s0  ;;  %v5733_v14 = vcombine.low %v7388_v29, %v5723_v16 }
 0x230   :  { %v661_v19 = vpop.permute.xlu0 %660  ;;  %v663_v41 = vpop.permute.xlu1 %662 }
 0x231   :  { %1047 = vst.msk [vmem:[#allocation3 + $0x1c0] sm:$0xff] %vm1018_vm5, %v5733_v14  ;;  %v670_v62 = vrot.slane %v661_v19, 4  ;;  %v671_v9 = vrot.slane %v663_v41, 4 }
 0x233   :  { %1511 = vrot.lane.b32.xlu0 %v5650_v13, %s5097_s18  ;;  %846 = vrot.lane.b32.xlu1 %v5589_v39, %s5096_s17  ;;  %v5741_v26 = vmax.bf16 %v670_v62, %v638_v23 }
 0x234   :  { %v733_v32 = vpop.permute.xlu0 %732  ;;  %v735_v60 = vpop.permute.xlu1 %734 }
 0x235   :  { %v742_v38 = vrot.slane %v733_v32, 4  ;;  %v743_v4 = vrot.slane %v735_v60, 4 }
 0x237   :  { %v758_v30 = vmax.bf16 %v742_v38, %v710_v0  ;;  %1117 = vrot.lane.b32.xlu0 %v5650_v13, %s5092_s16  ;;  %878 = vrot.lane.b32.xlu1 %v5589_v39, %s5091_s0 }
 0x238   :  { %v773_v8 = vpop.permute.xlu0 %772  ;;  %v775_v15 = vpop.permute.xlu1 %774 }
 0x239   :  { %v5748_v43 = vcombine.low %v5741_v26, %v758_v30  ;;  %v782_v44 = vrot.slane %v773_v8, 4  ;;  %v783_v62 = vrot.slane %v775_v15, 4 }
 0x23b   :  { %2020 = vst.msk [vmem:[#allocation3 + $0x168] sm:$0xff] %vm1018_vm5, %v5748_v43  ;;  %1050 = vst.msk [vmem:[#allocation3 + $0x1f0] sm:$0xff] %vm1018_vm5, %v5748_v43  ;;  %v830_v47 = vmax.bf16 %v814_v25, %v782_v44  ;;  %862 = vrot.lane.b32.xlu0 %v5589_v39, %s5097_s18  ;;  %1764 = vrot.lane.b32.xlu1 %v5599_v40, %s5096_s17 }
 0x23c   :  { %v5759_v13 = vpop.permute.xlu0 %558 }
 0x23d   :  { %v5764_v52 = vcombine.low %v758_v30, %v830_v47  ;;  %v5767_v57 = vcombine.low %v830_v47, %v7388_v29 }
 0x23f   :  { %2021 = vst.msk [vmem:[#allocation3 + $0x178] sm:$0xff] %vm1018_vm5, %v5767_v57  ;;  %1378 = vrot.lane.b32.xlu0 %v5599_v40, %s5095_s15  ;;  %1890 = vrot.lane.b32.xlu1 %v4423_v34, %s5094_s14 }
 0x240   :  { %v631_v18 = vpop.permute.xlu0 %630 }
 0x241   :  { %v639_v61 = vrot.slane %v631_v18, 4 }
 0x243   :  { %1888 = vrot.lane.b32.xlu0 %v4422_v54, %s5094_s14  ;;  %1647 = vrot.lane.b32.xlu1 %v5625_v59, %s5093_s2  ;;  %v5781_v22 = vmax.bf16 %v671_v9, %v639_v61  ;;  %v596_v61 = vrot.slane %v5607_v46, 4 }
 0x244   :  { %v703_v63 = vpop.permute.xlu0 %702 }
 0x245   :  { %v711_v19 = vrot.slane %v703_v63, 4 }
 0x247   :  { %v759_v40 = vmax.bf16 %v743_v4, %v711_v19  ;;  %1770 = vrot.lane.b32.xlu0 %v5625_v59, %s5096_s17  ;;  %1519 = vrot.lane.b32.xlu1 %v4423_v34, %s5097_s18 }
 0x248   :  { %v807_v53 = vpop.permute.xlu0 %806 }
 0x249   :  { %v5787_v32 = vcombine.low %v5781_v22, %v759_v40  ;;  %v815_v23 = vrot.slane %v807_v53, 4  ;;  %v5789_v0 = vpop.permute.xlu1 %840 }
 0x24b   :  { %2024 = vst.msk [vmem:[#allocation3 + $0x1a8] sm:$0xff] %vm1018_vm5, %v5787_v32  ;;  %v831_v38 = vmax.bf16 %v815_v23, %v783_v62  ;;  %1517 = vrot.lane.b32.xlu0 %v4422_v54, %s5097_s18  ;;  %1125 = vrot.lane.b32.xlu1 %v4423_v34, %s5092_s16 }
 0x24c   :  { %v5795_v30 = vpop.permute.xlu0 %856 }
 0x24d   :  { %v5797_v8 = vcombine.low %v759_v40, %v831_v38  ;;  %v5800_v25 = vcombine.low %v831_v38, %v7388_v29  ;;  %v5804_v41 = vcombine.low %v5789_v0, %v5795_v30  ;;  %v5806_v44 = vpop.permute.xlu1 %872  ;;  %v597_v38 = vrot.slane %v5672_v31, 4 }
 0x24e   :  { %v5810_v45 = vcombine.low %v5806_v44, %v5512_v28 }
 0x24f   :  { %7390 = vst [vmem:[#allocation6_spill] sm:$0xff] %v5800_v25  ;;  %2025 = vst.msk [vmem:[#allocation3 + $0x1b8] sm:$0xff] %vm1018_vm5, %v5800_v25  ;;  %1384 = vrot.lane.b32.xlu0 %v5625_v59, %s5095_s15  ;;  %848 = vrot.lane.b32.xlu1 %v5611_v50, %s5096_s17 }
 0x250   :  { %1024 = vst.msk [vmem:[#allocation3 + $0x50] sm:$0xff] %vm1018_vm5, %v5804_v41  ;;  %1025 = vst.msk [vmem:[#allocation3 + $0x60] sm:$0xff] %vm1018_vm5, %v5810_v45  ;;  %v1355_v47 = vpop.permute.xlu0 %1354 }
 0x251   :  { %1451 = vst.msk [vmem:[#allocation3] sm:$0xff] %vm1450_vm10, %v1355_v47  ;;  %v5823_v28 = vpop.permute.xlu1 %1493 }
 0x253   :  { %1649 = vrot.lane.b32.xlu0 %v5640_v2, %s5093_s2  ;;  %864 = vrot.lane.b32.xlu1 %v5611_v50, %s5097_s18 }
 0x255   :  { %v5829_v48 = vpop.permute.xlu0 %1623  ;;  %v1361_v34 = vpop.permute.xlu1 %1360 }
 0x256   :  { %1454 = vst.msk [vmem:[#allocation3 + $0x30] sm:$0xff] %vm1450_vm10, %v1361_v34  ;;  %v581_v34 = vrot.slane %v5416_v51, 4 }
 0x257   :  { %1123 = vrot.lane.b32.xlu0 %v4422_v54, %s5092_s16  ;;  %880 = vrot.lane.b32.xlu1 %v5611_v50, %s5091_s0  ;;  %v580_v54 = vrot.slane %v5402_v35, 4 }
 0x258   :  { %v5907_v31 = vmax.bf16 %v597_v38, %v581_v34  ;;  %v5971_v34 = vmax.bf16 %v5759_v13, %v5443_v17 }
 0x259   :  { %v1496_v60 = vpop.permute.xlu0 %1495  ;;  %v1626_v18 = vpop.permute.xlu1 %1625  ;;  %v5845_v4 = vmax.bf16 %v596_v61, %v580_v54 }
 0x25a   :  { %1589 = vst.msk [vmem:[#allocation3 + $0x30] sm:$0xff] %vm1585_vm11, %v1496_v60  ;;  %v5916_v61 = vcombine.low %v5907_v31, %v5699_v56 }
 0x25b   :  { %1719 = vst.msk [vmem:[#allocation3 + $0x30] sm:$0xff] %vm1715_vm12, %v1626_v18  ;;  %1250 = vrot.lane.b32.xlu0 %v5625_v59, %s5091_s0  ;;  %1772 = vrot.lane.b32.xlu1 %v5621_v55, %s5096_s17  ;;  %v4426_v46 = vcombine.low %v5845_v4, %v5654_v21 }
 0x25d   :  { %v1100_v63 = vpop.permute.xlu0 %1099  ;;  %v1102_v9 = vpop.permute.xlu1 %1101 }
 0x25e   :  { %1187 = vst.msk [vmem:[#allocation3 + $0x60] sm:$0xff] %vm1180_vm6, %v1100_v63  ;;  %1188 = vst.msk [vmem:[#allocation3 + $0x70] sm:$0xff] %vm1180_vm6, %v1102_v9 }
 0x25f   :  { %1252 = vrot.lane.b32.xlu0 %v5640_v2, %s5091_s0  ;;  %1386 = vrot.lane.b32.xlu1 %v5621_v55, %s5095_s15 }
 0x261   :  { %v1227_v59 = vpop.permute.xlu0 %1226  ;;  %v5853_v15 = vpop.permute.xlu1 %842 }
 0x262   :  { %1314 = vst.msk [vmem:[#allocation3 + $0x60] sm:$0xff] %vm1307_vm8, %v1227_v59 }
 0x263   :  { %1898 = vrot.lane.b32.xlu0 %v5674_v33, %s5094_s14  ;;  %1896 = vrot.lane.b32.xlu1 %v4426_v46, %s5094_s14 }
 0x265   :  { %v1229_v35 = vpop.permute.xlu0 %1228  ;;  %v5859_v19 = vpop.permute.xlu1 %874 }
 0x266   :  { %1315 = vst.msk [vmem:[#allocation3 + $0x70] sm:$0xff] %vm1307_vm8, %v1229_v35  ;;  %v5864_v55 = vcombine.low %v5859_v19, %v5566_v24  ;;  %v5017_v35 = vld [vmem:[%s7378_s3 + $0x8] sm:$0xff]  }
 0x267   :  { %1655 = vrot.lane.b32.xlu0 %v5663_v27, %s5093_s2  ;;  %1778 = vrot.lane.b32.xlu1 %v5663_v27, %s5096_s17 }
 0x268   :  { %1999 = vst.msk [vmem:[#allocation3 + $0x18] sm:$0xff] %vm1018_vm5, %v5864_v55  ;;  %1029 = vst.msk [vmem:[#allocation3 + $0xa0] sm:$0xff] %vm1018_vm5, %v5864_v55 }
 0x269   :  { %v5874_v2 = vpop.permute.xlu0 %858  ;;  %v5876_v21 = vpop.permute.xlu1 %1748 }
 0x26a   :  { %v5880_v24 = vcombine.low %v5853_v15, %v5874_v2 }
 0x26b   :  { %1527 = vrot.lane.b32.xlu0 %v5674_v33, %s5097_s18  ;;  %1525 = vrot.lane.b32.xlu1 %v4426_v46, %s5097_s18 }
 0x26c   :  { %1998 = vst.msk [vmem:[#allocation3 + $0x8] sm:$0xff] %vm1018_vm5, %v5880_v24  ;;  %1028 = vst.msk [vmem:[#allocation3 + $0x90] sm:$0xff] %vm1018_vm5, %v5880_v24 }
 0x26d   :  { %v5889_v40 = vpop.permute.xlu0 %1362  ;;  %v1875_v53 = vpop.permute.xlu1 %1874 }
 0x26f   :  { %1131 = vrot.lane.b32.xlu0 %v4426_v46, %s5092_s16  ;;  %1392 = vrot.lane.b32.xlu1 %v5663_v27, %s5095_s15  ;;  %v5016_v46 = vld [vmem:[%s7378_s3] sm:$0xff]  }
 0x270   :  { %2270 = vmatpush1.bf16.msra.mxu1 %v5016_v46  ;;  %v5020_v46 = vld [vmem:[%s7378_s3 + $0x20] sm:$0xff]  }
 0x271   :  { %v5894_v62 = vpop.permute.xlu0 %1872  ;;  %v5896_v23 = vpop.permute.xlu1 %1501  ;;  %2271 = vmatprep.subr.bf16.mxu1 %v7388_v29 }
 0x273   :  { %1780 = vrot.lane.b32.xlu0 %v5691_v37, %s5096_s17  ;;  %1657 = vrot.lane.b32.xlu1 %v5677_v49, %s5093_s2  ;;  %v2031_v47 = vld [vmem:[#allocation3 + $0x8] sm:$0xff] }
 0x274   :  { %4462 = vmatprep.mubr.msk.bf16.mxu1 %vm1018_vm5, %v2031_v47  ;;  %2272 = vmatpush1.bf16.msra.mxu1 %v5017_v35  ;;  %v5018_v47 = vld [vmem:[%s7378_s3 + $0x10] sm:$0xff]  }
 0x275   :  { %v1755_v60 = vpop.permute.xlu0 %1754  ;;  %v1369_v18 = vpop.permute.xlu1 %1368  ;;  %2273 = vmatprep.subr.bf16.mxu1 %v7388_v29 }
 0x276   :  { %1839 = vst.msk [vmem:[#allocation3 + $0x30] sm:$0xff] %vm1835_vm13, %v1755_v60 }
 0x277   :  { %1458 = vst.msk [vmem:[#allocation3 + $0x70] sm:$0xff] %vm1450_vm10, %v1369_v18  ;;  %1394 = vrot.lane.b32.xlu0 %v5691_v37, %s5095_s15  ;;  %1258 = vrot.lane.b32.xlu1 %v5663_v27, %s5091_s0 }
 0x278   :  { %1959 = vst.msk [vmem:[#allocation3 + $0x30] sm:$0xff] %vm1955_vm14, %v1875_v53  ;;  %2274 = vmatpush1.bf16.msra.mxu1 %v5018_v47 }
 0x279   :  { %v5918_v51 = vpop.permute.xlu0 %1631  ;;  %v1634_v54 = vpop.permute.xlu1 %1633  ;;  %2275 = vmatprep.subr.bf16.mxu1 %v7388_v29 }
 0x27b   :  { %1904 = vrot.lane.b32.xlu0 %v5916_v61, %s5094_s14  ;;  %850 = vrot.lane.b32.xlu1 %v5681_v36, %s5096_s17 }
 0x27d   :  { %v1504_v63 = vpop.permute.xlu0 %1503  ;;  %v1110_v9 = vpop.permute.xlu1 %1109 }
 0x27e   :  { %1593 = vst.msk [vmem:[#allocation3 + $0x70] sm:$0xff] %vm1585_vm11, %v1504_v63 }
 0x27f   :  { %1192 = vst.msk [vmem:[#allocation3 + $0xb0] sm:$0xff] %vm1180_vm6, %v1110_v9  ;;  %1786 = vrot.lane.b32.xlu0 %v5704_v1, %s5096_s17  ;;  %866 = vrot.lane.b32.xlu1 %v5681_v36, %s5097_s18 }
 0x280   :  { %1723 = vst.msk [vmem:[#allocation3 + $0x70] sm:$0xff] %vm1715_vm12, %v1634_v54  ;;  %v5019_v54 = vld [vmem:[%s7378_s3 + $0x18] sm:$0xff]  }
 0x281   :  { %v1108_v27 = vpop.permute.xlu0 %1107  ;;  %v5931_v37 = vpop.permute.xlu1 %876  ;;  %2276 = vmatpush1.bf16.msra.mxu1 %v5019_v54 }
 0x282   :  { %1191 = vst.msk [vmem:[#allocation3 + $0xa0] sm:$0xff] %vm1180_vm6, %v1108_v27  ;;  %v5936_v56 = vcombine.low %v5931_v37, %v5652_v5  ;;  %2277 = vmatprep.subr.bf16.mxu1 %v7388_v29 }
 0x283   :  { %1663 = vrot.lane.b32.xlu0 %v5704_v1, %s5093_s2  ;;  %882 = vrot.lane.b32.xlu1 %v5681_v36, %s5091_s0 }
 0x284   :  { %2003 = vst.msk [vmem:[#allocation3 + $0x58] sm:$0xff] %vm1018_vm5, %v5936_v56  ;;  %1033 = vst.msk [vmem:[#allocation3 + $0xe0] sm:$0xff] %vm1018_vm5, %v5936_v56 }
 0x285   :  { %v1235_v59 = vpop.permute.xlu0 %1234  ;;  %v5949_v5 = vpop.permute.xlu1 %1756  ;;  %2278 = vmatpush1.bf16.msra.mxu1 %v5020_v46  ;;  %v4408_v46 = vcombine.low %v5500_v20, %v5789_v0  ;;  %v4409_v20 = vcombine.low %v5795_v30, %v5806_v44  ;;  %v598_v30 = vrot.slane %v5714_v10, 4  ;;  %v582_v44 = vrot.slane %v5430_v3, 4 }
 0x286   :  { %1318 = vst.msk [vmem:[#allocation3 + $0xa0] sm:$0xff] %vm1307_vm8, %v1235_v59  ;;  %2279 = vmatprep.subr.bf16.mxu1 %v7388_v29 }
 0x287   :  { %868 = vrot.lane.b32.xlu0 %v5723_v16, %s5097_s18  ;;  %1906 = vrot.lane.b32.xlu1 %v5716_v11, %s5094_s14 }
 0x289   :  { %v1237_v53 = vpop.permute.xlu0 %1236  ;;  %v1883_v38 = vpop.permute.xlu1 %1882 }
 0x28a   :  { %1319 = vst.msk [vmem:[#allocation3 + $0xb0] sm:$0xff] %vm1307_vm8, %v1237_v53  ;;  %v5021_v53 = vld [vmem:[%s7378_s3 + $0x28] sm:$0xff]  }
 0x28b   :  { %884 = vrot.lane.b32.xlu0 %v5723_v16, %s5091_s0  ;;  %1533 = vrot.lane.b32.xlu1 %v5916_v61, %s5097_s18 }
 0x28c   :  { %2280 = vmatpush1.bf16.msra.mxu1 %v5021_v53 }
 0x28d   :  { %v5973_v60 = vpop.permute.xlu0 %844  ;;  %v5975_v18 = vpop.permute.xlu1 %1509  ;;  %2281 = vmatprep.subr.bf16.mxu1 %v7388_v29 }
 0x28f   :  { %854 = vrot.lane.b32.xlu0 %v5971_v34, %s5096_s17  ;;  %852 = vrot.lane.b32.xlu1 %v5723_v16, %s5096_s17 }
 0x291   :  { %v5985_v63 = vpop.permute.xlu0 %860  ;;  %v1377_v9 = vpop.permute.xlu1 %1376 }
 0x292   :  { %v5990_v27 = vcombine.low %v5973_v60, %v5985_v63  ;;  %1462 = vst.msk [vmem:[#allocation3 + $0xb0] sm:$0xff] %vm1450_vm10, %v1377_v9  ;;  %v5022_v9 = vld [vmem:[%s7378_s3 + $0x30] sm:$0xff]  }
 0x293   :  { %1619 = vrot.lane.b32.xlu0 %v5804_v41, %s5093_s2  ;;  %1788 = vrot.lane.b32.xlu1 %v5733_v14, %s5096_s17 }
 0x294   :  { %2002 = vst.msk [vmem:[#allocation3 + $0x48] sm:$0xff] %vm1018_vm5, %v5990_v27  ;;  %1032 = vst.msk [vmem:[#allocation3 + $0xd0] sm:$0xff] %vm1018_vm5, %v5990_v27  ;;  %2282 = vmatpush1.bf16.msra.mxu1 %v5022_v9 }
 0x295   :  { %v6004_v59 = vpop.permute.xlu0 %1370  ;;  %v1642_v35 = vpop.permute.xlu1 %1641  ;;  %2283 = vmatprep.subr.bf16.mxu1 %v7388_v29 }
 0x297   :  { %1356 = vrot.lane.b32.xlu0 %v5804_v41, %s5095_s15  ;;  %870 = vrot.lane.b32.xlu1 %v5971_v34, %s5097_s18 }
 0x299   :  { %v6014_v47 = vpop.permute.xlu0 %1880  ;;  %v1116_v54 = vpop.permute.xlu1 %1115 }
 0x29a   :  { %1195 = vst.msk [vmem:[#allocation3 + $0xe0] sm:$0xff] %vm1180_vm6, %v1116_v54  ;;  %v5023_v54 = vld [vmem:[%s7378_s3 + $0x38] sm:$0xff]  }
 0x29b   :  { %886 = vrot.lane.b32.xlu1 %v5971_v34, %s5091_s0  ;;  %1621 = vrot.lane.b32.xlu0 %v5810_v45, %s5093_s2 }
 0x29c   :  { %2284 = vmatpush1.bf16.msra.mxu1 %v5023_v54 }
 0x29d   :  { %v1763_v53 = vpop.permute.xlu0 %1762  ;;  %v1243_v25 = vpop.permute.xlu1 %1242  ;;  %2285 = vmatprep.subr.bf16.mxu1 %v7388_v29 }
 0x29e   :  { %1843 = vst.msk [vmem:[#allocation3 + $0x70] sm:$0xff] %vm1835_vm13, %v1763_v53 }
 0x29f   :  { %1322 = vst.msk [vmem:[#allocation3 + $0xe0] sm:$0xff] %vm1307_vm8, %v1243_v25  ;;  %1489 = vrot.lane.b32.xlu1 %v4408_v46, %s5097_s18  ;;  %1358 = vrot.lane.b32.xlu0 %v5810_v45, %s5095_s15  ;;  %v5024_v25 = vld [vmem:[%s7378_s3 + $0x40] sm:$0xff]  }
 0x2a0   :  { %1963 = vst.msk [vmem:[#allocation3 + $0x70] sm:$0xff] %vm1955_vm14, %v1883_v38  ;;  %2286 = vmatpush1.bf16.msra.mxu1 %v5024_v25 }
 0x2a1   :  { %v6039_v0 = vpop.permute.xlu0 %1639  ;;  %v1245_v9 = vpop.permute.xlu1 %1244 }
 0x2a3   :  { %1491 = vrot.lane.b32.xlu1 %v4409_v20, %s5097_s18  ;;  %1095 = vrot.lane.b32.xlu0 %v4408_v46, %s5092_s16  ;;  %v4412_v46 = vcombine.low %v5520_v42, %v5853_v15 }
 0x2a5   :  { %v1512_v38 = vpop.permute.xlu0 %1511  ;;  %v6047_v53 = vpop.permute.xlu1 %846 }
 0x2a6   :  { %1597 = vst.msk [vmem:[#allocation3 + $0xb0] sm:$0xff] %vm1585_vm11, %v1512_v38 }
 0x2a7   :  { %1727 = vst.msk [vmem:[#allocation3 + $0xb0] sm:$0xff] %vm1715_vm12, %v1642_v35  ;;  %1222 = vrot.lane.b32.xlu1 %v5804_v41, %s5091_s0  ;;  %1224 = vrot.lane.b32.xlu0 %v5810_v45, %s5091_s0  ;;  %v6066_v35 = vmax.bf16 %v598_v30, %v582_v44 }
 0x2a9   :  { %v1118_v54 = vpop.permute.xlu0 %1117  ;;  %v6059_v25 = vpop.permute.xlu1 %878  ;;  %v6077_v3 = vcombine.low %v6066_v35, %v5741_v26 }
 0x2aa   :  { %1196 = vst.msk [vmem:[#allocation3 + $0xf0] sm:$0xff] %vm1180_vm6, %v1118_v54  ;;  %v6064_v10 = vcombine.low %v6059_v25, %v5769_v58 }
 0x2ab   :  { %1323 = vst.msk [vmem:[#allocation3 + $0xf0] sm:$0xff] %vm1307_vm8, %v1245_v9  ;;  %1097 = vrot.lane.b32.xlu1 %v4409_v20, %s5092_s16  ;;  %1868 = vrot.lane.b32.xlu0 %v4412_v46, %s5094_s14 }
 0x2ac   :  { %2007 = vst.msk [vmem:[#allocation3 + $0x98] sm:$0xff] %vm1018_vm5, %v6064_v10  ;;  %1037 = vst.msk [vmem:[#allocation3 + $0x120] sm:$0xff] %vm1018_vm5, %v6064_v10 }
 0x2ad   :  { %v6079_v42 = vpop.permute.xlu0 %862  ;;  %v6081_v58 = vpop.permute.xlu1 %1764 }
 0x2ae   :  { %v6085_v41 = vcombine.low %v6047_v53, %v6079_v42 }
 0x2af   :  { %1133 = vrot.lane.b32.xlu1 %v5674_v33, %s5092_s16  ;;  %1912 = vrot.lane.b32.xlu0 %v6077_v3, %s5094_s14  ;;  %v4413_v33 = vcombine.low %v5874_v2, %v5859_v19 }
 0x2b0   :  { %2006 = vst.msk [vmem:[#allocation3 + $0x88] sm:$0xff] %vm1018_vm5, %v6085_v41  ;;  %1036 = vst.msk [vmem:[#allocation3 + $0x110] sm:$0xff] %vm1018_vm5, %v6085_v41 }
 0x2b1   :  { %v6095_v26 = vpop.permute.xlu0 %1378  ;;  %v1891_v45 = vpop.permute.xlu1 %1890 }
 0x2b3   :  { %1750 = vrot.lane.b32.xlu1 %v5880_v24, %s5096_s17  ;;  %1627 = vrot.lane.b32.xlu0 %v5880_v24, %s5093_s2 }
 0x2b5   :  { %v6103_v15 = vpop.permute.xlu0 %1888  ;;  %v6105_v20 = vpop.permute.xlu1 %1647 }
 0x2b7   :  { %1870 = vrot.lane.b32.xlu1 %v4413_v33, %s5094_s14  ;;  %1364 = vrot.lane.b32.xlu0 %v5880_v24, %s5095_s15 }
 0x2b9   :  { %v1771_v9 = vpop.permute.xlu0 %1770  ;;  %v1520_v38 = vpop.permute.xlu1 %1519 }
 0x2ba   :  { %1847 = vst.msk [vmem:[#allocation3 + $0xb0] sm:$0xff] %vm1835_vm13, %v1771_v9 }
 0x2bb   :  { %1967 = vst.msk [vmem:[#allocation3 + $0xb0] sm:$0xff] %vm1955_vm14, %v1891_v45  ;;  %1752 = vrot.lane.b32.xlu1 %v5864_v55, %s5096_s17  ;;  %1629 = vrot.lane.b32.xlu0 %v5864_v55, %s5093_s2 }
 0x2bd   :  { %v6116_v19 = vpop.permute.xlu0 %1517  ;;  %v1126_v2 = vpop.permute.xlu1 %1125 }
 0x2be   :  { %1200 = vst.msk [vmem:[#allocation3 + $0x130] sm:$0xff] %vm1180_vm6, %v1126_v2 }
 0x2bf   :  { %1497 = vrot.lane.b32.xlu1 %v4412_v46, %s5097_s18  ;;  %1366 = vrot.lane.b32.xlu0 %v5864_v55, %s5095_s15 }
 0x2c1   :  { %v1385_v30 = vpop.permute.xlu0 %1384  ;;  %v6122_v44 = vpop.permute.xlu1 %848 }
 0x2c2   :  { %1466 = vst.msk [vmem:[#allocation3 + $0xf0] sm:$0xff] %vm1450_vm10, %v1385_v30 }
 0x2c3   :  { %1601 = vst.msk [vmem:[#allocation3 + $0xf0] sm:$0xff] %vm1585_vm11, %v1520_v38  ;;  %1499 = vrot.lane.b32.xlu1 %v4413_v33, %s5097_s18  ;;  %1103 = vrot.lane.b32.xlu0 %v4412_v46, %s5092_s16  ;;  %v4416_v46 = vcombine.low %v5546_v7, %v5973_v60 }
 0x2c5   :  { %v1650_v54 = vpop.permute.xlu0 %1649  ;;  %v6128_v45 = vpop.permute.xlu1 %864 }
 0x2c6   :  { %1731 = vst.msk [vmem:[#allocation3 + $0xf0] sm:$0xff] %vm1715_vm12, %v1650_v54  ;;  %v6133_v9 = vcombine.low %v6122_v44, %v6128_v45 }
 0x2c7   :  { %1230 = vrot.lane.b32.xlu1 %v5880_v24, %s5091_s0  ;;  %1232 = vrot.lane.b32.xlu0 %v5864_v55, %s5091_s0 }
 0x2c8   :  { %2010 = vst.msk [vmem:[#allocation3 + $0xc8] sm:$0xff] %vm1018_vm5, %v6133_v9  ;;  %1040 = vst.msk [vmem:[#allocation3 + $0x150] sm:$0xff] %vm1018_vm5, %v6133_v9 }
 0x2c9   :  { %v1124_v38 = vpop.permute.xlu0 %1123  ;;  %v6145_v2 = vpop.permute.xlu1 %880 }
 0x2ca   :  { %1199 = vst.msk [vmem:[#allocation3 + $0x120] sm:$0xff] %vm1180_vm6, %v1124_v38  ;;  %v6150_v24 = vcombine.low %v6145_v2, %v5845_v4 }
 0x2cb   :  { %1105 = vrot.lane.b32.xlu1 %v4413_v33, %s5092_s16  ;;  %1876 = vrot.lane.b32.xlu0 %v4416_v46, %s5094_s14  ;;  %v4417_v33 = vcombine.low %v5985_v63, %v5931_v37 }
 0x2cc   :  { %2011 = vst.msk [vmem:[#allocation3 + $0xd8] sm:$0xff] %vm1018_vm5, %v6150_v24  ;;  %1041 = vst.msk [vmem:[#allocation3 + $0x160] sm:$0xff] %vm1018_vm5, %v6150_v24 }
 0x2cd   :  { %v1251_v7 = vpop.permute.xlu0 %1250  ;;  %v6158_v55 = vpop.permute.xlu1 %1772 }
 0x2ce   :  { %1326 = vst.msk [vmem:[#allocation3 + $0x120] sm:$0xff] %vm1307_vm8, %v1251_v7 }
 0x2cf   :  { %1400 = vrot.lane.b32.xlu1 %v5704_v1, %s5095_s15  ;;  %1260 = vrot.lane.b32.xlu0 %v5677_v49, %s5091_s0 }
 0x2d1   :  { %v1253_v4 = vpop.permute.xlu0 %1252  ;;  %v6165_v60 = vpop.permute.xlu1 %1386 }
 0x2d2   :  { %1327 = vst.msk [vmem:[#allocation3 + $0x130] sm:$0xff] %vm1307_vm8, %v1253_v4 }
 0x2d3   :  { %1758 = vrot.lane.b32.xlu1 %v5990_v27, %s5096_s17  ;;  %1635 = vrot.lane.b32.xlu0 %v5990_v27, %s5093_s2 }
 0x2d5   :  { %v1899_v30 = vpop.permute.xlu0 %1898  ;;  %v6174_v54 = vpop.permute.xlu1 %1896 }
 0x2d6   :  { %7391 = vst [vmem:[#allocation7_spill] sm:$0xff] %v6174_v54 }
 0x2d7   :  { %1878 = vrot.lane.b32.xlu1 %v4417_v33, %s5094_s14  ;;  %1372 = vrot.lane.b32.xlu0 %v5990_v27, %s5095_s15 }
 0x2d9   :  { %v6179_v49 = vpop.permute.xlu0 %1655  ;;  %v1779_v38 = vpop.permute.xlu1 %1778 }
 0x2da   :  { %7392 = vst [vmem:[#allocation8_spill] sm:$0xff] %v6179_v49  ;;  %1851 = vst.msk [vmem:[#allocation3 + $0xf0] sm:$0xff] %vm1835_vm13, %v1779_v38  ;;  %v599_v49 = vrot.slane %v5759_v13, 4 }
 0x2db   :  { %1971 = vst.msk [vmem:[#allocation3 + $0xf0] sm:$0xff] %vm1955_vm14, %v1899_v30  ;;  %1760 = vrot.lane.b32.xlu1 %v5936_v56, %s5096_s17  ;;  %1637 = vrot.lane.b32.xlu0 %v5936_v56, %s5093_s2 }
 0x2dd   :  { %v1528_v37 = vpop.permute.xlu0 %1527  ;;  %v6187_v63 = vpop.permute.xlu1 %1525 }
 0x2de   :  { %7393 = vst [vmem:[#allocation9_spill] sm:$0xff] %v6187_v63  ;;  %v6300_v63 = vcombine.low %v5611_v50, %v6122_v44 }
 0x2df   :  { %1505 = vrot.lane.b32.xlu1 %v4416_v46, %s5097_s18  ;;  %1374 = vrot.lane.b32.xlu0 %v5936_v56, %s5095_s15 }
 0x2e1   :  { %v1132_v7 = vpop.permute.xlu0 %1131  ;;  %v1393_v4 = vpop.permute.xlu1 %1392 }
 0x2e2   :  { %1203 = vst.msk [vmem:[#allocation3 + $0x160] sm:$0xff] %vm1180_vm6, %v1132_v7  ;;  %v6206_v7 = vcombine.low %v5589_v39, %v6047_v53 }
 0x2e3   :  { %1470 = vst.msk [vmem:[#allocation3 + $0x130] sm:$0xff] %vm1450_vm10, %v1393_v4  ;;  %1507 = vrot.lane.b32.xlu1 %v4417_v33, %s5097_s18  ;;  %1111 = vrot.lane.b32.xlu0 %v4416_v46, %s5092_s16 }
 0x2e4   :  { %1605 = vst.msk [vmem:[#allocation3 + $0x130] sm:$0xff] %vm1585_vm11, %v1528_v37 }
 0x2e5   :  { %v6197_v30 = vpop.permute.xlu0 %1780  ;;  %v1658_v38 = vpop.permute.xlu1 %1657 }
 0x2e6   :  { %7394 = vst [vmem:[#allocation10_spill] sm:$0xff] %v6197_v30  ;;  %1735 = vst.msk [vmem:[#allocation3 + $0x130] sm:$0xff] %vm1715_vm12, %v1658_v38 }
 0x2e7   :  { %1238 = vrot.lane.b32.xlu1 %v5990_v27, %s5091_s0  ;;  %1240 = vrot.lane.b32.xlu0 %v5936_v56, %s5091_s0 }
 0x2e9   :  { %v6208_v37 = vpop.permute.xlu0 %1394  ;;  %v1259_v4 = vpop.permute.xlu1 %1258 }
 0x2ea   :  { %7395 = vst [vmem:[#allocation11_spill] sm:$0xff] %v6208_v37  ;;  %1330 = vst.msk [vmem:[#allocation3 + $0x160] sm:$0xff] %vm1307_vm8, %v1259_v4 }
 0x2eb   :  { %1113 = vrot.lane.b32.xlu1 %v4417_v33, %s5092_s16  ;;  %1884 = vrot.lane.b32.xlu0 %v6206_v7, %s5094_s14 }
 0x2ed   :  { %v6214_v46 = vpop.permute.xlu0 %1904  ;;  %v6216_v27 = vpop.permute.xlu1 %850 }
 0x2ee   :  { %7396 = vst [vmem:[#allocation12_spill] sm:$0xff] %v6214_v46 }
 0x2ef   :  { %1665 = vrot.lane.b32.xlu1 %v5719_v12, %s5093_s2  ;;  %1535 = vrot.lane.b32.xlu0 %v5716_v11, %s5097_s18 }
 0x2f1   :  { %v1787_v39 = vpop.permute.xlu0 %1786  ;;  %v6222_v56 = vpop.permute.xlu1 %866 }
 0x2f2   :  { %1855 = vst.msk [vmem:[#allocation3 + $0x130] sm:$0xff] %vm1835_vm13, %v1787_v39  ;;  %v6227_v53 = vcombine.low %v6216_v27, %v6222_v56  ;;  %v4421_v39 = vcombine.low %v6079_v42, %v6059_v25 }
 0x2f3   :  { %1914 = vrot.lane.b32.xlu1 %v5764_v52, %s5094_s14  ;;  %1794 = vrot.lane.b32.xlu0 %v5748_v43, %s5096_s17 }
 0x2f4   :  { %2014 = vst.msk [vmem:[#allocation3 + $0x108] sm:$0xff] %vm1018_vm5, %v6227_v53  ;;  %1044 = vst.msk [vmem:[#allocation3 + $0x190] sm:$0xff] %vm1018_vm5, %v6227_v53 }
 0x2f5   :  { %v6237_v33 = vpop.permute.xlu0 %1663  ;;  %v6239_v38 = vpop.permute.xlu1 %882 }
 0x2f6   :  { %7397 = vst [vmem:[#allocation13_spill] sm:$0xff] %v6237_v33  ;;  %v6243_v4 = vcombine.low %v6239_v38, %v5907_v31 }
 0x2f7   :  { %1766 = vrot.lane.b32.xlu1 %v6085_v41, %s5096_s17  ;;  %1643 = vrot.lane.b32.xlu0 %v6085_v41, %s5093_s2 }
 0x2f8   :  { %2015 = vst.msk [vmem:[#allocation3 + $0x118] sm:$0xff] %vm1018_vm5, %v6243_v4  ;;  %1045 = vst.msk [vmem:[#allocation3 + $0x1a0] sm:$0xff] %vm1018_vm5, %v6243_v4 }
 0x2f9   :  { %v6255_v29 = vpop.permute.xlu0 %868  ;;  %v1907_v46 = vpop.permute.xlu1 %1906 }
 0x2fa   :  { %1975 = vst.msk [vmem:[#allocation3 + $0x130] sm:$0xff] %vm1955_vm14, %v1907_v46 }
 0x2fb   :  { %1886 = vrot.lane.b32.xlu1 %v4421_v39, %s5094_s14  ;;  %1380 = vrot.lane.b32.xlu0 %v6085_v41, %s5095_s15 }
 0x2fd   :  { %v6261_v31 = vpop.permute.xlu0 %884  ;;  %v6263_v33 = vpop.permute.xlu1 %1533 }
 0x2fe   :  { %7398 = vst [vmem:[#allocation14_spill] sm:$0xff] %v6263_v33  ;;  %v6267_v37 = vcombine.low %v6261_v31, %v6066_v35 }
 0x2ff   :  { %1768 = vrot.lane.b32.xlu1 %v6064_v10, %s5096_s17  ;;  %1645 = vrot.lane.b32.xlu0 %v6064_v10, %s5093_s2 }
 0x300   :  { %2019 = vst.msk [vmem:[#allocation3 + $0x158] sm:$0xff] %vm1018_vm5, %v6267_v37  ;;  %1049 = vst.msk [vmem:[#allocation3 + $0x1e0] sm:$0xff] %vm1018_vm5, %v6267_v37 }
 0x301   :  { %v6277_v25 = vpop.permute.xlu0 %854  ;;  %v6279_v42 = vpop.permute.xlu1 %852 }
 0x302   :  { %v6283_v35 = vcombine.low %v6279_v42, %v6255_v29 }
 0x303   :  { %1513 = vrot.lane.b32.xlu1 %v6206_v7, %s5097_s18  ;;  %1246 = vrot.lane.b32.xlu0 %v6085_v41, %s5091_s0 }
 0x304   :  { %2018 = vst.msk [vmem:[#allocation3 + $0x148] sm:$0xff] %vm1018_vm5, %v6283_v35  ;;  %1048 = vst.msk [vmem:[#allocation3 + $0x1d0] sm:$0xff] %vm1018_vm5, %v6283_v35 }
 0x305   :  { %v1620_v46 = vpop.permute.xlu0 %1619  ;;  %v6293_v33 = vpop.permute.xlu1 %1788 }
 0x306   :  { %7399 = vst [vmem:[#allocation15_spill] sm:$0xff] %v6293_v33  ;;  %v583_v33 = vrot.slane %v5443_v17, 4  ;;  %v6332_v17 = vcombine.low %v6128_v45, %v6145_v2  ;;  %v7400_v2 = vmov 0  }
 0x307   :  { %1515 = vrot.lane.b32.xlu1 %v4421_v39, %s5097_s18  ;;  %1121 = vrot.lane.b32.xlu0 %v4421_v39, %s5092_s16 }
 0x308   :  { %v6316_v50 = vmax.bf16 %v599_v49, %v583_v33 }
 0x309   :  { %v1357_v41 = vpop.permute.xlu0 %1356  ;;  %v6302_v30 = vpop.permute.xlu1 %870 }
 0x30a   :  { %1452 = vst.msk [vmem:[#allocation3 + $0x10] sm:$0xff] %vm1450_vm10, %v1357_v41  ;;  %v6307_v54 = vcombine.low %v6277_v25, %v6302_v30 }
 0x30b   :  { %1382 = vrot.lane.b32.xlu1 %v6064_v10, %s5095_s15  ;;  %1892 = vrot.lane.b32.xlu0 %v6300_v63, %s5094_s14 }
 0x30c   :  { %2022 = vst.msk [vmem:[#allocation3 + $0x188] sm:$0xff] %vm1018_vm5, %v6307_v54 }
 0x30d   :  { %v6318_v13 = vpop.permute.xlu1 %886  ;;  %v1622_v44 = vpop.permute.xlu0 %1621 }
 0x30e   :  { %v6322_v39 = vcombine.low %v6318_v13, %v6316_v50 }
 0x30f   :  { %1119 = vrot.lane.b32.xlu1 %v6206_v7, %s5092_s16  ;;  %1402 = vrot.lane.b32.xlu0 %v5733_v14, %s5095_s15  ;;  %v6349_v7 = vcombine.low %v7400_v2, %v5971_v34 }
 0x310   :  { %2023 = vst.msk [vmem:[#allocation3 + $0x198] sm:$0xff] %vm1018_vm5, %v6322_v39 }
 0x311   :  { %v1490_v49 = vpop.permute.xlu1 %1489  ;;  %v1359_v33 = vpop.permute.xlu0 %1358 }
 0x312   :  { %1586 = vst.msk [vmem:[#allocation3] sm:$0xff] %vm1585_vm11, %v1490_v49 }
 0x313   :  { %1453 = vst.msk [vmem:[#allocation3 + $0x20] sm:$0xff] %vm1450_vm10, %v1359_v33  ;;  %1248 = vrot.lane.b32.xlu1 %v6064_v10, %s5091_s0  ;;  %1894 = vrot.lane.b32.xlu0 %v6332_v17, %s5094_s14 }
 0x314   :  { %1716 = vst.msk [vmem:[#allocation3] sm:$0xff] %vm1715_vm12, %v1620_v46 }
 0x315   :  { %1588 = vst.msk [vmem:[#allocation3 + $0x20] sm:$0xff] %vm1585_vm11, %v5823_v28  ;;  %v1492_v14 = vpop.permute.xlu1 %1491  ;;  %v1096_v45 = vpop.permute.xlu0 %1095 }
 0x316   :  { %1836 = vst.msk [vmem:[#allocation3] sm:$0xff] %vm1835_vm13, %v5876_v21 }
 0x317   :  { %1718 = vst.msk [vmem:[#allocation3 + $0x20] sm:$0xff] %vm1715_vm12, %v5829_v48  ;;  %1796 = vrot.lane.b32.xlu1 %v6349_v7, %s5096_s17  ;;  %1139 = vrot.lane.b32.xlu0 %v5916_v61, %s5092_s16 }
 0x318   :  { %1587 = vst.msk [vmem:[#allocation3 + $0x10] sm:$0xff] %vm1585_vm11, %v1492_v14 }
 0x319   :  { %1185 = vst.msk [vmem:[#allocation3 + $0x40] sm:$0xff] %vm1180_vm6, %v1096_v45  ;;  %v1223_v28 = vpop.permute.xlu1 %1222  ;;  %v1225_v48 = vpop.permute.xlu0 %1224 }
 0x31a   :  { %1717 = vst.msk [vmem:[#allocation3 + $0x10] sm:$0xff] %vm1715_vm12, %v1622_v44 }
 0x31b   :  { %1312 = vst.msk [vmem:[#allocation3 + $0x40] sm:$0xff] %vm1307_vm8, %v1223_v28  ;;  %1774 = vrot.lane.b32.xlu1 %v6133_v9, %s5096_s17  ;;  %1776 = vrot.lane.b32.xlu0 %v6150_v24, %s5096_s17 }
 0x31c   :  { %1455 = vst.msk [vmem:[#allocation3 + $0x40] sm:$0xff] %vm1450_vm10, %v5889_v40 }
 0x31d   :  { %v1098_v21 = vpop.permute.xlu1 %1097  ;;  %v1869_v10 = vpop.permute.xlu0 %1868 }
 0x31e   :  { %1186 = vst.msk [vmem:[#allocation3 + $0x50] sm:$0xff] %vm1180_vm6, %v1098_v21 }
 0x31f   :  { %1956 = vst.msk [vmem:[#allocation3] sm:$0xff] %vm1955_vm14, %v1869_v10  ;;  %1266 = vrot.lane.b32.xlu1 %v5704_v1, %s5091_s0  ;;  %1521 = vrot.lane.b32.xlu0 %v6300_v63, %s5097_s18  ;;  %v2033_v1 = vld [vmem:[#allocation3 + $0x18] sm:$0xff]  ;;  %v2036_v10 = vld [vmem:[#allocation3 + $0x30] sm:$0xff] }
 0x320   :  { %1313 = vst.msk [vmem:[#allocation3 + $0x50] sm:$0xff] %vm1307_vm8, %v1225_v48 }
 0x321   :  { %v1134_v40 = vpop.permute.xlu1 %1133  ;;  %v6372_v61 = vpop.permute.xlu0 %1912 }
 0x322   :  { %1204 = vst.msk [vmem:[#allocation3 + $0x170] sm:$0xff] %vm1180_vm6, %v1134_v40  ;;  %v2039_v40 = vld [vmem:[#allocation3 + $0x48] sm:$0xff] }
 0x323   :  { %1651 = vrot.lane.b32.xlu1 %v6133_v9, %s5093_s2  ;;  %1523 = vrot.lane.b32.xlu0 %v6332_v17, %s5097_s18 }
 0x325   :  { %v1751_v46 = vpop.permute.xlu1 %1750  ;;  %v1628_v41 = vpop.permute.xlu0 %1627 }
 0x326   :  { %v2030_v44 = vld [vmem:[#allocation3] sm:$0xff]  ;;  %1837 = vst.msk [vmem:[#allocation3 + $0x10] sm:$0xff] %vm1835_vm13, %v1751_v46 }
 0x327   :  { %2302 = vmatmul.mubr.bf16.vlgmr.msra.gmra.mrb[0].mxu1 %v2030_v44  ;;  %1388 = vrot.lane.b32.xlu1 %v6133_v9, %s5095_s15  ;;  %v6451_v44 = vcombine.low %v5723_v16, %v6279_v42 }
 0x328   :  { %1390 = vrot.lane.b32.xlu0 %v6150_v24, %s5095_s15  ;;  %4463 = vmatprep.mubr.msk.bf16.mxu1 %vm1018_vm5, %v2033_v1 }
 0x329   :  { %v1871_v49 = vpop.permute.xlu1 %1870  ;;  %v1365_v33 = vpop.permute.xlu0 %1364 }
 0x32a   :  { %1957 = vst.msk [vmem:[#allocation3 + $0x10] sm:$0xff] %vm1955_vm14, %v1871_v49 }
 0x32b   :  { %1456 = vst.msk [vmem:[#allocation3 + $0x50] sm:$0xff] %vm1450_vm10, %v1365_v33  ;;  %1653 = vrot.lane.b32.xlu1 %v6150_v24, %s5093_s2 }
 0x32c   :  { %1127 = vrot.lane.b32.xlu0 %v6300_v63, %s5092_s16 }
 0x32d   :  { %v1753_v14 = vpop.permute.xlu1 %1752  ;;  %v1630_v45 = vpop.permute.xlu0 %1629 }
 0x32e   :  { %1838 = vst.msk [vmem:[#allocation3 + $0x20] sm:$0xff] %vm1835_vm13, %v1753_v14  ;;  %v2041_v14 = vld [vmem:[#allocation3 + $0x58] sm:$0xff] }
 0x32f   :  { %1958 = vst.msk [vmem:[#allocation3 + $0x20] sm:$0xff] %vm1955_vm14, %v5894_v62  ;;  %1254 = vrot.lane.b32.xlu1 %v6133_v9, %s5091_s0  ;;  %v2035_v62 = vld [vmem:[#allocation3 + $0x28] sm:$0xff]  ;;  %v4428_v9 = vcombine.low %v5681_v36, %v6216_v27  ;;  %v2037_v27 = vld [vmem:[#allocation3 + $0x38] sm:$0xff] }
 0x330   :  { %1256 = vrot.lane.b32.xlu0 %v6150_v24, %s5091_s0 }
 0x331   :  { %v1498_v28 = vpop.permute.xlu1 %1497  ;;  %v1367_v48 = vpop.permute.xlu0 %1366  ;;  %v2032_v21 = vld [vmem:[#allocation3 + $0x10] sm:$0xff] }
 0x332   :  { %1590 = vst.msk [vmem:[#allocation3 + $0x40] sm:$0xff] %vm1585_vm11, %v1498_v28  ;;  %2310 = vmatmul.mubr.bf16.gmra.mrb[4].mxu1 %v2032_v21 }
 0x333   :  { %1457 = vst.msk [vmem:[#allocation3 + $0x60] sm:$0xff] %vm1450_vm10, %v1367_v48  ;;  %1129 = vrot.lane.b32.xlu1 %v6332_v17, %s5092_s16  ;;  %4464 = vmatprep.mubr.msk.bf16.mxu1 %vm1018_vm5, %v2035_v62 }
 0x334   :  { %1720 = vst.msk [vmem:[#allocation3 + $0x40] sm:$0xff] %vm1715_vm12, %v1628_v41  ;;  %1782 = vrot.lane.b32.xlu0 %v6227_v53, %s5096_s17 }
 0x335   :  { %1592 = vst.msk [vmem:[#allocation3 + $0x60] sm:$0xff] %vm1585_vm11, %v5896_v23  ;;  %v1500_v24 = vpop.permute.xlu1 %1499  ;;  %v1104_v23 = vpop.permute.xlu0 %1103 }
 0x336   :  { %1840 = vst.msk [vmem:[#allocation3 + $0x40] sm:$0xff] %vm1835_vm13, %v5949_v5  ;;  %v2034_v36 = vld [vmem:[#allocation3 + $0x20] sm:$0xff] }
 0x337   :  { %1722 = vst.msk [vmem:[#allocation3 + $0x60] sm:$0xff] %vm1715_vm12, %v5918_v51  ;;  %1900 = vrot.lane.b32.xlu1 %v4428_v9, %s5094_s14  ;;  %v6422_v51 = vcombine.low %v6222_v56, %v6239_v38 }
 0x338   :  { %1591 = vst.msk [vmem:[#allocation3 + $0x50] sm:$0xff] %vm1585_vm11, %v1500_v24  ;;  %1659 = vrot.lane.b32.xlu0 %v6227_v53, %s5093_s2 }
 0x339   :  { %1189 = vst.msk [vmem:[#allocation3 + $0x80] sm:$0xff] %vm1180_vm6, %v1104_v23  ;;  %v1231_v5 = vpop.permute.xlu1 %1230  ;;  %v1233_v63 = vpop.permute.xlu0 %1232  ;;  %v6526_v23 = vcombine.low %v5971_v34, %v6277_v25 }
 0x33a   :  { %1721 = vst.msk [vmem:[#allocation3 + $0x50] sm:$0xff] %vm1715_vm12, %v1630_v45  ;;  %2318 = vmatmul.mubr.bf16.gmra.mrb[8].mxu1 %v2034_v36  ;;  %v2049_v36 = vld [vmem:[#allocation3 + $0x98] sm:$0xff] }
 0x33b   :  { %1316 = vst.msk [vmem:[#allocation3 + $0x80] sm:$0xff] %vm1307_vm8, %v1231_v5  ;;  %1541 = vrot.lane.b32.xlu1 %v6077_v3, %s5097_s18  ;;  %4465 = vmatprep.mubr.msk.bf16.mxu1 %vm1018_vm5, %v2037_v27 }
 0x33c   :  { %1459 = vst.msk [vmem:[#allocation3 + $0x80] sm:$0xff] %vm1450_vm10, %v6004_v59  ;;  %1531 = vrot.lane.b32.xlu0 %v6422_v51, %s5097_s18 }
 0x33d   :  { %v1106_v56 = vpop.permute.xlu1 %1105  ;;  %v1877_v38 = vpop.permute.xlu0 %1876 }
 0x33e   :  { %1190 = vst.msk [vmem:[#allocation3 + $0x90] sm:$0xff] %vm1180_vm6, %v1106_v56 }
 0x33f   :  { %1960 = vst.msk [vmem:[#allocation3 + $0x40] sm:$0xff] %vm1955_vm14, %v1877_v38  ;;  %1902 = vrot.lane.b32.xlu1 %v6422_v51, %s5094_s14 }
 0x340   :  { %1317 = vst.msk [vmem:[#allocation3 + $0x90] sm:$0xff] %vm1307_vm8, %v1233_v63  ;;  %1398 = vrot.lane.b32.xlu0 %v6243_v4, %s5095_s15 }
 0x341   :  { %v1401_v59 = vpop.permute.xlu1 %1400  ;;  %v1261_v17 = vpop.permute.xlu0 %1260 }
 0x342   :  { %1331 = vst.msk [vmem:[#allocation3 + $0x170] sm:$0xff] %vm1307_vm8, %v1261_v17  ;;  %2326 = vmatmul.mubr.bf16.gmra.mrb[12].mxu1 %v2036_v10 }
 0x343   :  { %1474 = vst.msk [vmem:[#allocation3 + $0x170] sm:$0xff] %vm1450_vm10, %v1401_v59  ;;  %1784 = vrot.lane.b32.xlu1 %v6243_v4, %s5096_s17  ;;  %4466 = vmatprep.mubr.msk.bf16.mxu1 %vm1018_vm5, %v2039_v40 }
 0x344   :  { %1135 = vrot.lane.b32.xlu0 %v4428_v9, %s5092_s16 }
 0x345   :  { %v1759_v46 = vpop.permute.xlu1 %1758  ;;  %v1636_v41 = vpop.permute.xlu0 %1635 }
 0x346   :  { %1841 = vst.msk [vmem:[#allocation3 + $0x50] sm:$0xff] %vm1835_vm13, %v1759_v46  ;;  %v2038_v33 = vld [vmem:[#allocation3 + $0x40] sm:$0xff]  ;;  %v4448_v46 = vcombine.low %v6302_v30, %v6318_v13 }
 0x347   :  { %1529 = vrot.lane.b32.xlu1 %v4428_v9, %s5097_s18 }
 0x348   :  { %1264 = vrot.lane.b32.xlu0 %v6243_v4, %s5091_s0 }
 0x349   :  { %v1879_v1 = vpop.permute.xlu1 %1878  ;;  %v1373_v49 = vpop.permute.xlu0 %1372 }
 0x34a   :  { %1961 = vst.msk [vmem:[#allocation3 + $0x50] sm:$0xff] %vm1955_vm14, %v1879_v1  ;;  %2334 = vmatmul.mubr.bf16.gmra.mrb[16].mxu1 %v2038_v33 }
 0x34b   :  { %1460 = vst.msk [vmem:[#allocation3 + $0x90] sm:$0xff] %vm1450_vm10, %v1373_v49  ;;  %1396 = vrot.lane.b32.xlu1 %v6227_v53, %s5095_s15  ;;  %4467 = vmatprep.mubr.msk.bf16.mxu1 %vm1018_vm5, %v2041_v14  ;;  %v2055_v49 = vld [vmem:[#allocation3 + $0xc8] sm:$0xff] }
 0x34c   :  { %1908 = vrot.lane.b32.xlu0 %v6451_v44, %s5094_s14 }
 0x34d   :  { %v1761_v45 = vpop.permute.xlu1 %1760  ;;  %v1638_v16 = vpop.permute.xlu0 %1637 }
 0x34e   :  { %1842 = vst.msk [vmem:[#allocation3 + $0x60] sm:$0xff] %vm1835_vm13, %v1761_v45 }
 0x34f   :  { %1962 = vst.msk [vmem:[#allocation3 + $0x60] sm:$0xff] %vm1955_vm14, %v6014_v47  ;;  %1661 = vrot.lane.b32.xlu1 %v6243_v4, %s5093_s2  ;;  %v2043_v47 = vld [vmem:[#allocation3 + $0x68] sm:$0xff] }
 0x350   :  { %1671 = vrot.lane.b32.xlu0 %v5748_v43, %s5093_s2 }
 0x351   :  { %v1506_v42 = vpop.permute.xlu1 %1505  ;;  %v1375_v28 = vpop.permute.xlu0 %1374  ;;  %v2040_v48 = vld [vmem:[#allocation3 + $0x50] sm:$0xff] }
 0x352   :  { %1594 = vst.msk [vmem:[#allocation3 + $0x80] sm:$0xff] %vm1585_vm11, %v1506_v42  ;;  %2342 = vmatmul.mubr.bf16.gmra.mrb[20].mxu1 %v2040_v48 }
 0x353   :  { %1461 = vst.msk [vmem:[#allocation3 + $0xa0] sm:$0xff] %vm1450_vm10, %v1375_v28  ;;  %1262 = vrot.lane.b32.xlu1 %v6227_v53, %s5091_s0  ;;  %4468 = vmatprep.mubr.msk.bf16.mxu1 %vm1018_vm5, %v2043_v47 }
 0x354   :  { %1724 = vst.msk [vmem:[#allocation3 + $0x80] sm:$0xff] %vm1715_vm12, %v1636_v41  ;;  %1790 = vrot.lane.b32.xlu0 %v6283_v35, %s5096_s17 }
 0x355   :  { %1596 = vst.msk [vmem:[#allocation3 + $0xa0] sm:$0xff] %vm1585_vm11, %v5975_v18  ;;  %v1508_v4 = vpop.permute.xlu1 %1507  ;;  %v1112_v21 = vpop.permute.xlu0 %1111  ;;  %v6483_v18 = vcombine.low %v6316_v50, %v5781_v22  ;;  %v2045_v22 = vld [vmem:[#allocation3 + $0x78] sm:$0xff]  ;;  %v6502_v50 = vcombine.low %v6255_v29, %v6261_v31  ;;  %v2047_v29 = vld [vmem:[#allocation3 + $0x88] sm:$0xff] }
 0x356   :  { %1844 = vst.msk [vmem:[#allocation3 + $0x80] sm:$0xff] %vm1835_vm13, %v6081_v58  ;;  %v2042_v53 = vld [vmem:[#allocation3 + $0x60] sm:$0xff] }
 0x357   :  { %1726 = vst.msk [vmem:[#allocation3 + $0xa0] sm:$0xff] %vm1715_vm12, %v6039_v0  ;;  %1137 = vrot.lane.b32.xlu1 %v6422_v51, %s5092_s16 }
 0x358   :  { %1595 = vst.msk [vmem:[#allocation3 + $0x90] sm:$0xff] %vm1585_vm11, %v1508_v4  ;;  %1920 = vrot.lane.b32.xlu0 %v6483_v18, %s5094_s14 }
 0x359   :  { %1193 = vst.msk [vmem:[#allocation3 + $0xc0] sm:$0xff] %vm1180_vm6, %v1112_v21  ;;  %v1239_v0 = vpop.permute.xlu1 %1238  ;;  %v1241_v58 = vpop.permute.xlu0 %1240  ;;  %v2059_v21 = vld [vmem:[#allocation3 + $0xe8] sm:$0xff] }
 0x35a   :  { %1725 = vst.msk [vmem:[#allocation3 + $0x90] sm:$0xff] %vm1715_vm12, %v1638_v16  ;;  %2350 = vmatmul.mubr.bf16.gmra.mrb[24].mxu1 %v2042_v53  ;;  %v2057_v16 = vld [vmem:[#allocation3 + $0xd8] sm:$0xff]  ;;  %v7403_v53 = vld [vmem:[#allocation9_spill] sm:$0xff] }
 0x35b   :  { %1320 = vst.msk [vmem:[#allocation3 + $0xc0] sm:$0xff] %vm1307_vm8, %v1239_v0  ;;  %1141 = vrot.lane.b32.xlu1 %v5716_v11, %s5092_s16  ;;  %4469 = vmatprep.mubr.msk.bf16.mxu1 %vm1018_vm5, %v2045_v22 }
 0x35c   :  { %1463 = vst.msk [vmem:[#allocation3 + $0xc0] sm:$0xff] %vm1450_vm10, %v6095_v26  ;;  %1268 = vrot.lane.b32.xlu0 %v5719_v12, %s5091_s0  ;;  %v2044_v26 = vld [vmem:[#allocation3 + $0x70] sm:$0xff] }
 0x35d   :  { %v1114_v62 = vpop.permute.xlu1 %1113  ;;  %v1885_v9 = vpop.permute.xlu0 %1884 }
 0x35e   :  { %1194 = vst.msk [vmem:[#allocation3 + $0xd0] sm:$0xff] %vm1180_vm6, %v1114_v62 }
 0x35f   :  { %1964 = vst.msk [vmem:[#allocation3 + $0x80] sm:$0xff] %vm1955_vm14, %v1885_v9  ;;  %1910 = vrot.lane.b32.xlu1 %v6502_v50, %s5094_s14 }
 0x360   :  { %1321 = vst.msk [vmem:[#allocation3 + $0xd0] sm:$0xff] %vm1307_vm8, %v1241_v58  ;;  %1667 = vrot.lane.b32.xlu0 %v6283_v35, %s5093_s2 }
 0x361   :  { %v1666_v11 = vpop.permute.xlu1 %1665  ;;  %v1536_v12 = vpop.permute.xlu0 %1535 }
 0x362   :  { %1609 = vst.msk [vmem:[#allocation3 + $0x170] sm:$0xff] %vm1585_vm11, %v1536_v12  ;;  %2358 = vmatmul.mubr.bf16.gmra.mrb[28].mxu1 %v2044_v26  ;;  %v7405_v12 = vld [vmem:[#allocation11_spill] sm:$0xff]  ;;  %v2060_v26 = vld [vmem:[#allocation3 + $0xf0] sm:$0xff] }
 0x363   :  { %1739 = vst.msk [vmem:[#allocation3 + $0x170] sm:$0xff] %vm1715_vm12, %v1666_v11  ;;  %1408 = vrot.lane.b32.xlu1 %v5748_v43, %s5095_s15  ;;  %4470 = vmatprep.mubr.msk.bf16.mxu1 %vm1018_vm5, %v2047_v29 }
 0x364   :  { %1539 = vrot.lane.b32.xlu0 %v6502_v50, %s5097_s18 }
 0x365   :  { %v1915_v31 = vpop.permute.xlu1 %1914  ;;  %v1795_v24 = vpop.permute.xlu0 %1794 }
 0x366   :  { %1859 = vst.msk [vmem:[#allocation3 + $0x170] sm:$0xff] %vm1835_vm13, %v1795_v24  ;;  %v2046_v63 = vld [vmem:[#allocation3 + $0x80] sm:$0xff] }
 0x367   :  { %1979 = vst.msk [vmem:[#allocation3 + $0x170] sm:$0xff] %vm1955_vm14, %v1915_v31  ;;  %1792 = vrot.lane.b32.xlu1 %v6267_v37, %s5096_s17 }
 0x368   :  { %1406 = vrot.lane.b32.xlu0 %v6267_v37, %s5095_s15 }
 0x369   :  { %v1767_v51 = vpop.permute.xlu1 %1766  ;;  %v1644_v5 = vpop.permute.xlu0 %1643 }
 0x36a   :  { %1845 = vst.msk [vmem:[#allocation3 + $0x90] sm:$0xff] %vm1835_vm13, %v1767_v51  ;;  %2366 = vmatmul.mubr.bf16.gmra.mrb[32].mxu1 %v2046_v63  ;;  %v2065_v63 = vld [vmem:[#allocation3 + $0x118] sm:$0xff] }
 0x36b   :  { %1537 = vrot.lane.b32.xlu1 %v6451_v44, %s5097_s18  ;;  %4471 = vmatprep.mubr.msk.bf16.mxu1 %vm1018_vm5, %v2049_v36  ;;  %v7407_v36 = vld [vmem:[#allocation14_spill] sm:$0xff] }
 0x36c   :  { %1916 = vrot.lane.b32.xlu0 %v6526_v23, %s5094_s14 }
 0x36d   :  { %v1887_v27 = vpop.permute.xlu1 %1886  ;;  %v1381_v56 = vpop.permute.xlu0 %1380 }
 0x36e   :  { %1965 = vst.msk [vmem:[#allocation3 + $0x90] sm:$0xff] %vm1955_vm14, %v1887_v27 }
 0x36f   :  { %1464 = vst.msk [vmem:[#allocation3 + $0xd0] sm:$0xff] %vm1450_vm10, %v1381_v56  ;;  %1404 = vrot.lane.b32.xlu1 %v6283_v35, %s5095_s15 }
 0x370   :  { %1543 = vrot.lane.b32.xlu0 %v5764_v52, %s5097_s18 }
 0x371   :  { %v1769_v34 = vpop.permute.xlu1 %1768  ;;  %v1646_v25 = vpop.permute.xlu0 %1645 }
 0x372   :  { %1846 = vst.msk [vmem:[#allocation3 + $0xa0] sm:$0xff] %vm1835_vm13, %v1769_v34  ;;  %v7409_v34 = vld [vmem:[#allocation12_spill] sm:$0xff] }
 0x373   :  { %1966 = vst.msk [vmem:[#allocation3 + $0xa0] sm:$0xff] %vm1955_vm14, %v6103_v15  ;;  %1669 = vrot.lane.b32.xlu1 %v6267_v37, %s5093_s2  ;;  %v2051_v15 = vld [vmem:[#allocation3 + $0xa8] sm:$0xff] }
 0x374   :  { %1798 = vrot.lane.b32.xlu0 %v6307_v54, %s5096_s17 }
 0x375   :  { %v1514_v38 = vpop.permute.xlu1 %1513  ;;  %v1247_v59 = vpop.permute.xlu0 %1246  ;;  %v2048_v17 = vld [vmem:[#allocation3 + $0x90] sm:$0xff] }
 0x376   :  { %1598 = vst.msk [vmem:[#allocation3 + $0xc0] sm:$0xff] %vm1585_vm11, %v1514_v38  ;;  %2374 = vmatmul.mubr.bf16.gmra.mrb[36].mxu1 %v2048_v17  ;;  %v2067_v17 = vld [vmem:[#allocation3 + $0x128] sm:$0xff] }
 0x377   :  { %1728 = vst.msk [vmem:[#allocation3 + $0xc0] sm:$0xff] %vm1715_vm12, %v1644_v5  ;;  %1673 = vrot.lane.b32.xlu1 %v5767_v57, %s5093_s2  ;;  %4472 = vmatprep.mubr.msk.bf16.mxu1 %vm1018_vm5, %v2051_v15  ;;  %v7410_v15 = vld [vmem:[#allocation15_spill] sm:$0xff] }
 0x378   :  { %1802 = vrot.lane.b32.xlu0 %v5787_v32, %s5096_s17  ;;  %1848 = vst.msk [vmem:[#allocation3 + $0xc0] sm:$0xff] %vm1835_vm13, %v6158_v55 }
 0x379   :  { %v1516_v10 = vpop.permute.xlu1 %1515  ;;  %v1122_v40 = vpop.permute.xlu0 %1121 }
 0x37a   :  { %1599 = vst.msk [vmem:[#allocation3 + $0xd0] sm:$0xff] %vm1585_vm11, %v1516_v10  ;;  %v2050_v1 = vld [vmem:[#allocation3 + $0xa0] sm:$0xff] }
 0x37b   :  { %1198 = vst.msk [vmem:[#allocation3 + $0x110] sm:$0xff] %vm1180_vm6, %v1122_v40  ;;  %1922 = vrot.lane.b32.xlu1 %v5797_v8, %s5094_s14 }
 0x37c   :  { %1729 = vst.msk [vmem:[#allocation3 + $0xd0] sm:$0xff] %vm1715_vm12, %v1646_v25  ;;  %1143 = vrot.lane.b32.xlu0 %v6451_v44, %s5092_s16  ;;  %v2053_v44 = vld [vmem:[#allocation3 + $0xb8] sm:$0xff] }
 0x37d   :  { %v1383_v55 = vpop.permute.xlu1 %1382  ;;  %v1893_v41 = vpop.permute.xlu0 %1892 }
 0x37e   :  { %1465 = vst.msk [vmem:[#allocation3 + $0xe0] sm:$0xff] %vm1450_vm10, %v1383_v55  ;;  %2382 = vmatmul.mubr.bf16.gmra.mrb[40].mxu1 %v2050_v1  ;;  %v2069_v1 = vld [vmem:[#allocation3 + $0x138] sm:$0xff] }
 0x37f   :  { %1968 = vst.msk [vmem:[#allocation3 + $0xc0] sm:$0xff] %vm1955_vm14, %v1893_v41  ;;  %1918 = vrot.lane.b32.xlu1 %v4448_v46, %s5094_s14  ;;  %4473 = vmatprep.mubr.msk.bf16.mxu1 %vm1018_vm5, %v2053_v44 }
 0x380   :  { %1600 = vst.msk [vmem:[#allocation3 + $0xe0] sm:$0xff] %vm1585_vm11, %v6116_v19  ;;  %1410 = vrot.lane.b32.xlu0 %v6349_v7, %s5095_s15  ;;  %v2052_v7 = vld [vmem:[#allocation3 + $0xb0] sm:$0xff] }
 0x381   :  { %1730 = vst.msk [vmem:[#allocation3 + $0xe0] sm:$0xff] %vm1715_vm12, %v6105_v20  ;;  %v1120_v30 = vpop.permute.xlu1 %1119  ;;  %v6575_v13 = vpop.permute.xlu0 %1402 }
 0x382   :  { %1197 = vst.msk [vmem:[#allocation3 + $0x100] sm:$0xff] %vm1180_vm6, %v1120_v30 }
 0x383   :  { %1324 = vst.msk [vmem:[#allocation3 + $0x100] sm:$0xff] %vm1307_vm8, %v1247_v59  ;;  %1270 = vrot.lane.b32.xlu1 %v6283_v35, %s5091_s0 }
 0x384   :  { %1924 = vrot.lane.b32.xlu0 %v5294_v6, %s5094_s14  ;;  %1467 = vst.msk [vmem:[#allocation3 + $0x100] sm:$0xff] %vm1450_vm10, %v6165_v60 }
 0x385   :  { %v1249_v19 = vpop.permute.xlu1 %1248  ;;  %v1895_v20 = vpop.permute.xlu0 %1894 }
 0x386   :  { %1325 = vst.msk [vmem:[#allocation3 + $0x110] sm:$0xff] %vm1307_vm8, %v1249_v19  ;;  %2390 = vmatmul.mubr.bf16.gmra.mrb[44].mxu1 %v2052_v7  ;;  %v2054_v45 = vld [vmem:[#allocation3 + $0xc0] sm:$0xff]  ;;  %v2068_v7 = vld [vmem:[#allocation3 + $0x130] sm:$0xff] }
 0x387   :  { %1800 = vrot.lane.b32.xlu1 %v6322_v39, %s5096_s17  ;;  %4474 = vmatprep.mubr.msk.bf16.mxu1 %vm1018_vm5, %v2055_v49  ;;  %v2071_v49 = vld [vmem:[#allocation3 + $0x148] sm:$0xff] }
 0x388   :  { %1272 = vrot.lane.b32.xlu0 %v6267_v37, %s5091_s0  ;;  %v7401_v37 = vld [vmem:[#allocation7_spill] sm:$0xff] }
 0x389   :  { %v6591_v35 = vpop.permute.xlu1 %1796  ;;  %v1140_v33 = vpop.permute.xlu0 %1139 }
 0x38a   :  { %1207 = vst.msk [vmem:[#allocation3 + $0x1a0] sm:$0xff] %vm1180_vm6, %v1140_v33 }
 0x38b   :  { %1804 = vrot.lane.b32.xlu1 %v5294_v6, %s5096_s17 }
 0x38c   :  { %1675 = vrot.lane.b32.xlu0 %v6307_v54, %s5093_s2 }
 0x38d   :  { %v1775_v60 = vpop.permute.xlu1 %1774  ;;  %v1777_v14 = vpop.permute.xlu0 %1776 }
 0x38e   :  { %1849 = vst.msk [vmem:[#allocation3 + $0xd0] sm:$0xff] %vm1835_vm13, %v1775_v60  ;;  %1850 = vst.msk [vmem:[#allocation3 + $0xe0] sm:$0xff] %vm1835_vm13, %v1777_v14  ;;  %2398 = vmatmul.mubr.bf16.gmra.mrb[48].mxu1 %v2054_v45 }
 0x38f   :  { %1969 = vst.msk [vmem:[#allocation3 + $0xd0] sm:$0xff] %vm1955_vm14, %v1895_v20  ;;  %1970 = vst.msk [vmem:[#allocation3 + $0xe0] sm:$0xff] %vm1955_vm14, %v7401_v37  ;;  %1145 = vrot.lane.b32.xlu1 %v6502_v50, %s5092_s16  ;;  %4475 = vmatprep.mubr.msk.bf16.mxu1 %vm1018_vm5, %v2057_v16  ;;  %v2073_v37 = vld [vmem:[#allocation3 + $0x158] sm:$0xff] }
 0x390   :  { %1147 = vrot.lane.b32.xlu0 %v6077_v3, %s5092_s16  ;;  %v7402_v3 = vld [vmem:[#allocation10_spill] sm:$0xff] }
 0x391   :  { %v1267_v42 = vpop.permute.xlu1 %1266  ;;  %v1522_v28 = vpop.permute.xlu0 %1521 }
 0x392   :  { %1334 = vst.msk [vmem:[#allocation3 + $0x1a0] sm:$0xff] %vm1307_vm8, %v1267_v42 }
 0x393   :  { %1602 = vst.msk [vmem:[#allocation3 + $0x100] sm:$0xff] %vm1585_vm11, %v1522_v28  ;;  %1545 = vrot.lane.b32.xlu1 %v6526_v23, %s5097_s18 }
 0x394   :  { %1547 = vrot.lane.b32.xlu0 %v4448_v46, %s5097_s18 }
 0x395   :  { %v1652_v48 = vpop.permute.xlu1 %1651  ;;  %v1524_v47 = vpop.permute.xlu0 %1523 }
 0x396   :  { %1732 = vst.msk [vmem:[#allocation3 + $0x100] sm:$0xff] %vm1715_vm12, %v1652_v48  ;;  %v2056_v4 = vld [vmem:[#allocation3 + $0xd0] sm:$0xff]  ;;  %v2058_v62 = vld [vmem:[#allocation3 + $0xe0] sm:$0xff] }
 0x397   :  { %1852 = vst.msk [vmem:[#allocation3 + $0x100] sm:$0xff] %vm1835_vm13, %v7402_v3  ;;  %1274 = vrot.lane.b32.xlu1 %v5748_v43, %s5091_s0  ;;  %2406 = vmatmul.mubr.bf16.gmra.mrb[52].mxu1 %v2056_v4  ;;  %v7404_v43 = vld [vmem:[#allocation8_spill] sm:$0xff]  ;;  %v2075_v4 = vld [vmem:[#allocation3 + $0x168] sm:$0xff] }
 0x398   :  { %1414 = vrot.lane.b32.xlu0 %v6322_v39, %s5095_s15  ;;  %4476 = vmatprep.mubr.msk.bf16.mxu1 %vm1018_vm5, %v2059_v21 }
 0x399   :  { %v1389_v0 = vpop.permute.xlu1 %1388 }
 0x39a   :  { %v1391_v58 = vpop.permute.xlu0 %1390  ;;  %1468 = vst.msk [vmem:[#allocation3 + $0x110] sm:$0xff] %vm1450_vm10, %v1389_v0 }
 0x39b   :  { %1469 = vst.msk [vmem:[#allocation3 + $0x120] sm:$0xff] %vm1450_vm10, %v1391_v58  ;;  %1412 = vrot.lane.b32.xlu1 %v6307_v54, %s5095_s15  ;;  %v2061_v54 = vld [vmem:[#allocation3 + $0xf8] sm:$0xff] }
 0x39c   :  { %1603 = vst.msk [vmem:[#allocation3 + $0x110] sm:$0xff] %vm1585_vm11, %v1524_v47  ;;  %1604 = vst.msk [vmem:[#allocation3 + $0x120] sm:$0xff] %vm1585_vm11, %v7403_v53  ;;  %1679 = vrot.lane.b32.xlu0 %v5787_v32, %s5093_s2  ;;  %v2077_v53 = vld [vmem:[#allocation3 + $0x178] sm:$0xff] }
 0x39d   :  { %1734 = vst.msk [vmem:[#allocation3 + $0x120] sm:$0xff] %vm1715_vm12, %v7404_v43  ;;  %v1654_v22 = vpop.permute.xlu1 %1653 }
 0x39e   :  { %v1128_v50 = vpop.permute.xlu0 %1127  ;;  %1733 = vst.msk [vmem:[#allocation3 + $0x110] sm:$0xff] %vm1715_vm12, %v1654_v22 }
 0x39f   :  { %1201 = vst.msk [vmem:[#allocation3 + $0x140] sm:$0xff] %vm1180_vm6, %v1128_v50  ;;  %1677 = vrot.lane.b32.xlu1 %v6322_v39, %s5093_s2  ;;  %2414 = vmatmul.mubr.bf16.gmra.mrb[56].mxu1 %v2058_v62  ;;  %v2076_v62 = vld [vmem:[#allocation3 + $0x170] sm:$0xff] }
 0x3a0   :  { %1276 = vrot.lane.b32.xlu0 %v5767_v57, %s5091_s0  ;;  %4477 = vmatprep.mubr.msk.bf16.mxu1 %vm1018_vm5, %v2061_v54  ;;  %v2079_v54 = vld [vmem:[#allocation3 + $0x188] sm:$0xff] }
 0x3a1   :  { %v1255_v9 = vpop.permute.xlu1 %1254 }
 0x3a2   :  { %v1257_v11 = vpop.permute.xlu0 %1256  ;;  %1328 = vst.msk [vmem:[#allocation3 + $0x140] sm:$0xff] %vm1307_vm8, %v1255_v9 }
 0x3a3   :  { %1471 = vst.msk [vmem:[#allocation3 + $0x140] sm:$0xff] %vm1450_vm10, %v7405_v12  ;;  %1549 = vrot.lane.b32.xlu1 %v6483_v18, %s5097_s18  ;;  %v2063_v18 = vld [vmem:[#allocation3 + $0x108] sm:$0xff] }
 0x3a4   :  { %1551 = vrot.lane.b32.xlu0 %v5797_v8, %s5097_s18 }
 0x3a5   :  { %v1130_v39 = vpop.permute.xlu1 %1129 }
 0x3a6   :  { %v1783_v57 = vpop.permute.xlu0 %1782  ;;  %1202 = vst.msk [vmem:[#allocation3 + $0x150] sm:$0xff] %vm1180_vm6, %v1130_v39 }
 0x3a7   :  { %1853 = vst.msk [vmem:[#allocation3 + $0x110] sm:$0xff] %vm1835_vm13, %v1783_v57  ;;  %1149 = vrot.lane.b32.xlu1 %v5764_v52, %s5092_s16  ;;  %2422 = vmatmul.mubr.bf16.gmra.mrb[60].mxu1 %v2060_v26  ;;  %v7406_v52 = vld [vmem:[#allocation6_spill] sm:$0xff]  ;;  %v2081_v26 = vld [vmem:[#allocation3 + $0x198] sm:$0xff] }
 0x3a8   :  { %1329 = vst.msk [vmem:[#allocation3 + $0x150] sm:$0xff] %vm1307_vm8, %v1257_v11  ;;  %3007 = vrot.lane.b32.xlu0 %v5294_v6, %s5097_s18  ;;  %4478 = vmatprep.mubr.msk.bf16.mxu1 %vm1018_vm5, %v2063_v18 }
 0x3a9   :  { %v1901_v8 = vpop.permute.xlu1 %1900 }
 0x3aa   :  { %v1660_v29 = vpop.permute.xlu0 %1659  ;;  %1972 = vst.msk [vmem:[#allocation3 + $0x100] sm:$0xff] %vm1955_vm14, %v1901_v8 }
 0x3ab   :  { %1416 = vrot.lane.b32.xlu1 %v5787_v32, %s5095_s15  ;;  %v7408_v32 = vld [vmem:[#allocation13_spill] sm:$0xff] }
 0x3ad   :  { %v6657_v31 = vpop.permute.xlu1 %1541 }
 0x3ae   :  { %v1532_v24 = vpop.permute.xlu0 %1531 }
 0x3af   :  { %1681 = vrot.lane.b32.xlu1 %v7406_v52, %s5093_s2 }
 0x3b1   :  { %v1903_v23 = vpop.permute.xlu1 %1902  ;;  %v2062_v5 = vld [vmem:[#allocation3 + $0x100] sm:$0xff] }
 0x3b2   :  { %v1399_v51 = vpop.permute.xlu0 %1398  ;;  %1973 = vst.msk [vmem:[#allocation3 + $0x110] sm:$0xff] %vm1955_vm14, %v1903_v23  ;;  %2430 = vmatmul.mubr.bf16.gmra.mrb[64].mxu1 %v2062_v5  ;;  %v2083_v5 = vld [vmem:[#allocation3 + $0x1a8] sm:$0xff] }
 0x3b3   :  { %1473 = vst.msk [vmem:[#allocation3 + $0x160] sm:$0xff] %vm1450_vm10, %v1399_v51  ;;  %4479 = vmatprep.mubr.msk.bf16.mxu1 %vm1018_vm5, %v2065_v63 }
 0x3b4   :  { %1608 = vst.msk [vmem:[#allocation3 + $0x160] sm:$0xff] %vm1585_vm11, %v7407_v36 }
 0x3b5   :  { %1738 = vst.msk [vmem:[#allocation3 + $0x160] sm:$0xff] %vm1715_vm12, %v7408_v32  ;;  %v1785_v27 = vpop.permute.xlu1 %1784 }
 0x3b6   :  { %v1136_v56 = vpop.permute.xlu0 %1135  ;;  %1854 = vst.msk [vmem:[#allocation3 + $0x120] sm:$0xff] %vm1835_vm13, %v1785_v27 }
 0x3b7   :  { %1205 = vst.msk [vmem:[#allocation3 + $0x180] sm:$0xff] %vm1180_vm6, %v1136_v56 }
 0x3b8   :  { %1974 = vst.msk [vmem:[#allocation3 + $0x120] sm:$0xff] %vm1955_vm14, %v7409_v34 }
 0x3b9   :  { %v1530_v25 = vpop.permute.xlu1 %1529  ;;  %v2064_v59 = vld [vmem:[#allocation3 + $0x110] sm:$0xff] }
 0x3ba   :  { %v1265_v38 = vpop.permute.xlu0 %1264  ;;  %1606 = vst.msk [vmem:[#allocation3 + $0x140] sm:$0xff] %vm1585_vm11, %v1530_v25  ;;  %2438 = vmatmul.mubr.bf16.gmra.mrb[68].mxu1 %v2064_v59  ;;  %v2085_v25 = vld [vmem:[#allocation3 + $0x1b8] sm:$0xff] }
 0x3bb   :  { %1736 = vst.msk [vmem:[#allocation3 + $0x140] sm:$0xff] %vm1715_vm12, %v1660_v29  ;;  %4480 = vmatprep.mubr.msk.bf16.mxu1 %vm1018_vm5, %v2067_v17 }
 0x3bc   :  { %1856 = vst.msk [vmem:[#allocation3 + $0x140] sm:$0xff] %vm1835_vm13, %v7410_v15 }
 0x3bd   :  { %v1397_v10 = vpop.permute.xlu1 %1396 }
 0x3be   :  { %v1909_v40 = vpop.permute.xlu0 %1908  ;;  %1472 = vst.msk [vmem:[#allocation3 + $0x150] sm:$0xff] %vm1450_vm10, %v1397_v10 }
 0x3bf   :  { %1976 = vst.msk [vmem:[#allocation3 + $0x140] sm:$0xff] %vm1955_vm14, %v1909_v40  ;;  %v2066_v41 = vld [vmem:[#allocation3 + $0x120] sm:$0xff] }
 0x3c0   :  { %1607 = vst.msk [vmem:[#allocation3 + $0x150] sm:$0xff] %vm1585_vm11, %v1532_v24 }
 0x3c1   :  { %v1662_v46 = vpop.permute.xlu1 %1661 }
 0x3c2   :  { %v1672_v55 = vpop.permute.xlu0 %1671  ;;  %1737 = vst.msk [vmem:[#allocation3 + $0x150] sm:$0xff] %vm1715_vm12, %v1662_v46  ;;  %2446 = vmatmul.mubr.bf16.gmra.mrb[72].mxu1 %v2066_v41 }
 0x3c3   :  { %4481 = vmatprep.mubr.msk.bf16.mxu1 %vm1018_vm5, %v2069_v1 }
 0x3c5   :  { %v1263_v44 = vpop.permute.xlu1 %1262 }
 0x3c6   :  { %v1791_v30 = vpop.permute.xlu0 %1790  ;;  %1332 = vst.msk [vmem:[#allocation3 + $0x180] sm:$0xff] %vm1307_vm8, %v1263_v44  ;;  %v2070_v45 = vld [vmem:[#allocation3 + $0x140] sm:$0xff] }
 0x3c7   :  { %1857 = vst.msk [vmem:[#allocation3 + $0x150] sm:$0xff] %vm1835_vm13, %v1791_v30 }
 0x3c8   :  { %1475 = vst.msk [vmem:[#allocation3 + $0x180] sm:$0xff] %vm1450_vm10, %v6575_v13 }
 0x3c9   :  { %v1138_v19 = vpop.permute.xlu1 %1137 }
 0x3ca   :  { %v6686_v20 = vpop.permute.xlu0 %1920  ;;  %1206 = vst.msk [vmem:[#allocation3 + $0x190] sm:$0xff] %vm1180_vm6, %v1138_v19  ;;  %2454 = vmatmul.mubr.bf16.gmra.mrb[76].mxu1 %v2068_v7 }
 0x3cb   :  { %1333 = vst.msk [vmem:[#allocation3 + $0x190] sm:$0xff] %vm1307_vm8, %v1265_v38  ;;  %4482 = vmatprep.mubr.msk.bf16.mxu1 %vm1018_vm5, %v2071_v49 }
 0x3cd   :  { %v1142_v33 = vpop.permute.xlu1 %1141 }
 0x3ce   :  { %v1269_v60 = vpop.permute.xlu0 %1268  ;;  %1208 = vst.msk [vmem:[#allocation3 + $0x1b0] sm:$0xff] %vm1180_vm6, %v1142_v33 }
 0x3cf   :  { %1335 = vst.msk [vmem:[#allocation3 + $0x1b0] sm:$0xff] %vm1307_vm8, %v1269_v60  ;;  %v2089_v60 = vld [vmem:[#allocation3 + $0x1d8] sm:$0xff] }
 0x3d1   :  { %v1911_v14 = vpop.permute.xlu1 %1910 }
 0x3d2   :  { %v1668_v13 = vpop.permute.xlu0 %1667  ;;  %1977 = vst.msk [vmem:[#allocation3 + $0x150] sm:$0xff] %vm1955_vm14, %v1911_v14  ;;  %2462 = vmatmul.mubr.bf16.gmra.mrb[80].mxu1 %v2070_v45 }
 0x3d3   :  { %4483 = vmatprep.mubr.msk.bf16.mxu1 %vm1018_vm5, %v2073_v37 }
 0x3d5   :  { %v1409_v16 = vpop.permute.xlu1 %1408 }
 0x3d6   :  { %v1540_v42 = vpop.permute.xlu0 %1539  ;;  %1478 = vst.msk [vmem:[#allocation3 + $0x1b0] sm:$0xff] %vm1450_vm10, %v1409_v16 }
 0x3d9   :  { %v1793_v28 = vpop.permute.xlu1 %1792  ;;  %v2072_v47 = vld [vmem:[#allocation3 + $0x150] sm:$0xff] }
 0x3da   :  { %v1407_v48 = vpop.permute.xlu0 %1406  ;;  %1858 = vst.msk [vmem:[#allocation3 + $0x160] sm:$0xff] %vm1835_vm13, %v1793_v28  ;;  %2470 = vmatmul.mubr.bf16.gmra.mrb[84].mxu1 %v2072_v47 }
 0x3db   :  { %1477 = vst.msk [vmem:[#allocation3 + $0x1a0] sm:$0xff] %vm1450_vm10, %v1407_v48  ;;  %4484 = vmatprep.mubr.msk.bf16.mxu1 %vm1018_vm5, %v2075_v4 }
 0x3dc   :  { %1978 = vst.msk [vmem:[#allocation3 + $0x160] sm:$0xff] %vm1955_vm14, %v6372_v61 }
 0x3dd   :  { %1612 = vst.msk [vmem:[#allocation3 + $0x1a0] sm:$0xff] %vm1585_vm11, %v6657_v31  ;;  %v1538_v3 = vpop.permute.xlu1 %1537 }
 0x3de   :  { %1742 = vst.msk [vmem:[#allocation3 + $0x1a0] sm:$0xff] %vm1715_vm12, %v1672_v55  ;;  %v1917_v21 = vpop.permute.xlu0 %1916  ;;  %v2087_v55 = vld [vmem:[#allocation3 + $0x1c8] sm:$0xff] }
 0x3df   :  { %1610 = vst.msk [vmem:[#allocation3 + $0x180] sm:$0xff] %vm1585_vm11, %v1538_v3 }
 0x3e0   :  { %1740 = vst.msk [vmem:[#allocation3 + $0x180] sm:$0xff] %vm1715_vm12, %v1668_v13 }
 0x3e1   :  { %1860 = vst.msk [vmem:[#allocation3 + $0x180] sm:$0xff] %vm1835_vm13, %v6591_v35  ;;  %v1405_v0 = vpop.permute.xlu1 %1404 }
 0x3e2   :  { %1980 = vst.msk [vmem:[#allocation3 + $0x180] sm:$0xff] %vm1955_vm14, %v1917_v21  ;;  %v1544_v61 = vpop.permute.xlu0 %1543  ;;  %v2091_v21 = vld [vmem:[#allocation3 + $0x1e8] sm:$0xff] }
 0x3e3   :  { %1476 = vst.msk [vmem:[#allocation3 + $0x190] sm:$0xff] %vm1450_vm10, %v1405_v0  ;;  %v2074_v58 = vld [vmem:[#allocation3 + $0x160] sm:$0xff] }
 0x3e4   :  { %1613 = vst.msk [vmem:[#allocation3 + $0x1b0] sm:$0xff] %vm1585_vm11, %v1544_v61  ;;  %1611 = vst.msk [vmem:[#allocation3 + $0x190] sm:$0xff] %vm1585_vm11, %v1540_v42  ;;  %2478 = vmatmul.mubr.bf16.gmra.mrb[88].mxu1 %v2074_v58  ;;  %v6771_v42 = vld [vmem:[%s7379_s4] ss:$0 sm:$0xff] }
 0x3e5   :  { %4485 = vmatprep.mubr.msk.bf16.mxu1 %vm1018_vm5, %v2077_v53  ;;  %v1670_v43 = vpop.permute.xlu1 %1669 }
 0x3e6   :  { %v1799_v22 = vpop.permute.xlu0 %1798  ;;  %1741 = vst.msk [vmem:[#allocation3 + $0x190] sm:$0xff] %vm1715_vm12, %v1670_v43 }
 0x3e7   :  { %1861 = vst.msk [vmem:[#allocation3 + $0x190] sm:$0xff] %vm1835_vm13, %v1799_v22 }
 0x3e9   :  { %v1674_v35 = vpop.permute.xlu1 %1673  ;;  %v2078_v57 = vld [vmem:[#allocation3 + $0x180] sm:$0xff] }
 0x3ea   :  { %v1803_v50 = vpop.permute.xlu0 %1802  ;;  %1743 = vst.msk [vmem:[#allocation3 + $0x1b0] sm:$0xff] %vm1715_vm12, %v1674_v35 }
 0x3eb   :  { %1863 = vst.msk [vmem:[#allocation3 + $0x1b0] sm:$0xff] %vm1835_vm13, %v1803_v50 }
 0x3ec   :  { %2486 = vmatmul.mubr.bf16.gmra.mrb[92].mxu1 %v2076_v62 }
 0x3ed   :  { %4486 = vmatprep.mubr.msk.bf16.mxu1 %vm1018_vm5, %v2079_v54  ;;  %v1923_v9 = vpop.permute.xlu1 %1922 }
 0x3ee   :  { %v1144_v11 = vpop.permute.xlu0 %1143  ;;  %1983 = vst.msk [vmem:[#allocation3 + $0x1b0] sm:$0xff] %vm1955_vm14, %v1923_v9 }
 0x3ef   :  { %1209 = vst.msk [vmem:[#allocation3 + $0x1c0] sm:$0xff] %vm1180_vm6, %v1144_v11 }
 0x3f1   :  { %v1919_v12 = vpop.permute.xlu1 %1918 }
 0x3f2   :  { %v1411_v39 = vpop.permute.xlu0 %1410  ;;  %1981 = vst.msk [vmem:[#allocation3 + $0x190] sm:$0xff] %vm1955_vm14, %v1919_v12 }
 0x3f4   :  { %2494 = vmatmul.mubr.bf16.gmra.mrb[96].mxu1 %v2078_v57 }
 0x3f5   :  { %4487 = vmatprep.mubr.msk.bf16.mxu1 %vm1018_vm5, %v2081_v26  ;;  %v1271_v18 = vpop.permute.xlu1 %1270  ;;  %v2084_v1 = vld [vmem:[#allocation3 + $0x1b0] sm:$0xff] }
 0x3f6   :  { %v6722_v8 = vpop.permute.xlu0 %1924  ;;  %1336 = vst.msk [vmem:[#allocation3 + $0x1c0] sm:$0xff] %vm1307_vm8, %v1271_v18 }
 0x3f7   :  { %1479 = vst.msk [vmem:[#allocation3 + $0x1c0] sm:$0xff] %vm1450_vm10, %v1411_v39 }
 0x3f9   :  { %v1801_v29 = vpop.permute.xlu1 %1800  ;;  %v2080_v24 = vld [vmem:[#allocation3 + $0x190] sm:$0xff] }
 0x3fa   :  { %v6726_v31 = vpop.f32.mrb[0].mxu1  ;;  %1862 = vst.msk [vmem:[#allocation3 + $0x1a0] sm:$0xff] %vm1835_vm13, %v1801_v29  ;;  %v1273_v52 = vpop.permute.xlu0 %1272  ;;  %v2093_v29 = vld [vmem:[#allocation3 + $0x1f8] sm:$0xff] }
 0x3fb   :  { %v2305_v23 = vpop.f32.mrb[1].mxu1  ;;  %1982 = vst.msk [vmem:[#allocation3 + $0x1a0] sm:$0xff] %vm1955_vm14, %v6686_v20  ;;  %v2304_v3 = vadd.f32 %v6771_v42, %v6726_v31 }
 0x3fc   :  { %v6731_v51 = vpop.f32.mrb[2].mxu1  ;;  %2502 = vmatmul.mubr.bf16.gmra.mrb[100].mxu1 %v2080_v24 }
 0x3fd   :  { %v2308_v63 = vpop.f32.mrb[3].mxu1  ;;  %4488 = vmatprep.mubr.msk.bf16.mxu1 %vm1018_vm5, %v2083_v5  ;;  %v6734_v36 = vpop.permute.xlu1 %1804  ;;  %v2307_v61 = vadd.f32 %v6771_v42, %v6731_v51  ;;  %v2558_v22 = vmax.f32 %v2304_v3, 0.0 }
 0x3fe   :  { %v1676_v32 = vpop.permute.xlu0 %1675 }
 0x3ff   :  { %v2559_v6 = vmax.f32 %v2307_v61, 0.0  ;;  %v4695_v39 = vpack.c.bf16 %v2558_v22, %v2558_v22 }
 0x401   :  { %v1146_v27 = vpop.permute.xlu1 %1145 }
 0x402   :  { %1210 = vst.msk [vmem:[#allocation3 + $0x1d0] sm:$0xff] %vm1180_vm6, %v1146_v27  ;;  %v1148_v56 = vpop.permute.xlu0 %1147  ;;  %v2082_v34 = vld [vmem:[#allocation3 + $0x1a0] sm:$0xff] }
 0x403   :  { %1337 = vst.msk [vmem:[#allocation3 + $0x1d0] sm:$0xff] %vm1307_vm8, %v1273_v52  ;;  %v4696_v52 = vpack.c.bf16 %v2559_v6, %v2559_v6 }
 0x404   :  { %1211 = vst.msk [vmem:[#allocation3 + $0x1e0] sm:$0xff] %vm1180_vm6, %v1148_v56  ;;  %2510 = vmatmul.mubr.bf16.gmra.mrb[104].mxu1 %v2082_v34 }
 0x405   :  { %4489 = vmatprep.mubr.msk.bf16.mxu1 %vm1018_vm5, %v2085_v25  ;;  %v1546_v38 = vpop.permute.xlu1 %1545  ;;  %v6740_v59 = vpop.f32.mrb[4].mxu1 }
 0x406   :  { %1614 = vst.msk [vmem:[#allocation3 + $0x1c0] sm:$0xff] %vm1585_vm11, %v1546_v38  ;;  %v1548_v17 = vpop.permute.xlu0 %1547  ;;  %v2313_v15 = vpop.f32.mrb[5].mxu1  ;;  %v2312_v57 = vadd.f32 %v6771_v42, %v6740_v59 }
 0x407   :  { %1744 = vst.msk [vmem:[#allocation3 + $0x1c0] sm:$0xff] %vm1715_vm12, %v1676_v32  ;;  %v6744_v10 = vpop.f32.mrb[6].mxu1 }
 0x408   :  { %1864 = vst.msk [vmem:[#allocation3 + $0x1c0] sm:$0xff] %vm1835_vm13, %v6734_v36  ;;  %v2316_v40 = vpop.f32.mrb[7].mxu1  ;;  %v2315_v31 = vadd.f32 %v6771_v42, %v6744_v10  ;;  %v2560_v63 = vmax.f32 %v2312_v57, 0.0 }
 0x409   :  { %1984 = vst.msk [vmem:[#allocation3 + $0x1c0] sm:$0xff] %vm1955_vm14, %v6722_v8  ;;  %v1275_v46 = vpop.permute.xlu1 %1274 }
 0x40a   :  { %1338 = vst.msk [vmem:[#allocation3 + $0x1e0] sm:$0xff] %vm1307_vm8, %v1275_v46  ;;  %v1415_v41 = vpop.permute.xlu0 %1414  ;;  %v2561_v34 = vmax.f32 %v2315_v31, 0.0 }
 0x40b   :  { %1481 = vst.msk [vmem:[#allocation3 + $0x1e0] sm:$0xff] %vm1450_vm10, %v1415_v41 }
 0x40c   :  { %2518 = vmatmul.mubr.bf16.gmra.mrb[108].mxu1 %v2084_v1  ;;  %v4698_v41 = vpack.c.bf16 %v2561_v34, %v2561_v34 }
 0x40d   :  { %4490 = vmatprep.mubr.msk.bf16.mxu1 %vm1018_vm5, %v2087_v55  ;;  %v1413_v44 = vpop.permute.xlu1 %1412  ;;  %v6753_v30 = vpop.f32.mrb[8].mxu1 }
 0x40e   :  { %1480 = vst.msk [vmem:[#allocation3 + $0x1d0] sm:$0xff] %vm1450_vm10, %v1413_v44  ;;  %v1680_v19 = vpop.permute.xlu0 %1679  ;;  %v2321_v20 = vpop.f32.mrb[9].mxu1  ;;  %v2320_v10 = vadd.f32 %v6771_v42, %v6753_v30 }
 0x40f   :  { %1615 = vst.msk [vmem:[#allocation3 + $0x1d0] sm:$0xff] %vm1585_vm11, %v1548_v17  ;;  %v6757_v7 = vpop.f32.mrb[10].mxu1 }
 0x410   :  { %v2324_v49 = vpop.f32.mrb[11].mxu1  ;;  %v2086_v13 = vld [vmem:[#allocation3 + $0x1c0] sm:$0xff]  ;;  %v2323_v44 = vadd.f32 %v6771_v42, %v6757_v7 }
 0x411   :  { %v1678_v33 = vpop.permute.xlu1 %1677  ;;  %v2562_v49 = vmax.f32 %v2320_v10, 0.0 }
 0x412   :  { %1745 = vst.msk [vmem:[#allocation3 + $0x1d0] sm:$0xff] %vm1715_vm12, %v1678_v33  ;;  %v1277_v14 = vpop.permute.xlu0 %1276 }
 0x413   :  { %1865 = vst.msk [vmem:[#allocation3 + $0x1d0] sm:$0xff] %vm1835_vm13, %v6734_v36 }
 0x414   :  { %2526 = vmatmul.mubr.bf16.gmra.mrb[112].mxu1 %v2086_v13  ;;  %1985 = vst.msk [vmem:[#allocation3 + $0x1d0] sm:$0xff] %vm1955_vm14, %v6722_v8 }
 0x415   :  { %4491 = vmatprep.mubr.msk.bf16.mxu1 %vm1018_vm5, %v2089_v60  ;;  %v1550_v45 = vpop.permute.xlu1 %1549  ;;  %v6765_v37 = vpop.f32.mrb[12].mxu1 }
 0x416   :  { %1616 = vst.msk [vmem:[#allocation3 + $0x1e0] sm:$0xff] %vm1585_vm11, %v1550_v45  ;;  %v2329_v16 = vpop.f32.mrb[13].mxu1  ;;  %v1552_v48 = vpop.permute.xlu0 %1551  ;;  %v2563_v45 = vmax.f32 %v2323_v44, 0.0  ;;  %v2328_v3 = vadd.f32 %v6771_v42, %v6765_v37 }
 0x417   :  { %1746 = vst.msk [vmem:[#allocation3 + $0x1e0] sm:$0xff] %vm1715_vm12, %v1680_v19  ;;  %v6774_v28 = vpop.f32.mrb[14].mxu1 }
 0x418   :  { %1866 = vst.msk [vmem:[#allocation3 + $0x1e0] sm:$0xff] %vm1835_vm13, %v6734_v36  ;;  %v2332_v47 = vpop.f32.mrb[15].mxu1 }
 0x419   :  { %1986 = vst.msk [vmem:[#allocation3 + $0x1e0] sm:$0xff] %vm1955_vm14, %v6722_v8  ;;  %v1150_v4 = vpop.permute.xlu1 %1149 }
 0x41a   :  { %1212 = vst.msk [vmem:[#allocation3 + $0x1f0] sm:$0xff] %vm1180_vm6, %v1150_v4  ;;  %v6786_v58 = vpop.permute.xlu0 %3007  ;;  %v4699_v4 = vpack.c.bf16 %v2562_v49, %v2562_v49 }
 0x41b   :  { %1339 = vst.msk [vmem:[#allocation3 + $0x1f0] sm:$0xff] %vm1307_vm8, %v1277_v14  ;;  %v2088_v0 = vld [vmem:[#allocation3 + $0x1d0] sm:$0xff] }
 0x41c   :  { %2534 = vmatmul.mubr.bf16.gmra.mrb[116].mxu1 %v2088_v0  ;;  %3688 = vst.msk [vmem:[#allocation5] sm:$0xff] %vm3687_vm0, %v6786_v58  ;;  %3728 = vst.msk [vmem:[#allocation5 + $0x40] sm:$0xff] %vm3687_vm0, %v6786_v58 }
 0x41d   :  { %v1417_v53 = vpop.permute.xlu1 %1416  ;;  %v2335_v43 = vpop.f32.mrb[16].mxu1  ;;  %4492 = vmatprep.mubr.msk.bf16.mxu1 %vm1018_vm5, %v2091_v21  ;;  %3029 = vst.msk [vmem:[#allocation4] sm:$0xff] %vm3028_vm1, %v6786_v58  ;;  %3030 = vst.msk [vmem:[#allocation4 + $0x18] sm:$0xff] %vm3028_vm1, %v6786_v58 }
 0x41e   :  { %1482 = vst.msk [vmem:[#allocation3 + $0x1f0] sm:$0xff] %vm1450_vm10, %v1417_v53  ;;  %v2336_v35 = vadd.f32 %v6771_v42, %v2335_v43  ;;  %v2337_v50 = vpop.f32.mrb[17].mxu1  ;;  %v4700_v53 = vpack.c.bf16 %v2563_v45, %v2563_v45  ;;  %v2331_v43 = vadd.f32 %v6771_v42, %v6774_v28  ;;  %v5031_v45 = vld [vmem:[%s7380_s5 + $0x58] sm:$0xff]  }
 0x41f   :  { %1617 = vst.msk [vmem:[#allocation3 + $0x1f0] sm:$0xff] %vm1585_vm11, %v1552_v48  ;;  %v2338_v62 = vpop.f32.mrb[18].mxu1 }
 0x420   :  { %v2566_v54 = vmax.f32 %v2336_v35, 0.0  ;;  %v2339_v9 = vadd.f32 %v6771_v42, %v2338_v62  ;;  %v2340_v11 = vpop.f32.mrb[19].mxu1  ;;  %v2090_v24 = vld [vmem:[#allocation3 + $0x1e0] sm:$0xff]  ;;  %v2564_v62 = vmax.f32 %v2328_v3, 0.0 }
 0x421   :  { %v1682_v12 = vpop.permute.xlu1 %1681  ;;  %v2565_v11 = vmax.f32 %v2331_v43, 0.0  ;;  %v5033_v43 = vld [vmem:[%s7380_s5 + $0x60] sm:$0xff]  }
 0x422   :  { %v4703_v26 = vpack.c.bf16 %v2566_v54, %v2566_v54  ;;  %v2567_v18 = vmax.f32 %v2339_v9, 0.0  ;;  %1747 = vst.msk [vmem:[#allocation3 + $0x1f0] sm:$0xff] %vm1715_vm12, %v1682_v12  ;;  %v4701_v28 = vpack.c.bf16 %v2564_v62, %v2564_v62 }
 0x423   :  { %1867 = vst.msk [vmem:[#allocation3 + $0x1f0] sm:$0xff] %vm1835_vm13, %v6734_v36 }
 0x424   :  { %v2878_v23 = vmax.bf16 %v4703_v26, %v4695_v39  ;;  %v4704_v51 = vpack.c.bf16 %v2567_v18, %v2567_v18  ;;  %1987 = vst.msk [vmem:[#allocation3 + $0x1f0] sm:$0xff] %vm1955_vm14, %v6722_v8  ;;  %2542 = vmatmul.mubr.bf16.gmra.mrb[120].mxu1 %v2090_v24  ;;  %v4697_v8 = vpack.c.bf16 %v2560_v63, %v2560_v63 }
 0x425   :  { %v2343_v5 = vpop.f32.mrb[20].mxu1  ;;  %4493 = vmatprep.mubr.msk.bf16.mxu1 %vm1018_vm5, %v2093_v29  ;;  %v4702_v24 = vpack.c.bf16 %v2565_v11, %v2565_v11  ;;  %v5035_v11 = vld [vmem:[%s7380_s5 + $0x68] sm:$0xff]  }
 0x426   :  { %v2879_v32 = vmax.bf16 %v4704_v51, %v4696_v52  ;;  %v2344_v27 = vadd.f32 %v6771_v42, %v2343_v5  ;;  %v2345_v56 = vpop.f32.mrb[21].mxu1 }
 0x427   :  { %v2346_v25 = vpop.f32.mrb[22].mxu1 }
 0x428   :  { %v2910_v38 = vmax.bf16 %v2879_v32, %v2878_v23  ;;  %v2568_v59 = vmax.f32 %v2344_v27, 0.0  ;;  %v2347_v17 = vadd.f32 %v6771_v42, %v2346_v25  ;;  %v2348_v15 = vpop.f32.mrb[23].mxu1 }
 0x42a   :  { %v4705_v40 = vpack.c.bf16 %v2568_v59, %v2568_v59  ;;  %v2569_v46 = vmax.f32 %v2347_v17, 0.0  ;;  %v4558_v55 = vcombine.low %v7400_v2, %v2910_v38 }
 0x42b   :  { %v2092_v1 = vld [vmem:[#allocation3 + $0x1f0] sm:$0xff] }
 0x42c   :  { %v2880_v19 = vmax.bf16 %v4705_v40, %v4697_v8  ;;  %v4706_v20 = vpack.c.bf16 %v2569_v46, %v2569_v46  ;;  %3045 = vrot.lane.b32.xlu0 %v4558_v55, %s5096_s17  ;;  %2550 = vmatmul.mubr.bf16.gmra.mrb[124].mxu1 %v2092_v1  ;;  %2959 = vst.msk [vmem:[#allocation4 + $0x30] sm:$0xff] %vm2956_vm7, %v4558_v55  ;;  %v5025_v55 = vld [vmem:[%s7380_s5 + $0x40] sm:$0xff]   ;;  %v5027_v1 = vld [vmem:[%s7380_s5 + $0x48] sm:$0xff]  }
 0x42d   :  { %v2351_v33 = vpop.f32.mrb[24].mxu1  ;;  %4779 = vmatprep.subr.bf16.mxu0 %v5025_v55 }
 0x42e   :  { %v2881_v30 = vmax.bf16 %v4706_v20, %v4698_v41  ;;  %v2352_v60 = vadd.f32 %v6771_v42, %v2351_v33  ;;  %v2353_v14 = vpop.f32.mrb[25].mxu1  ;;  %v5026_v41 = vld [vmem:[%s7380_s5] sm:$0xff]  }
 0x42f   :  { %v2354_v13 = vpop.f32.mrb[26].mxu1  ;;  %4780 = vmatpush3.bf16.msra.mxu0 %v5026_v41 }
 0x430   :  { %v2911_v16 = vmax.bf16 %v2881_v30, %v2880_v19  ;;  %v2570_v48 = vmax.f32 %v2352_v60, 0.0  ;;  %v2355_v47 = vadd.f32 %v6771_v42, %v2354_v13  ;;  %v2356_v7 = vpop.f32.mrb[27].mxu1  ;;  %v5028_v19 = vld [vmem:[%s7380_s5 + $0x8] sm:$0xff]   ;;  %4781 = vmatprep.subr.bf16.mxu0 %v5027_v1  ;;  %v5029_v30 = vld [vmem:[%s7380_s5 + $0x50] sm:$0xff]  }
 0x431   :  { %v5030_v60 = vld [vmem:[%s7380_s5 + $0x10] sm:$0xff]  }
 0x432   :  { %v4707_v21 = vpack.c.bf16 %v2570_v48, %v2570_v48  ;;  %v2571_v0 = vmax.f32 %v2355_v47, 0.0  ;;  %v4564_v61 = vcombine.low %v2910_v38, %v2911_v16  ;;  %v5032_v48 = vld [vmem:[%s7380_s5 + $0x18] sm:$0xff]  }
 0x433   :  { %4782 = vmatpush3.bf16.msra.mxu0 %v5028_v19 }
 0x434   :  { %v2882_v22 = vmax.bf16 %v4707_v21, %v4699_v4  ;;  %v4708_v35 = vpack.c.bf16 %v2571_v0, %v2571_v0  ;;  %2977 = vrot.lane.b32.xlu0 %v4564_v61, %s5091_s0  ;;  %3090 = vst.msk [vmem:[#allocation4 + $0x8] sm:$0xff] %vm2956_vm7, %v4564_v61  ;;  %4783 = vmatprep.subr.bf16.mxu0 %v5029_v30 }
 0x435   :  { %v2359_v50 = vpop.f32.mrb[28].mxu1 }
 0x436   :  { %v2883_v6 = vmax.bf16 %v4708_v35, %v4700_v53  ;;  %v2360_v54 = vadd.f32 %v6771_v42, %v2359_v50  ;;  %v2361_v9 = vpop.f32.mrb[29].mxu1 }
 0x437   :  { %v2362_v37 = vpop.f32.mrb[30].mxu1  ;;  %4784 = vmatpush3.bf16.msra.mxu0 %v5030_v60 }
 0x438   :  { %v2912_v12 = vmax.bf16 %v2883_v6, %v2882_v22  ;;  %v2572_v39 = vmax.f32 %v2360_v54, 0.0  ;;  %v2363_v57 = vadd.f32 %v6771_v42, %v2362_v37  ;;  %v2364_v26 = vpop.f32.mrb[31].mxu1  ;;  %4785 = vmatprep.subr.bf16.mxu0 %v5031_v45  ;;  %v5034_v22 = vld [vmem:[%s7380_s5 + $0x20] sm:$0xff]  }
 0x43a   :  { %v4709_v18 = vpack.c.bf16 %v2572_v39, %v2572_v39  ;;  %v2573_v29 = vmax.f32 %v2363_v57, 0.0  ;;  %v4559_v31 = vcombine.low %v2911_v16, %v2912_v12 }
 0x43b   :  { %4786 = vmatpush3.bf16.msra.mxu0 %v5032_v48 }
 0x43c   :  { %v2884_v52 = vmax.bf16 %v4709_v18, %v4701_v28  ;;  %v4710_v23 = vpack.c.bf16 %v2573_v29, %v2573_v29  ;;  %3099 = vrot.lane.b32.xlu0 %v4559_v31, %s5091_s0  ;;  %2960 = vst.msk [vmem:[#allocation4 + $0x48] sm:$0xff] %vm2956_vm7, %v4559_v31  ;;  %4787 = vmatprep.subr.bf16.mxu0 %v5033_v43 }
 0x43d   :  { %v2367_v51 = vpop.f32.mrb[32].mxu1 }
 0x43e   :  { %v2885_v5 = vmax.bf16 %v4710_v23, %v4702_v24  ;;  %v2369_v63 = vpop.f32.mrb[33].mxu1  ;;  %v2368_v14 = vadd.f32 %v6771_v42, %v2367_v51  ;;  %v5037_v24 = vld [vmem:[%s7380_s5 + $0x70] sm:$0xff]  }
 0x43f   :  { %v2370_v32 = vpop.f32.mrb[34].mxu1  ;;  %4788 = vmatpush3.bf16.msra.mxu0 %v5034_v22  ;;  %v5038_v23 = vld [vmem:[%s7380_s5 + $0x30] sm:$0xff]  }
 0x440   :  { %v2913_v27 = vmax.bf16 %v2885_v5, %v2884_v52  ;;  %v2372_v56 = vpop.f32.mrb[35].mxu1  ;;  %3047 = vrot.lane.b32.xlu0 %v4559_v31, %s5096_s17  ;;  %v2371_v13 = vadd.f32 %v6771_v42, %v2370_v32  ;;  %v2574_v47 = vmax.f32 %v2368_v14, 0.0  ;;  %4789 = vmatprep.subr.bf16.mxu0 %v5035_v11 }
 0x442   :  { %v6842_v34 = vcombine.low %v2913_v27, %v7400_v2  ;;  %v6844_v25 = vcombine.low %v2912_v12, %v2913_v27  ;;  %v2575_v21 = vmax.f32 %v2371_v13, 0.0  ;;  %v4711_v35 = vpack.c.bf16 %v2574_v47, %v2574_v47  ;;  %v5036_v12 = vld [vmem:[%s7380_s5 + $0x28] sm:$0xff]  }
 0x443   :  { %4790 = vmatpush3.bf16.msra.mxu0 %v5036_v12 }
 0x444   :  { %3101 = vrot.lane.b32.xlu1 %v6842_v34, %s5091_s0  ;;  %3009 = vrot.lane.b32.xlu0 %v4559_v31, %s5097_s18  ;;  %3091 = vst.msk [vmem:[#allocation4 + $0x20] sm:$0xff] %vm2956_vm7, %v6844_v25  ;;  %v4712_v6 = vpack.c.bf16 %v2575_v21, %v2575_v21 }
 0x445   :  { %4791 = vmatprep.subr.bf16.mxu0 %v5037_v24 }
 0x447   :  { %4792 = vmatpush3.bf16.msra.mxu0 %v5038_v23 }
 0x449   :  { %v2375_v38 = vpop.f32.mrb[36].mxu1 }
 0x44a   :  { %v2377_v59 = vpop.f32.mrb[37].mxu1  ;;  %v2376_v54 = vadd.f32 %v6771_v42, %v2375_v38 }
 0x44b   :  { %v2378_v17 = vpop.f32.mrb[38].mxu1 }
 0x44c   :  { %v2380_v15 = vpop.f32.mrb[39].mxu1  ;;  %v2379_v39 = vadd.f32 %v6771_v42, %v2378_v17  ;;  %v2576_v28 = vmax.f32 %v2376_v54, 0.0 }
 0x44d   :  { %v5039_v15 = vld [vmem:[%s7380_s5 + $0x78] sm:$0xff]  }
 0x44e   :  { %v2577_v51 = vmax.f32 %v2379_v39, 0.0  ;;  %v4713_v38 = vpack.c.bf16 %v2576_v28, %v2576_v28  ;;  %4793 = vmatprep.subr.bf16.mxu0 %v5039_v15 }
 0x451   :  { %v6851_v10 = vpop.f32.mrb[40].mxu1 }
 0x452   :  { %v2385_v8 = vpop.f32.mrb[41].mxu1  ;;  %v2384_v56 = vadd.f32 %v6771_v42, %v6851_v10 }
 0x453   :  { %v6853_v40 = vpop.f32.mrb[42].mxu1  ;;  %v5040_v8 = vld [vmem:[%s7380_s5 + $0x38] sm:$0xff]  }
 0x454   :  { %v2388_v46 = vpop.f32.mrb[43].mxu1  ;;  %v2387_v10 = vadd.f32 %v6771_v42, %v6853_v40  ;;  %v2578_v1 = vmax.f32 %v2384_v56, 0.0  ;;  %4794 = vmatpush3.bf16.msra.mxu0 %v5040_v8 }
 0x455   :  { %v4714_v46 = vpack.c.bf16 %v2577_v51, %v2577_v51 }
 0x456   :  { %v2579_v14 = vmax.f32 %v2387_v10, 0.0  ;;  %v4715_v47 = vpack.c.bf16 %v2578_v1, %v2578_v1 }
 0x458   :  { %v4716_v21 = vpack.c.bf16 %v2579_v14, %v2579_v14 }
 0x459   :  { %v6864_v44 = vpop.f32.mrb[44].mxu1 }
 0x45a   :  { %v2393_v20 = vpop.f32.mrb[45].mxu1  ;;  %v2392_v40 = vadd.f32 %v6771_v42, %v6864_v44 }
 0x45b   :  { %v6869_v49 = vpop.f32.mrb[46].mxu1 }
 0x45c   :  { %v2396_v33 = vpop.f32.mrb[47].mxu1  ;;  %v2580_v22 = vmax.f32 %v2392_v40, 0.0 }
 0x461   :  { %v2399_v16 = vpop.f32.mrb[48].mxu1 }
 0x462   :  { %v2400_v7 = vadd.f32 %v6771_v42, %v2399_v16  ;;  %v2401_v4 = vpop.f32.mrb[49].mxu1 }
 0x463   :  { %v2402_v3 = vpop.f32.mrb[50].mxu1 }
 0x464   :  { %v2582_v0 = vmax.f32 %v2400_v7, 0.0  ;;  %v2403_v61 = vadd.f32 %v6771_v42, %v2402_v3  ;;  %v2404_v53 = vpop.f32.mrb[51].mxu1 }
 0x466   :  { %v4719_v50 = vpack.c.bf16 %v2582_v0, %v2582_v0  ;;  %v2583_v62 = vmax.f32 %v2403_v61, 0.0  ;;  %v2395_v0 = vadd.f32 %v6771_v42, %v6869_v49  ;;  %v4717_v49 = vpack.c.bf16 %v2580_v22, %v2580_v22 }
 0x468   :  { %v2886_v9 = vmax.bf16 %v4719_v50, %v4711_v35  ;;  %v4720_v37 = vpack.c.bf16 %v2583_v62, %v2583_v62 }
 0x46a   :  { %v2887_v57 = vmax.bf16 %v4720_v37, %v4712_v6  ;;  %v2407_v26 = vpop.f32.mrb[52].mxu1  ;;  %v2581_v6 = vmax.f32 %v2395_v0, 0.0 }
 0x46b   :  { %v2408_v29 = vadd.f32 %v6771_v42, %v2407_v26  ;;  %v2409_v31 = vpop.f32.mrb[53].mxu1 }
 0x46c   :  { %v2914_v18 = vmax.bf16 %v2887_v57, %v2886_v9  ;;  %v2410_v52 = vpop.f32.mrb[54].mxu1  ;;  %v4718_v26 = vpack.c.bf16 %v2581_v6, %v2581_v6 }
 0x46d   :  { %v2584_v5 = vmax.f32 %v2408_v29, 0.0  ;;  %v2411_v63 = vadd.f32 %v6771_v42, %v2410_v52  ;;  %v2412_v32 = vpop.f32.mrb[55].mxu1 }
 0x46e   :  { %v6910_v27 = vcombine.low %v7400_v2, %v2914_v18 }
 0x46f   :  { %v4721_v59 = vpack.c.bf16 %v2584_v5, %v2584_v5  ;;  %v2585_v17 = vmax.f32 %v2411_v63, 0.0 }
 0x470   :  { %3131 = vrot.lane.b32.xlu1 %v6910_v27, %s5097_s18  ;;  %2961 = vst.msk [vmem:[#allocation4 + $0x60] sm:$0xff] %vm2956_vm7, %v6910_v27 }
 0x471   :  { %v2888_v55 = vmax.bf16 %v4721_v59, %v4713_v38  ;;  %v4722_v41 = vpack.c.bf16 %v2585_v17, %v2585_v17 }
 0x472   :  { %v2415_v19 = vpop.f32.mrb[56].mxu1 }
 0x473   :  { %v2889_v20 = vmax.bf16 %v4722_v41, %v4714_v46  ;;  %v2416_v33 = vadd.f32 %v6771_v42, %v2415_v19  ;;  %v2417_v30 = vpop.f32.mrb[57].mxu1 }
 0x474   :  { %v2418_v60 = vpop.f32.mrb[58].mxu1 }
 0x475   :  { %v2915_v13 = vmax.bf16 %v2889_v20, %v2888_v55  ;;  %v2586_v45 = vmax.f32 %v2416_v33, 0.0  ;;  %v2419_v16 = vadd.f32 %v6771_v42, %v2418_v60  ;;  %v2420_v48 = vpop.f32.mrb[59].mxu1 }
 0x477   :  { %v4723_v7 = vpack.c.bf16 %v2586_v45, %v2586_v45  ;;  %v2587_v4 = vmax.f32 %v2419_v16, 0.0  ;;  %v4566_v3 = vcombine.low %v2914_v18, %v2915_v13 }
 0x479   :  { %v2890_v61 = vmax.bf16 %v4723_v7, %v4715_v47  ;;  %v4724_v53 = vpack.c.bf16 %v2587_v4, %v2587_v4  ;;  %3151 = vrot.lane.b32.xlu1 %v4566_v3, %s5096_s17  ;;  %3092 = vst.msk [vmem:[#allocation4 + $0x38] sm:$0xff] %vm2956_vm7, %v4566_v3 }
 0x47a   :  { %v2423_v43 = vpop.f32.mrb[60].mxu1 }
 0x47b   :  { %v2891_v35 = vmax.bf16 %v4724_v53, %v4716_v21  ;;  %v2424_v50 = vadd.f32 %v6771_v42, %v2423_v43  ;;  %v2425_v62 = vpop.f32.mrb[61].mxu1 }
 0x47c   :  { %v2426_v44 = vpop.f32.mrb[62].mxu1 }
 0x47d   :  { %v2916_v54 = vmax.bf16 %v2891_v35, %v2890_v61  ;;  %v2588_v9 = vmax.f32 %v2424_v50, 0.0  ;;  %v2427_v37 = vadd.f32 %v6771_v42, %v2426_v44  ;;  %v2428_v11 = vpop.f32.mrb[63].mxu1 }
 0x47f   :  { %v4561_v12 = vcombine.low %v2915_v13, %v2916_v54  ;;  %v4725_v39 = vpack.c.bf16 %v2588_v9, %v2588_v9  ;;  %v2589_v57 = vmax.f32 %v2427_v37, 0.0 }
 0x481   :  { %3181 = vst.msk [vmem:[#allocation4 + $0x10] sm:$0xff] %vm2956_vm7, %v4561_v12  ;;  %2962 = vst.msk [vmem:[#allocation4 + $0x78] sm:$0xff] %vm2956_vm7, %v4561_v12  ;;  %v2892_v28 = vmax.bf16 %v4725_v39, %v4717_v49  ;;  %v4726_v18 = vpack.c.bf16 %v2589_v57, %v2589_v57  ;;  %3103 = vrot.lane.b32.xlu1 %v4561_v12, %s5091_s0  ;;  %3013 = vrot.lane.b32.xlu0 %v4561_v12, %s5097_s18 }
 0x483   :  { %v2893_v29 = vmax.bf16 %v4726_v18, %v4718_v26 }
 0x485   :  { %v2431_v31 = vpop.f32.mrb[64].mxu1  ;;  %v2917_v24 = vmax.bf16 %v2893_v29, %v2892_v28  ;;  %3049 = vrot.lane.b32.xlu0 %v6910_v27, %s5096_s17 }
 0x486   :  { %v2433_v52 = vpop.f32.mrb[65].mxu1  ;;  %v2432_v41 = vadd.f32 %v6771_v42, %v2431_v31 }
 0x487   :  { %v2434_v23 = vpop.f32.mrb[66].mxu1  ;;  %v6942_v5 = vcombine.low %v2916_v54, %v2917_v24  ;;  %v6945_v63 = vcombine.low %v2917_v24, %v7400_v2 }
 0x488   :  { %v2436_v51 = vpop.f32.mrb[67].mxu1  ;;  %v2435_v1 = vadd.f32 %v6771_v42, %v2434_v23  ;;  %v2590_v20 = vmax.f32 %v2432_v41, 0.0 }
 0x489   :  { %3153 = vrot.lane.b32.xlu1 %v6942_v5, %s5096_s17  ;;  %3093 = vst.msk [vmem:[#allocation4 + $0x50] sm:$0xff] %vm2956_vm7, %v6942_v5  ;;  %2979 = vrot.lane.b32.xlu0 %v6844_v25, %s5091_s0  ;;  %3182 = vst.msk [vmem:[#allocation4 + $0x28] sm:$0xff] %vm2956_vm7, %v6945_v63 }
 0x48a   :  { %v2591_v13 = vmax.f32 %v2435_v1, 0.0  ;;  %v4727_v47 = vpack.c.bf16 %v2590_v20, %v2590_v20 }
 0x48d   :  { %v2439_v32 = vpop.f32.mrb[68].mxu1  ;;  %3105 = vrot.lane.b32.xlu1 %v6945_v63, %s5091_s0  ;;  %3011 = vrot.lane.b32.xlu0 %v6842_v34, %s5097_s18 }
 0x48e   :  { %v2441_v27 = vpop.f32.mrb[69].mxu1  ;;  %v2440_v40 = vadd.f32 %v6771_v42, %v2439_v32 }
 0x48f   :  { %v2442_v56 = vpop.f32.mrb[70].mxu1 }
 0x490   :  { %v2444_v38 = vpop.f32.mrb[71].mxu1  ;;  %v2443_v21 = vadd.f32 %v6771_v42, %v2442_v56  ;;  %v2592_v43 = vmax.f32 %v2440_v40, 0.0 }
 0x491   :  { %2981 = vrot.lane.b32.xlu0 %v4566_v3, %s5091_s0  ;;  %v4728_v3 = vpack.c.bf16 %v2591_v13, %v2591_v13 }
 0x492   :  { %v2593_v6 = vmax.f32 %v2443_v21, 0.0  ;;  %v4729_v49 = vpack.c.bf16 %v2592_v43, %v2592_v43 }
 0x494   :  { %v4730_v18 = vpack.c.bf16 %v2593_v6, %v2593_v6 }
 0x495   :  { %v2447_v59 = vpop.f32.mrb[72].mxu1  ;;  %3051 = vrot.lane.b32.xlu0 %v4561_v12, %s5096_s17 }
 0x496   :  { %v2449_v17 = vpop.f32.mrb[73].mxu1  ;;  %v2448_v28 = vadd.f32 %v6771_v42, %v2447_v59 }
 0x497   :  { %v2450_v25 = vpop.f32.mrb[74].mxu1 }
 0x498   :  { %v2452_v15 = vpop.f32.mrb[75].mxu1  ;;  %v2451_v24 = vadd.f32 %v6771_v42, %v2450_v25  ;;  %v2594_v32 = vmax.f32 %v2448_v28, 0.0 }
 0x49a   :  { %v2595_v15 = vmax.f32 %v2451_v24, 0.0  ;;  %v4731_v41 = vpack.c.bf16 %v2594_v32, %v2594_v32 }
 0x49d   :  { %v6961_v8 = vpop.f32.mrb[76].mxu1 }
 0x49e   :  { %v3046_v46 = vpop.permute.xlu0 %3045  ;;  %v2457_v10 = vpop.f32.mrb[77].mxu1  ;;  %v2456_v1 = vadd.f32 %v6771_v42, %v6961_v8 }
 0x49f   :  { %3070 = vst.msk [vmem:[#allocation4] sm:$0xff] %vm3069_vm2, %v3046_v46  ;;  %v6964_v55 = vpop.f32.mrb[78].mxu1 }
 0x4a0   :  { %v2460_v34 = vpop.f32.mrb[79].mxu1 }
 0x4a5   :  { %v2463_v19 = vpop.f32.mrb[80].mxu1 }
 0x4a6   :  { %v2464_v33 = vadd.f32 %v6771_v42, %v2463_v19  ;;  %v2978_v30 = vpop.permute.xlu0 %2977  ;;  %v2465_v60 = vpop.f32.mrb[81].mxu1 }
 0x4a7   :  { %2998 = vst.msk [vmem:[#allocation4 + $0x30] sm:$0xff] %vm2995_vm9, %v2978_v30  ;;  %v2466_v14 = vpop.f32.mrb[82].mxu1  ;;  %v2459_v30 = vadd.f32 %v6771_v42, %v6964_v55 }
 0x4a8   :  { %v2598_v45 = vmax.f32 %v2464_v33, 0.0  ;;  %v2467_v16 = vadd.f32 %v6771_v42, %v2466_v14  ;;  %v2468_v48 = vpop.f32.mrb[83].mxu1  ;;  %v4732_v33 = vpack.c.bf16 %v2595_v15, %v2595_v15 }
 0x4a9   :  { %v2597_v40 = vmax.f32 %v2459_v30, 0.0 }
 0x4aa   :  { %v4735_v7 = vpack.c.bf16 %v2598_v45, %v2598_v45  ;;  %v2599_v4 = vmax.f32 %v2467_v16, 0.0  ;;  %v2596_v45 = vmax.f32 %v2456_v1, 0.0 }
 0x4ab   :  { %v4734_v43 = vpack.c.bf16 %v2597_v40, %v2597_v40 }
 0x4ac   :  { %v2894_v0 = vmax.bf16 %v4735_v7, %v4727_v47  ;;  %v4736_v61 = vpack.c.bf16 %v2599_v4, %v2599_v4 }
 0x4ad   :  { %v2471_v53 = vpop.f32.mrb[84].mxu1 }
 0x4ae   :  { %v2895_v22 = vmax.bf16 %v4736_v61, %v4728_v3  ;;  %v2472_v35 = vadd.f32 %v6771_v42, %v2471_v53  ;;  %v2473_v50 = vpop.f32.mrb[85].mxu1  ;;  %v3100_v62 = vpop.permute.xlu0 %3099 }
 0x4af   :  { %3123 = vst.msk [vmem:[#allocation4 + $0x8] sm:$0xff] %vm2995_vm9, %v3100_v62  ;;  %v2474_v44 = vpop.f32.mrb[86].mxu1 }
 0x4b0   :  { %v2918_v54 = vmax.bf16 %v2895_v22, %v2894_v0  ;;  %v2600_v9 = vmax.f32 %v2472_v35, 0.0  ;;  %v2475_v37 = vadd.f32 %v6771_v42, %v2474_v44  ;;  %v2476_v11 = vpop.f32.mrb[87].mxu1  ;;  %v4733_v0 = vpack.c.bf16 %v2596_v45, %v2596_v45 }
 0x4b2   :  { %v4737_v12 = vpack.c.bf16 %v2600_v9, %v2600_v9  ;;  %v2601_v39 = vmax.f32 %v2475_v37, 0.0  ;;  %v3048_v57 = vpop.permute.xlu0 %3047  ;;  %v6977_v26 = vcombine.low %v7400_v2, %v2918_v54  ;;  %v7015_v37 = vld [vmem:[%s7380_s5 + $0x80] sm:$0xff]  }
 0x4b3   :  { %3071 = vst.msk [vmem:[#allocation4 + $0x18] sm:$0xff] %vm3069_vm2, %v3048_v57  ;;  %4924 = vmatprep.subr.bf16.mxu0 %v7015_v37 }
 0x4b4   :  { %v2896_v29 = vmax.bf16 %v4737_v12, %v4729_v49  ;;  %v4738_v31 = vpack.c.bf16 %v2601_v39, %v2601_v39  ;;  %3133 = vrot.lane.b32.xlu1 %v6977_v26, %s5097_s18  ;;  %2963 = vst.msk [vmem:[#allocation4 + $0x90] sm:$0xff] %vm2956_vm7, %v6977_v26 }
 0x4b6   :  { %v2897_v52 = vmax.bf16 %v4738_v31, %v4730_v18  ;;  %v3102_v51 = vpop.permute.xlu1 %3101  ;;  %v3010_v56 = vpop.permute.xlu0 %3009 }
 0x4b7   :  { %v2479_v23 = vpop.f32.mrb[88].mxu1  ;;  %3124 = vst.msk [vmem:[#allocation4 + $0x20] sm:$0xff] %vm2995_vm9, %v3102_v51 }
 0x4b8   :  { %v2480_v27 = vadd.f32 %v6771_v42, %v2479_v23  ;;  %v2481_v38 = vpop.f32.mrb[89].mxu1  ;;  %v2919_v59 = vmax.bf16 %v2897_v52, %v2896_v29  ;;  %3031 = vst.msk [vmem:[#allocation4 + $0x30] sm:$0xff] %vm3028_vm1, %v3010_v56 }
 0x4b9   :  { %v2482_v17 = vpop.f32.mrb[90].mxu1 }
 0x4ba   :  { %v2602_v46 = vmax.f32 %v2480_v27, 0.0  ;;  %v2483_v10 = vadd.f32 %v6771_v42, %v2482_v17  ;;  %v2484_v34 = vpop.f32.mrb[91].mxu1  ;;  %v6990_v25 = vcombine.low %v2918_v54, %v2919_v59 }
 0x4bc   :  { %v4739_v19 = vpack.c.bf16 %v2602_v46, %v2602_v46  ;;  %v2603_v20 = vmax.f32 %v2483_v10, 0.0  ;;  %3155 = vrot.lane.b32.xlu1 %v6990_v25, %s5096_s17  ;;  %3094 = vst.msk [vmem:[#allocation4 + $0x68] sm:$0xff] %vm2956_vm7, %v6990_v25 }
 0x4be   :  { %v2898_v60 = vmax.bf16 %v4739_v19, %v4731_v41  ;;  %v4740_v14 = vpack.c.bf16 %v2603_v20, %v2603_v20 }
 0x4bf   :  { %v2487_v13 = vpop.f32.mrb[92].mxu1 }
 0x4c0   :  { %v2899_v16 = vmax.bf16 %v4740_v14, %v4732_v33  ;;  %v2488_v48 = vadd.f32 %v6771_v42, %v2487_v13  ;;  %v2489_v8 = vpop.f32.mrb[93].mxu1 }
 0x4c1   :  { %v2490_v47 = vpop.f32.mrb[94].mxu1 }
 0x4c2   :  { %v2920_v7 = vmax.bf16 %v2899_v16, %v2898_v60  ;;  %v2604_v4 = vmax.f32 %v2488_v48, 0.0  ;;  %v2491_v3 = vadd.f32 %v6771_v42, %v2490_v47  ;;  %v2492_v21 = vpop.f32.mrb[95].mxu1 }
 0x4c4   :  { %v7002_v61 = vcombine.low %v2919_v59, %v2920_v7  ;;  %v4741_v53 = vpack.c.bf16 %v2604_v4, %v2604_v4  ;;  %v2605_v55 = vmax.f32 %v2491_v3, 0.0 }
 0x4c6   :  { %3183 = vst.msk [vmem:[#allocation4 + $0x40] sm:$0xff] %vm2956_vm7, %v7002_v61  ;;  %2964 = vst.msk [vmem:[#allocation4 + $0xa8] sm:$0xff] %vm2956_vm7, %v7002_v61  ;;  %v2900_v22 = vmax.bf16 %v4741_v53, %v4733_v0  ;;  %v4742_v35 = vpack.c.bf16 %v2605_v55, %v2605_v55  ;;  %3017 = vrot.lane.b32.xlu1 %v7002_v61, %s5097_s18 }
 0x4c7   :  { %v2495_v50 = vpop.f32.mrb[96].mxu1 }
 0x4c8   :  { %v2901_v62 = vmax.bf16 %v4742_v35, %v4734_v43  ;;  %v2497_v44 = vpop.f32.mrb[97].mxu1  ;;  %v2496_v56 = vadd.f32 %v6771_v42, %v2495_v50 }
 0x4c9   :  { %v2498_v6 = vpop.f32.mrb[98].mxu1 }
 0x4ca   :  { %v2921_v54 = vmax.bf16 %v2901_v62, %v2900_v22  ;;  %v2500_v9 = vpop.f32.mrb[99].mxu1  ;;  %3107 = vrot.lane.b32.xlu1 %v7002_v61, %s5091_s0  ;;  %v2499_v38 = vadd.f32 %v6771_v42, %v2498_v6  ;;  %v2606_v17 = vmax.f32 %v2496_v56, 0.0 }
 0x4cb   :  { %v3189_v9 = vld [vmem:[#allocation4] sm:$0xff] }
 0x4cc   :  { %v7017_v11 = vcombine.low %v2920_v7, %v2921_v54  ;;  %v7020_v49 = vcombine.low %v2921_v54, %v7400_v2  ;;  %v2607_v10 = vmax.f32 %v2499_v38, 0.0  ;;  %v4743_v19 = vpack.c.bf16 %v2606_v17, %v2606_v17  ;;  %v5087_v17 = vld [vmem:[%s7379_s4] ss:$0 sm:$0xff] }
 0x4ce   :  { %3157 = vrot.lane.b32.xlu1 %v7017_v11, %s5096_s17  ;;  %3095 = vst.msk [vmem:[#allocation4 + $0x80] sm:$0xff] %vm2956_vm7, %v7017_v11  ;;  %3184 = vst.msk [vmem:[#allocation4 + $0x58] sm:$0xff] %vm2956_vm7, %v7020_v49  ;;  %3109 = vrot.lane.b32.xlu0 %v7020_v49, %s5091_s0  ;;  %v4744_v14 = vpack.c.bf16 %v2607_v10, %v2607_v10 }
 0x4cf   :  { %v2503_v12 = vpop.f32.mrb[100].mxu1 }
 0x4d0   :  { %v2505_v39 = vpop.f32.mrb[101].mxu1  ;;  %v2504_v30 = vadd.f32 %v6771_v42, %v2503_v12 }
 0x4d1   :  { %v2506_v57 = vpop.f32.mrb[102].mxu1 }
 0x4d2   :  { %v2508_v28 = vpop.f32.mrb[103].mxu1  ;;  %3053 = vrot.lane.b32.xlu1 %v6977_v26, %s5096_s17  ;;  %v2507_v16 = vadd.f32 %v6771_v42, %v2506_v57  ;;  %v2608_v47 = vmax.f32 %v2504_v30, 0.0 }
 0x4d4   :  { %v2609_v21 = vmax.f32 %v2507_v16, 0.0  ;;  %v4745_v35 = vpack.c.bf16 %v2608_v47, %v2608_v47 }
 0x4d6   :  { %v4746_v12 = vpack.c.bf16 %v2609_v21, %v2609_v21 }
 0x4d7   :  { %v2511_v18 = vpop.f32.mrb[104].mxu1 }
 0x4d8   :  { %v2513_v29 = vpop.f32.mrb[105].mxu1  ;;  %v2512_v43 = vadd.f32 %v6771_v42, %v2511_v18 }
 0x4d9   :  { %v2514_v31 = vpop.f32.mrb[106].mxu1 }
 0x4da   :  { %v2516_v24 = vpop.f32.mrb[107].mxu1  ;;  %v2515_v39 = vadd.f32 %v6771_v42, %v2514_v31  ;;  %v2610_v18 = vmax.f32 %v2512_v43, 0.0 }
 0x4dc   :  { %v2611_v38 = vmax.f32 %v2515_v39, 0.0 }
 0x4df   :  { %v7033_v52 = vpop.f32.mrb[108].mxu1 }
 0x4e0   :  { %v2521_v23 = vpop.f32.mrb[109].mxu1 }
 0x4e1   :  { %v7035_v51 = vpop.f32.mrb[110].mxu1 }
 0x4e2   :  { %v2524_v32 = vpop.f32.mrb[111].mxu1  ;;  %v3132_v27 = vpop.permute.xlu1 %3131 }
 0x4e3   :  { %3143 = vst.msk [vmem:[#allocation4 + $0x8] sm:$0xff] %vm3028_vm1, %v3132_v27 }
 0x4e7   :  { %v2527_v59 = vpop.f32.mrb[112].mxu1 }
 0x4e8   :  { %v2528_v26 = vadd.f32 %v6771_v42, %v2527_v59  ;;  %v2529_v15 = vpop.f32.mrb[113].mxu1 }
 0x4e9   :  { %v2530_v46 = vpop.f32.mrb[114].mxu1  ;;  %v4747_v15 = vpack.c.bf16 %v2610_v18, %v2610_v18 }
 0x4ea   :  { %v2614_v34 = vmax.f32 %v2528_v26, 0.0  ;;  %v2531_v41 = vadd.f32 %v6771_v42, %v2530_v46  ;;  %v2532_v1 = vpop.f32.mrb[115].mxu1 }
 0x4eb   :  { %v3152_v60 = vpop.permute.xlu1 %3151 }
 0x4ec   :  { %v4751_v20 = vpack.c.bf16 %v2614_v34, %v2614_v34  ;;  %v2615_v33 = vmax.f32 %v2531_v41, 0.0  ;;  %3169 = vst.msk [vmem:[#allocation4 + $0x8] sm:$0xff] %vm3069_vm2, %v3152_v60 }
 0x4ee   :  { %v2902_v13 = vmax.bf16 %v4751_v20, %v4743_v19  ;;  %v4752_v45 = vpack.c.bf16 %v2615_v33, %v2615_v33 }
 0x4ef   :  { %v2535_v8 = vpop.f32.mrb[116].mxu1 }
 0x4f0   :  { %v2903_v48 = vmax.bf16 %v4752_v45, %v4744_v14  ;;  %v2536_v40 = vadd.f32 %v6771_v42, %v2535_v8  ;;  %v2537_v7 = vpop.f32.mrb[117].mxu1 }
 0x4f1   :  { %v2538_v3 = vpop.f32.mrb[118].mxu1 }
 0x4f2   :  { %v2922_v4 = vmax.bf16 %v2903_v48, %v2902_v13  ;;  %v2616_v0 = vmax.f32 %v2536_v40, 0.0  ;;  %v2539_v53 = vadd.f32 %v6771_v42, %v2538_v3  ;;  %v2540_v55 = vpop.f32.mrb[119].mxu1 }
 0x4f3   :  { %v3104_v44 = vpop.permute.xlu1 %3103  ;;  %v7051_v6 = vpop.permute.xlu0 %3013  ;;  %v3190_v54 = vld [vmem:[#allocation4 + $0x8] sm:$0xff] }
 0x4f4   :  { %v7049_v22 = vcombine.low %v7400_v2, %v2922_v4  ;;  %v4753_v50 = vpack.c.bf16 %v2616_v0, %v2616_v0  ;;  %v2617_v62 = vmax.f32 %v2539_v53, 0.0  ;;  %3125 = vst.msk [vmem:[#allocation4 + $0x38] sm:$0xff] %vm2995_vm9, %v3104_v44  ;;  %3420 = vmatprep.mubr.bf16.mxu0 %v3190_v54  ;;  %v5042_v53 = vld [vmem:[%s7380_s5 + $0x88] sm:$0xff]  }
 0x4f5   :  { %3144 = vst.msk [vmem:[#allocation4 + $0x20] sm:$0xff] %vm3028_vm1, %v7051_v6  ;;  %3421 = vmatmul.mubr.bf16.vlgmr.msra.gmra.mrb[32].mxu0 %v3189_v9 }
 0x4f6   :  { %3135 = vrot.lane.b32.xlu1 %v7049_v22, %s5097_s18  ;;  %v2904_v57 = vmax.bf16 %v4753_v50, %v4745_v35  ;;  %v4754_v28 = vpack.c.bf16 %v2617_v62, %v2617_v62  ;;  %4925 = vmatpush3.bf16.msra.mxu0 %v7015_v37 }
 0x4f7   :  { %v2543_v29 = vpop.f32.mrb[120].mxu1  ;;  %v3050_v32 = vpop.permute.xlu0 %3049  ;;  %4926 = vmatprep.subr.bf16.mxu0 %v5042_v53 }
 0x4f8   :  { %v2905_v24 = vmax.bf16 %v4754_v28, %v4746_v12  ;;  %v2544_v23 = vadd.f32 %v6771_v42, %v2543_v29  ;;  %v2545_v27 = vpop.f32.mrb[121].mxu1  ;;  %3072 = vst.msk [vmem:[#allocation4 + $0x30] sm:$0xff] %vm3069_vm2, %v3050_v32  ;;  %v2520_v42 = vadd.f32 %v5087_v17, %v7033_v52  ;;  %v2523_v52 = vadd.f32 %v5087_v17, %v7035_v51 }
 0x4f9   :  { %v2546_v56 = vpop.f32.mrb[122].mxu1 }
 0x4fa   :  { %2983 = vrot.lane.b32.xlu1 %v6942_v5, %s5091_s0  ;;  %v2923_v31 = vmax.bf16 %v2905_v24, %v2904_v57  ;;  %v2618_v59 = vmax.f32 %v2544_v23, 0.0  ;;  %v2547_v26 = vadd.f32 %v5087_v17, %v2546_v56  ;;  %v2548_v37 = vpop.f32.mrb[123].mxu1  ;;  %v4748_v5 = vpack.c.bf16 %v2611_v38, %v2611_v38  ;;  %4927 = vmatpush3.bf16.msra.mxu0 %v5042_v53 }
 0x4fb   :  { %v3154_v34 = vpop.permute.xlu1 %3153  ;;  %v2980_v41 = vpop.permute.xlu0 %2979  ;;  %v2612_v30 = vmax.f32 %v2520_v42, 0.0  ;;  %v2613_v47 = vmax.f32 %v2523_v52, 0.0  ;;  %v3191_v52 = vld [vmem:[#allocation4 + $0x10] sm:$0xff] }
 0x4fc   :  { %v4755_v46 = vpack.c.bf16 %v2618_v59, %v2618_v59  ;;  %v2619_v10 = vmax.f32 %v2547_v26, 0.0  ;;  %v4575_v1 = vcombine.low %v2922_v4, %v2923_v31  ;;  %3170 = vst.msk [vmem:[#allocation4 + $0x20] sm:$0xff] %vm3069_vm2, %v3154_v34 }
 0x4fd   :  { %2999 = vst.msk [vmem:[#allocation4 + $0x48] sm:$0xff] %vm2995_vm9, %v2980_v41  ;;  %v4749_v7 = vpack.c.bf16 %v2612_v30, %v2612_v30  ;;  %v4750_v35 = vpack.c.bf16 %v2613_v47, %v2613_v47  ;;  %v3197_v30 = vld [vmem:[#allocation4 + $0x40] sm:$0xff] }
 0x4fe   :  { %3015 = vrot.lane.b32.xlu1 %v6945_v63, %s5097_s18  ;;  %v2906_v19 = vmax.bf16 %v4755_v46, %v4747_v15  ;;  %v4756_v20 = vpack.c.bf16 %v2619_v10, %v2619_v10  ;;  %3159 = vrot.lane.b32.xlu0 %v4575_v1, %s5096_s17  ;;  %3096 = vst.msk [vmem:[#allocation4 + $0x98] sm:$0xff] %vm2956_vm7, %v4575_v1 }
 0x4ff   :  { %v2551_v33 = vpop.f32.mrb[124].mxu1  ;;  %v3106_v13 = vpop.permute.xlu1 %3105 }
 0x500   :  { %v2907_v60 = vmax.bf16 %v4756_v20, %v4748_v5  ;;  %v2552_v14 = vadd.f32 %v5087_v17, %v2551_v33  ;;  %v3012_v45 = vpop.permute.xlu0 %3011  ;;  %3126 = vst.msk [vmem:[#allocation4 + $0x50] sm:$0xff] %vm2995_vm9, %v3106_v13  ;;  %v2553_v63 = vpop.f32.mrb[125].mxu1  ;;  %v3194_v33 = vld [vmem:[#allocation4 + $0x28] sm:$0xff]  ;;  %v3209_v13 = vld [vmem:[#allocation4 + $0xa0] sm:$0xff] }
 0x501   :  { %3032 = vst.msk [vmem:[#allocation4 + $0x48] sm:$0xff] %vm3028_vm1, %v3012_v45  ;;  %v2554_v8 = vpop.f32.mrb[126].mxu1  ;;  %v3212_v63 = vld [vmem:[#allocation4 + $0xb8] sm:$0xff] }
 0x502   :  { %3055 = vrot.lane.b32.xlu1 %v7002_v61, %s5096_s17  ;;  %v2924_v16 = vmax.bf16 %v2907_v60, %v2906_v19  ;;  %v2620_v48 = vmax.f32 %v2552_v14, 0.0  ;;  %v2555_v40 = vadd.f32 %v5087_v17, %v2554_v8  ;;  %v2556_v51 = vpop.f32.mrb[127].mxu1  ;;  %v3192_v61 = vld [vmem:[#allocation4 + $0x18] sm:$0xff] }
 0x503   :  { %v3193_v21 = vld [vmem:[#allocation4 + $0x20] sm:$0xff]  ;;  %v3200_v60 = vld [vmem:[#allocation4 + $0x58] sm:$0xff] }
 0x504   :  { %v4757_v4 = vpack.c.bf16 %v2620_v48, %v2620_v48  ;;  %v2982_v3 = vpop.permute.xlu0 %2981  ;;  %v4574_v0 = vcombine.low %v2923_v31, %v2924_v16  ;;  %v2621_v55 = vmax.f32 %v2555_v40, 0.0  ;;  %3428 = vmatprep.mubr.bf16.mxu0 %v3193_v21 }
 0x505   :  { %3000 = vst.msk [vmem:[#allocation4 + $0x60] sm:$0xff] %vm2995_vm9, %v2982_v3  ;;  %3429 = vmatmul.mubr.bf16.gmra.mrb[36].mxu0 %v3192_v61 }
 0x506   :  { %2985 = vrot.lane.b32.xlu1 %v6990_v25, %s5091_s0  ;;  %v2908_v43 = vmax.bf16 %v4757_v4, %v4749_v7  ;;  %3033 = vst.msk [vmem:[#allocation4 + $0x60] sm:$0xff] %vm3028_vm1, %v7051_v6  ;;  %3137 = vrot.lane.b32.xlu0 %v4574_v0, %s5097_s18  ;;  %v4758_v50 = vpack.c.bf16 %v2621_v55, %v2621_v55 }
 0x507   :  { %3185 = vst.msk [vmem:[#allocation4 + $0x70] sm:$0xff] %vm2956_vm7, %v4574_v0 }
 0x508   :  { %v3052_v62 = vpop.permute.xlu0 %3051  ;;  %v2909_v44 = vmax.bf16 %v4758_v50, %v4750_v35 }
 0x509   :  { %3073 = vst.msk [vmem:[#allocation4 + $0x48] sm:$0xff] %vm3069_vm2, %v3052_v62 }
 0x50a   :  { %v2925_v54 = vmax.bf16 %v2909_v44, %v2908_v43 }
 0x50c   :  { %v4577_v25 = vcombine.low %v2925_v54, %v7400_v2  ;;  %v4576_v9 = vcombine.low %v2924_v16, %v2925_v54 }
 0x50e   :  { %3186 = vst.msk [vmem:[#allocation4 + $0x88] sm:$0xff] %vm2956_vm7, %v4577_v25  ;;  %3113 = vrot.lane.b32.xlu1 %v4577_v25, %s5091_s0  ;;  %3161 = vrot.lane.b32.xlu0 %v4576_v9, %s5096_s17  ;;  %3097 = vst.msk [vmem:[#allocation4 + $0xb0] sm:$0xff] %vm2956_vm7, %v4576_v9  ;;  %v3203_v14 = vld [vmem:[#allocation4 + $0x70] sm:$0xff] }
 0x510   :  { %v3198_v24 = vld [vmem:[#allocation4 + $0x48] sm:$0xff] }
 0x512   :  { %3019 = vrot.lane.b32.xlu1 %v7020_v49, %s5097_s18  ;;  %3111 = vrot.lane.b32.xlu0 %v4574_v0, %s5091_s0  ;;  %v3195_v49 = vld [vmem:[#allocation4 + $0x30] sm:$0xff] }
 0x515   :  { %v3206_v45 = vld [vmem:[#allocation4 + $0x88] sm:$0xff] }
 0x516   :  { %3057 = vrot.lane.b32.xlu0 %v7049_v22, %s5096_s17 }
 0x51a   :  { %2987 = vrot.lane.b32.xlu0 %v7017_v11, %s5091_s0 }
 0x51e   :  { %3059 = vrot.lane.b32.xlu0 %v4574_v0, %s5096_s17 }
 0x526   :  { %v3134_v6 = vpop.permute.xlu1 %3133 }
 0x527   :  { %3145 = vst.msk [vmem:[#allocation4 + $0x38] sm:$0xff] %vm3028_vm1, %v3134_v6 }
 0x52e   :  { %v3156_v12 = vpop.permute.xlu1 %3155 }
 0x52f   :  { %3171 = vst.msk [vmem:[#allocation4 + $0x38] sm:$0xff] %vm3069_vm2, %v3156_v12 }
 0x536   :  { %v3196_v39 = vld [vmem:[#allocation4 + $0x38] sm:$0xff] }
 0x537   :  { %3436 = vmatprep.mubr.bf16.mxu0 %v3196_v39  ;;  %v5043_v39 = vld [vmem:[%s7381_s7 + $0x40] sm:$0xff]  }
 0x538   :  { %v3018_v57 = vpop.permute.xlu1 %3017  ;;  %3437 = vmatmul.mubr.bf16.gmra.mrb[40].mxu0 %v3195_v49  ;;  %4853 = vmatprep.subr.bf16.mxu0 %v5043_v39  ;;  %v5045_v49 = vld [vmem:[%s7381_s7 + $0x48] sm:$0xff]  }
 0x539   :  { %3146 = vst.msk [vmem:[#allocation4 + $0x50] sm:$0xff] %vm3028_vm1, %v3018_v57 }
 0x53c   :  { %v3108_v28 = vpop.permute.xlu1 %3107 }
 0x53d   :  { %3127 = vst.msk [vmem:[#allocation4 + $0x68] sm:$0xff] %vm2995_vm9, %v3108_v28  ;;  %v5046_v28 = vld [vmem:[%s7381_s7 + $0x8] sm:$0xff]  }
 0x540   :  { %v3158_v22 = vpop.permute.xlu1 %3157  ;;  %v3110_v11 = vpop.permute.xlu0 %3109 }
 0x541   :  { %3172 = vst.msk [vmem:[#allocation4 + $0x50] sm:$0xff] %vm3069_vm2, %v3158_v22  ;;  %v5047_v22 = vld [vmem:[%s7381_s7 + $0x50] sm:$0xff]  }
 0x542   :  { %3128 = vst.msk [vmem:[#allocation4 + $0x80] sm:$0xff] %vm2995_vm9, %v3110_v11  ;;  %v5048_v11 = vld [vmem:[%s7381_s7 + $0x10] sm:$0xff]  }
 0x544   :  { %v3054_v18 = vpop.permute.xlu1 %3053 }
 0x545   :  { %3074 = vst.msk [vmem:[#allocation4 + $0x60] sm:$0xff] %vm3069_vm2, %v3054_v18  ;;  %v5049_v18 = vld [vmem:[%s7381_s7 + $0x58] sm:$0xff]  }
 0x548   :  { %v3199_v29 = vld [vmem:[#allocation4 + $0x50] sm:$0xff] }
 0x549   :  { %3444 = vmatprep.mubr.bf16.mxu0 %v3199_v29  ;;  %v5050_v29 = vld [vmem:[%s7381_s7 + $0x18] sm:$0xff]  }
 0x54a   :  { %3445 = vmatmul.mubr.bf16.gmra.mrb[44].mxu0 %v3198_v24  ;;  %v5051_v24 = vld [vmem:[%s7381_s7 + $0x60] sm:$0xff]  }
 0x54c   :  { %v3201_v26 = vld [vmem:[#allocation4 + $0x60] sm:$0xff] }
 0x568   :  { %v3136_v23 = vpop.permute.xlu1 %3135 }
 0x569   :  { %3147 = vst.msk [vmem:[#allocation4 + $0x68] sm:$0xff] %vm3028_vm1, %v3136_v23  ;;  %v5052_v23 = vld [vmem:[%s7381_s7 + $0x20] sm:$0xff]  }
 0x56c   :  { %v2984_v32 = vpop.permute.xlu1 %2983 }
 0x56d   :  { %3001 = vst.msk [vmem:[#allocation4 + $0x78] sm:$0xff] %vm2995_vm9, %v2984_v32  ;;  %v5053_v32 = vld [vmem:[%s7381_s7 + $0x68] sm:$0xff]  }
 0x570   :  { %v3016_v27 = vpop.permute.xlu1 %3015  ;;  %v3160_v56 = vpop.permute.xlu0 %3159 }
 0x571   :  { %3034 = vst.msk [vmem:[#allocation4 + $0x78] sm:$0xff] %vm3028_vm1, %v3016_v27  ;;  %v5054_v27 = vld [vmem:[%s7381_s7 + $0x28] sm:$0xff]  }
 0x572   :  { %3173 = vst.msk [vmem:[#allocation4 + $0x68] sm:$0xff] %vm3069_vm2, %v3160_v56 }
 0x574   :  { %v3056_v38 = vpop.permute.xlu1 %3055 }
 0x575   :  { %3075 = vst.msk [vmem:[#allocation4 + $0x78] sm:$0xff] %vm3069_vm2, %v3056_v38 }
 0x578   :  { %v2986_v31 = vpop.permute.xlu1 %2985  ;;  %v3138_v59 = vpop.permute.xlu0 %3137 }
 0x579   :  { %3002 = vst.msk [vmem:[#allocation4 + $0x90] sm:$0xff] %vm2995_vm9, %v2986_v31  ;;  %v3202_v17 = vld [vmem:[#allocation4 + $0x68] sm:$0xff] }
 0x57a   :  { %3035 = vst.msk [vmem:[#allocation4 + $0x90] sm:$0xff] %vm3028_vm1, %v3018_v57  ;;  %3148 = vst.msk [vmem:[#allocation4 + $0x80] sm:$0xff] %vm3028_vm1, %v3138_v59  ;;  %3452 = vmatprep.mubr.bf16.mxu0 %v3202_v17  ;;  %v5044_v57 = vld [vmem:[%s7381_s7] sm:$0xff]  }
 0x57b   :  { %3453 = vmatmul.mubr.bf16.gmra.mrb[48].mxu0 %v3201_v26 }
 0x57c   :  { %v3204_v34 = vld [vmem:[#allocation4 + $0x78] sm:$0xff] }
 0x580   :  { %v3114_v37 = vpop.permute.xlu1 %3113  ;;  %v3162_v15 = vpop.permute.xlu0 %3161 }
 0x581   :  { %3130 = vst.msk [vmem:[#allocation4 + $0xb0] sm:$0xff] %vm2995_vm9, %v3114_v37 }
 0x582   :  { %3174 = vst.msk [vmem:[#allocation4 + $0x80] sm:$0xff] %vm3069_vm2, %v3162_v15 }
 0x583   :  { %3150 = vst.msk [vmem:[#allocation4 + $0xb0] sm:$0xff] %vm3028_vm1, %v6786_v58 }
 0x584   :  { %3176 = vst.msk [vmem:[#allocation4 + $0xb0] sm:$0xff] %vm3069_vm2, %v6734_v36  ;;  %v3112_v42 = vpop.permute.xlu0 %3111  ;;  %v3020_v1 = vpop.permute.xlu1 %3019 }
 0x585   :  { %3129 = vst.msk [vmem:[#allocation4 + $0x98] sm:$0xff] %vm2995_vm9, %v3112_v42 }
 0x586   :  { %3149 = vst.msk [vmem:[#allocation4 + $0x98] sm:$0xff] %vm3028_vm1, %v6786_v58 }
 0x587   :  { %3175 = vst.msk [vmem:[#allocation4 + $0x98] sm:$0xff] %vm3069_vm2, %v6734_v36 }
 0x588   :  { %v3058_v46 = vpop.permute.xlu0 %3057 }
 0x589   :  { %v3205_v10 = vld [vmem:[#allocation4 + $0x80] sm:$0xff]  ;;  %3076 = vst.msk [vmem:[#allocation4 + $0x90] sm:$0xff] %vm3069_vm2, %v3058_v46 }
 0x58a   :  { %3460 = vmatprep.mubr.bf16.mxu0 %v3205_v10 }
 0x58b   :  { %3461 = vmatmul.mubr.bf16.gmra.mrb[52].mxu0 %v3204_v34  ;;  %v3211_v36 = vld [vmem:[#allocation4 + $0xb0] sm:$0xff] }
 0x58c   :  { %v2988_v41 = vpop.permute.xlu0 %2987 }
 0x58d   :  { %3003 = vst.msk [vmem:[#allocation4 + $0xa8] sm:$0xff] %vm2995_vm9, %v2988_v41 }
 0x58e   :  { %3036 = vst.msk [vmem:[#allocation4 + $0xa8] sm:$0xff] %vm3028_vm1, %v3020_v1  ;;  %v3208_v5 = vld [vmem:[#allocation4 + $0x98] sm:$0xff] }
 0x58f   :  { %3468 = vmatprep.mubr.bf16.mxu0 %v3208_v5 }
 0x590   :  { %v3060_v19 = vpop.permute.xlu0 %3059  ;;  %v3207_v58 = vld [vmem:[#allocation4 + $0x90] sm:$0xff] }
 0x591   :  { %3077 = vst.msk [vmem:[#allocation4 + $0xa8] sm:$0xff] %vm3069_vm2, %v3060_v19 }
 0x593   :  { %3469 = vmatmul.mubr.bf16.gmra.mrb[56].mxu0 %v3207_v58 }
 0x594   :  { %3476 = vmatprep.mubr.bf16.mxu0 %v3211_v36 }
 0x598   :  { %v3210_v20 = vld [vmem:[#allocation4 + $0xa8] sm:$0xff] }
 0x59b   :  { %3477 = vmatmul.mubr.bf16.gmra.mrb[60].mxu0 %v3210_v20 }
 0x59c   :  { %4928 = vmatprep.mubr.msk.bf16.mxu0 %vm2956_vm7, %v3191_v52 }
 0x5a3   :  { %4929 = vmatmul.mubr.msk.bf16.vlgmr.msra.gmra.mrb[64].mxu0 %vm2956_vm7, %v3194_v33 }
 0x5a4   :  { %4932 = vmatprep.mubr.msk.bf16.mxu0 %vm2956_vm7, %v3197_v30  ;;  %4854 = vmatpush3.bf16.msra.mxu0 %v5044_v57 }
 0x5a5   :  { %4855 = vmatprep.subr.bf16.mxu0 %v5045_v49 }
 0x5a8   :  { %4856 = vmatpush3.bf16.msra.mxu0 %v5046_v28 }
 0x5a9   :  { %4857 = vmatprep.subr.bf16.mxu0 %v5047_v22 }
 0x5ab   :  { %4933 = vmatmul.mubr.msk.bf16.gmra.mrb[68].mxu0 %vm2956_vm7, %v3200_v60 }
 0x5ac   :  { %4936 = vmatprep.mubr.msk.bf16.mxu0 %vm2956_vm7, %v3203_v14  ;;  %4858 = vmatpush3.bf16.msra.mxu0 %v5048_v11 }
 0x5ad   :  { %4859 = vmatprep.subr.bf16.mxu0 %v5049_v18 }
 0x5b0   :  { %4860 = vmatpush3.bf16.msra.mxu0 %v5050_v29 }
 0x5b1   :  { %4861 = vmatprep.subr.bf16.mxu0 %v5051_v24 }
 0x5b3   :  { %4937 = vmatmul.mubr.msk.bf16.gmra.mrb[72].mxu0 %vm2956_vm7, %v3206_v45 }
 0x5b4   :  { %4940 = vmatprep.mubr.msk.bf16.mxu0 %vm2956_vm7, %v3209_v13  ;;  %4862 = vmatpush3.bf16.msra.mxu0 %v5052_v23  ;;  %v7212_v13 = vld [vmem:[%s7382_s6] ss:$0 sm:$0xff] }
 0x5b5   :  { %4863 = vmatprep.subr.bf16.mxu0 %v5053_v32 }
 0x5b8   :  { %4864 = vmatpush3.bf16.msra.mxu0 %v5054_v27 }
 0x5bb   :  { %4941 = vmatmul.mubr.msk.bf16.gmra.mrb[76].mxu0 %vm2956_vm7, %v3212_v63 }
 0x5c8   :  { %v4795_v16 = vpop.f32.mrb[32].mxu0 }
 0x5c9   :  { %v4796_v48 = vpop.f32.mrb[33].mxu0 }
 0x5ca   :  { %v7141_v8 = vadd.f32 %v4796_v48, %v4795_v16  ;;  %v4798_v47 = vpop.f32.mrb[34].mxu0 }
 0x5cb   :  { %v4799_v40 = vpop.f32.mrb[35].mxu0 }
 0x5cc   :  { %v7143_v51 = vadd.f32 %v4799_v40, %v4798_v47  ;;  %v3423_v16 = vadd.f32 %v7141_v8, %v7212_v13 }
 0x5d8   :  { %v4801_v7 = vpop.f32.mrb[36].mxu0 }
 0x5d9   :  { %v4802_v4 = vpop.f32.mrb[37].mxu0 }
 0x5da   :  { %v7145_v3 = vadd.f32 %v4802_v4, %v4801_v7  ;;  %v4804_v21 = vpop.f32.mrb[38].mxu0 }
 0x5db   :  { %v4805_v0 = vpop.f32.mrb[39].mxu0 }
 0x5dc   :  { %v7147_v53 = vadd.f32 %v4805_v0, %v4804_v21  ;;  %v3431_v45 = vadd.f32 %v7145_v3, %v7212_v13  ;;  %v3426_v21 = vadd.f32 %v7143_v51, %v7212_v13  ;;  %v5055_v51 = vld [vmem:[%s7381_s7 + $0x70] sm:$0xff]  }
 0x5dd   :  { %4865 = vmatprep.subr.bf16.mxu0 %v5055_v51 }
 0x5de   :  { %v3434_v40 = vadd.f32 %v7147_v53, %v7212_v13 }
 0x60b   :  { %v4807_v55 = vpop.f32.mrb[40].mxu0 }
 0x60c   :  { %v4808_v61 = vpop.f32.mrb[41].mxu0 }
 0x60d   :  { %v7149_v43 = vadd.f32 %v4808_v61, %v4807_v55  ;;  %v4810_v35 = vpop.f32.mrb[42].mxu0 }
 0x60e   :  { %v4811_v50 = vpop.f32.mrb[43].mxu0 }
 0x60f   :  { %v7151_v62 = vadd.f32 %v4811_v50, %v4810_v35  ;;  %v3439_v8 = vadd.f32 %v7149_v43, %v7212_v13  ;;  %v5056_v43 = vld [vmem:[%s7381_s7 + $0x30] sm:$0xff]  }
 0x610   :  { %4866 = vmatpush3.bf16.msra.mxu0 %v5056_v43 }
 0x61d   :  { %v4813_v44 = vpop.f32.mrb[44].mxu0 }
 0x61e   :  { %v4814_v54 = vpop.f32.mrb[45].mxu0 }
 0x61f   :  { %v7153_v25 = vadd.f32 %v4814_v54, %v4813_v44  ;;  %v4816_v9 = vpop.f32.mrb[46].mxu0 }
 0x620   :  { %v4817_v6 = vpop.f32.mrb[47].mxu0 }
 0x621   :  { %v7155_v12 = vadd.f32 %v4817_v6, %v4816_v9  ;;  %v3447_v3 = vadd.f32 %v7153_v25, %v7212_v13  ;;  %v3442_v25 = vadd.f32 %v7151_v62, %v7212_v13  ;;  %v5057_v62 = vld [vmem:[%s7381_s7 + $0x78] sm:$0xff]  }
 0x622   :  { %4867 = vmatprep.subr.bf16.mxu0 %v5057_v62 }
 0x623   :  { %v3450_v53 = vadd.f32 %v7155_v12, %v7212_v13 }
 0x64e   :  { %v4819_v56 = vpop.f32.mrb[48].mxu0 }
 0x64f   :  { %v4820_v38 = vpop.f32.mrb[49].mxu0 }
 0x650   :  { %v7193_v31 = vadd.f32 %v4820_v38, %v4819_v56  ;;  %v4822_v59 = vpop.f32.mrb[50].mxu0  ;;  %v5058_v38 = vld [vmem:[%s7381_s7 + $0x38] sm:$0xff]  }
 0x651   :  { %v4823_v17 = vpop.f32.mrb[51].mxu0  ;;  %4868 = vmatpush3.bf16.msra.mxu0 %v5058_v38 }
 0x652   :  { %v7195_v26 = vadd.f32 %v4823_v17, %v4822_v59 }
 0x65e   :  { %v4825_v37 = vpop.f32.mrb[52].mxu0 }
 0x65f   :  { %v4826_v15 = vpop.f32.mrb[53].mxu0 }
 0x660   :  { %v7197_v42 = vadd.f32 %v4826_v15, %v4825_v37  ;;  %v4828_v46 = vpop.f32.mrb[54].mxu0 }
 0x661   :  { %v4829_v10 = vpop.f32.mrb[55].mxu0 }
 0x662   :  { %v7199_v34 = vadd.f32 %v4829_v10, %v4828_v46  ;;  %v3463_v15 = vadd.f32 %v7197_v42, %v7212_v13 }
 0x666   :  { %v4831_v41 = vpop.f32.mrb[56].mxu0 }
 0x667   :  { %v4832_v1 = vpop.f32.mrb[57].mxu0 }
 0x668   :  { %v7201_v5 = vadd.f32 %v4832_v1, %v4831_v41  ;;  %v4834_v19 = vpop.f32.mrb[58].mxu0 }
 0x669   :  { %v4835_v58 = vpop.f32.mrb[59].mxu0 }
 0x66a   :  { %v7203_v36 = vadd.f32 %v4835_v58, %v4834_v19  ;;  %v3455_v19 = vadd.f32 %v7193_v31, %v7212_v13 }
 0x66e   :  { %v4837_v20 = vpop.f32.mrb[60].mxu0 }
 0x66f   :  { %v4838_v52 = vpop.f32.mrb[61].mxu0 }
 0x670   :  { %v7205_v33 = vadd.f32 %v4838_v52, %v4837_v20  ;;  %v4840_v30 = vpop.f32.mrb[62].mxu0 }
 0x671   :  { %v4841_v60 = vpop.f32.mrb[63].mxu0 }
 0x672   :  { %v7207_v14 = vadd.f32 %v4841_v60, %v4840_v30  ;;  %v3466_v30 = vadd.f32 %v7199_v34, %v7212_v13  ;;  %v5059_v60 = vld [vmem:[%s7381_s7 + $0xc0] sm:$0xff]  }
 0x673   :  { %4881 = vmatprep.subr.bf16.mxu0 %v5059_v60  ;;  %v5067_v60 = vld [vmem:[%s7381_s7 + $0xe0] sm:$0xff]  }
 0x676   :  { %v4930_v63 = vpop.f32.mrb[64].mxu0 }
 0x677   :  { %v3528_v48 = vadd.f32 %v4930_v63, %v3431_v45  ;;  %v3519_v47 = vpop.f32.mrb[65].mxu0 }
 0x678   :  { %v3520_v7 = vadd.f32 %v3519_v47, %v3423_v16  ;;  %v4931_v4 = vpop.f32.mrb[66].mxu0  ;;  %v3458_v16 = vadd.f32 %v7195_v26, %v7212_v13  ;;  %v3471_v26 = vadd.f32 %v7201_v5, %v7212_v13 }
 0x679   :  { %v3531_v0 = vadd.f32 %v4931_v4, %v3434_v40  ;;  %v3522_v55 = vpop.f32.mrb[67].mxu0  ;;  %v3584_v50 = vmax.f32 %v3528_v48, 0.0 }
 0x67a   :  { %v3523_v61 = vadd.f32 %v3522_v55, %v3426_v21  ;;  %v3582_v9 = vmax.f32 %v3520_v7, 0.0 }
 0x67b   :  { %v3585_v57 = vmax.f32 %v3531_v0, 0.0  ;;  %v4761_v29 = vpack.c.bf16 %v3584_v50, %v3584_v50  ;;  %v3479_v0 = vadd.f32 %v7205_v33, %v7212_v13 }
 0x67c   :  { %v3583_v12 = vmax.f32 %v3523_v61, 0.0  ;;  %v4759_v32 = vpack.c.bf16 %v3582_v9, %v3582_v9 }
 0x67d   :  { %v4762_v59 = vpack.c.bf16 %v3585_v57, %v3585_v57 }
 0x67e   :  { %v4934_v35 = vpop.f32.mrb[68].mxu0  ;;  %v4760_v46 = vpack.c.bf16 %v3583_v12, %v3583_v12 }
 0x67f   :  { %v3544_v44 = vadd.f32 %v4934_v35, %v3447_v3  ;;  %v3535_v54 = vpop.f32.mrb[69].mxu0 }
 0x680   :  { %v3536_v6 = vadd.f32 %v3535_v54, %v3439_v8  ;;  %v4935_v39 = vpop.f32.mrb[70].mxu0  ;;  %v3482_v8 = vadd.f32 %v7207_v14, %v7212_v13  ;;  %v3474_v54 = vadd.f32 %v7203_v36, %v7212_v13 }
 0x681   :  { %v3588_v49 = vmax.f32 %v3544_v44, 0.0  ;;  %v3547_v28 = vadd.f32 %v4935_v39, %v3450_v53  ;;  %v3538_v22 = vpop.f32.mrb[71].mxu0 }
 0x682   :  { %v3586_v11 = vmax.f32 %v3536_v6, 0.0  ;;  %v3539_v18 = vadd.f32 %v3538_v22, %v3442_v25 }
 0x683   :  { %v4765_v24 = vpack.c.bf16 %v3588_v49, %v3588_v49  ;;  %v3589_v23 = vmax.f32 %v3547_v28, 0.0 }
 0x684   :  { %v4763_v27 = vpack.c.bf16 %v3586_v11, %v3586_v11  ;;  %v3587_v56 = vmax.f32 %v3539_v18, 0.0 }
 0x685   :  { %v3664_v17 = vmax.bf16 %v4765_v24, %v4761_v29  ;;  %v4766_v37 = vpack.c.bf16 %v3589_v23, %v3589_v23 }
 0x686   :  { %v3662_v10 = vmax.bf16 %v4763_v27, %v4759_v32  ;;  %v4764_v41 = vpack.c.bf16 %v3587_v56, %v3587_v56  ;;  %v4938_v1 = vpop.f32.mrb[72].mxu0 }
 0x687   :  { %v3665_v58 = vmax.bf16 %v4766_v37, %v4762_v59  ;;  %v3560_v20 = vadd.f32 %v4938_v1, %v3463_v15  ;;  %v3551_v52 = vpop.f32.mrb[73].mxu0  ;;  %v5063_v1 = vld [vmem:[%s7381_s7 + $0xd0] sm:$0xff]  }
 0x688   :  { %v3663_v42 = vmax.bf16 %v4764_v41, %v4760_v46  ;;  %v3552_v45 = vadd.f32 %v3551_v52, %v3455_v19  ;;  %v4939_v63 = vpop.f32.mrb[74].mxu0  ;;  %v5061_v46 = vld [vmem:[%s7381_s7 + $0xc8] sm:$0xff]   ;;  %v5064_v19 = vld [vmem:[%s7381_s7 + $0x90] sm:$0xff]   ;;  %v5066_v52 = vld [vmem:[%s7381_s7 + $0x98] sm:$0xff]  }
 0x689   :  { %v3671_v48 = vmax.bf16 %v3665_v58, %v3664_v17  ;;  %v3563_v47 = vadd.f32 %v4939_v63, %v3466_v30  ;;  %v3554_v31 = vpop.f32.mrb[75].mxu0  ;;  %v3592_v61 = vmax.f32 %v3560_v20, 0.0  ;;  %v5062_v41 = vld [vmem:[%s7381_s7 + $0x88] sm:$0xff]   ;;  %v5065_v20 = vld [vmem:[%s7381_s7 + $0xd8] sm:$0xff]  }
 0x68a   :  { %v3670_v40 = vmax.bf16 %v3663_v42, %v3662_v10  ;;  %v3555_v7 = vadd.f32 %v3554_v31, %v3458_v16  ;;  %v3590_v50 = vmax.f32 %v3552_v45, 0.0  ;;  %v3732_v10 = vld [vmem:[#allocation5] sm:$0xff]  ;;  %v5069_v16 = vld [vmem:[%s7381_s7 + $0xe8] sm:$0xff]  }
 0x68b   :  { %v4623_v4 = vcombine.low %v3671_v48, %v7400_v2  ;;  %v3593_v53 = vmax.f32 %v3563_v47, 0.0  ;;  %v4769_v43 = vpack.c.bf16 %v3592_v61, %v3592_v61  ;;  %v5068_v42 = vld [vmem:[%s7381_s7 + $0xa0] sm:$0xff]   ;;  %v5070_v47 = vld [vmem:[%s7381_s7 + $0xa8] sm:$0xff]   ;;  %v5077_v61 = vld [vmem:[%s7381_s7 + $0x110] sm:$0xff]  }
 0x68c   :  { %v4621_v34 = vcombine.low %v7400_v2, %v3670_v40  ;;  %v4622_v21 = vcombine.low %v3670_v40, %v3671_v48  ;;  %v3591_v39 = vmax.f32 %v3555_v7, 0.0  ;;  %v4767_v28 = vpack.c.bf16 %v3590_v50, %v3590_v50  ;;  %v5071_v40 = vld [vmem:[%s7381_s7 + $0xf0] sm:$0xff]   ;;  %v3741_v50 = vld [vmem:[#allocation5 + $0x48] sm:$0xff] }
 0x68d   :  { %3693 = vst.msk [vmem:[#allocation5 + $0x30] sm:$0xff] %vm3678_vm15, %v4623_v4  ;;  %v4770_v12 = vpack.c.bf16 %v3593_v53, %v3593_v53  ;;  %v5072_v7 = vld [vmem:[%s7381_s7 + $0xb0] sm:$0xff]  }
 0x68e   :  { %v4942_v55 = vpop.f32.mrb[76].mxu0  ;;  %3697 = vrot.lane.b32.xlu1 %v4621_v34, %s5097_s18  ;;  %3680 = vst.msk [vmem:[#allocation5 + $0x28] sm:$0xff] %vm3678_vm15, %v4621_v34  ;;  %3710 = vst.msk [vmem:[#allocation5 + $0x10] sm:$0xff] %vm3678_vm15, %v4622_v21  ;;  %v4768_v29 = vpack.c.bf16 %v3591_v39, %v3591_v39  ;;  %v5074_v34 = vld [vmem:[%s7381_s7 + $0xb8] sm:$0xff]   ;;  %v5081_v53 = vld [vmem:[%s7383_s9 + $0x10] sm:$0xff]  }
 0x68f   :  { %v3576_v3 = vadd.f32 %v4942_v55, %v3479_v0  ;;  %v3567_v35 = vpop.f32.mrb[77].mxu0  ;;  %v5076_v0 = vld [vmem:[%s7381_s7 + $0x108] sm:$0xff]   ;;  %v5085_v39 = vld [vmem:[%s7383_s9 + $0x30] sm:$0xff]  }
 0x690   :  { %v3568_v33 = vadd.f32 %v3567_v35, %v3471_v26  ;;  %v4943_v44 = vpop.f32.mrb[78].mxu0  ;;  %v3740_v26 = vld [vmem:[#allocation5 + $0x40] sm:$0xff] }
 0x691   :  { %v3596_v51 = vmax.f32 %v3576_v3, 0.0  ;;  %v3579_v9 = vadd.f32 %v4943_v44, %v3482_v8  ;;  %v3570_v6 = vpop.f32.mrb[79].mxu0  ;;  %v5078_v3 = vld [vmem:[%s7381_s7 + $0x118] sm:$0xff]   ;;  %v5079_v44 = vld [vmem:[%s7383_s9] sm:$0xff]  }
 0x692   :  { %v3594_v5 = vmax.f32 %v3568_v33, 0.0  ;;  %v3571_v25 = vadd.f32 %v3570_v6, %v3474_v54  ;;  %3684 = vrot.lane.b32.xlu1 %v4622_v21, %s5097_s18  ;;  %v5075_v21 = vld [vmem:[%s7381_s7 + $0x100] sm:$0xff]   ;;  %v5098_v33 = vmov 0.0   ;;  %v5080_v54 = vld [vmem:[%s7383_s9 + $0x8] sm:$0xff]  }
 0x693   :  { %v4773_v57 = vpack.c.bf16 %v3596_v51, %v3596_v51  ;;  %v3597_v49 = vmax.f32 %v3579_v9, 0.0  ;;  %v5082_v51 = vld [vmem:[%s7383_s9 + $0x18] sm:$0xff]   ;;  %v5083_v9 = vld [vmem:[%s7383_s9 + $0x20] sm:$0xff]   ;;  %v5084_v6 = vld [vmem:[%s7383_s9 + $0x28] sm:$0xff]  }
 0x694   :  { %v4771_v14 = vpack.c.bf16 %v3594_v5, %v3594_v5  ;;  %v3595_v22 = vmax.f32 %v3571_v25, 0.0  ;;  %v5086_v5 = vld [vmem:[%s7383_s9 + $0x38] sm:$0xff]  }
 0x695   :  { %v3668_v11 = vmax.bf16 %v4773_v57, %v4769_v43  ;;  %v4774_v18 = vpack.c.bf16 %v3597_v49, %v3597_v49 }
 0x696   :  { %v3666_v36 = vmax.bf16 %v4771_v14, %v4767_v28  ;;  %v4772_v13 = vpack.c.bf16 %v3595_v22, %v3595_v22  ;;  %3713 = vrot.lane.b32.xlu1 %v4623_v4, %s5097_s18  ;;  %v5073_v4 = vld [vmem:[%s7381_s7 + $0xf8] sm:$0xff]  }
 0x697   :  { %v3669_v24 = vmax.bf16 %v4774_v18, %v4770_v12 }
 0x698   :  { %v3667_v23 = vmax.bf16 %v4772_v13, %v4768_v29  ;;  %v4627_v13 = vld [vmem:[%s7384_s8] ss:$0 sm:$0xff] }
 0x699   :  { %v3673_v62 = vmax.bf16 %v3669_v24, %v3668_v11 }
 0x69a   :  { %v3672_v32 = vmax.bf16 %v3667_v23, %v3666_v36 }
 0x69b   :  { %v4626_v27 = vcombine.low %v3673_v62, %v7400_v2 }
 0x69c   :  { %v4624_v56 = vcombine.low %v7400_v2, %v3672_v32  ;;  %v4625_v38 = vcombine.low %v3672_v32, %v3673_v62  ;;  %v5060_v2 = vld [vmem:[%s7381_s7 + $0x80] sm:$0xff]  }
 0x69d   :  { %3730 = vst.msk [vmem:[#allocation5 + $0x20] sm:$0xff] %vm3678_vm15, %v4626_v27 }
 0x69e   :  { %3699 = vrot.lane.b32.xlu0 %v4624_v56, %s5097_s18  ;;  %3722 = vst.msk [vmem:[#allocation5 + $0x18] sm:$0xff] %vm3678_vm15, %v4624_v56  ;;  %3711 = vst.msk [vmem:[#allocation5 + $0x38] sm:$0xff] %vm3678_vm15, %v4625_v38 }
 0x6a2   :  { %3724 = vrot.lane.b32.xlu0 %v4625_v38, %s5097_s18 }
 0x6a4   :  { %v3736_v8 = vld [vmem:[#allocation5 + $0x20] sm:$0xff] }
 0x6a6   :  { %3715 = vrot.lane.b32.xlu0 %v4626_v27, %s5097_s18 }
 0x700   :  { %v3698_v59 = vpop.permute.xlu1 %3697 }
 0x701   :  { %3703 = vst.msk [vmem:[#allocation5 + $0x8] sm:$0xff] %vm3687_vm0, %v3698_v59 }
 0x704   :  { %v3685_v17 = vpop.permute.xlu1 %3684 }
 0x705   :  { %3689 = vst.msk [vmem:[#allocation5 + $0x28] sm:$0xff] %vm3687_vm0, %v3685_v17 }
 0x708   :  { %v3714_v37 = vpop.permute.xlu1 %3713  ;;  %v3733_v15 = vld [vmem:[#allocation5 + $0x8] sm:$0xff] }
 0x709   :  { %3719 = vst.msk [vmem:[#allocation5 + $0x10] sm:$0xff] %vm3687_vm0, %v3714_v37  ;;  %4075 = vmatprep.mubr.bf16.mxu0 %v3733_v15 }
 0x70a   :  { %4076 = vmatmul.mubr.bf16.vlgmr.msra.gmra.mrb[80].mxu0 %v3732_v10 }
 0x70b   :  { %4882 = vmatpush3.bf16.msra.mxu0 %v5060_v2 }
 0x70c   :  { %4883 = vmatprep.subr.bf16.mxu0 %v5061_v46  ;;  %v3737_v48 = vld [vmem:[#allocation5 + $0x28] sm:$0xff] }
 0x70f   :  { %4884 = vmatpush3.bf16.msra.mxu0 %v5062_v41 }
 0x710   :  { %v3700_v58 = vpop.permute.xlu0 %3699  ;;  %4885 = vmatprep.subr.bf16.mxu0 %v5063_v1  ;;  %v3734_v55 = vld [vmem:[#allocation5 + $0x10] sm:$0xff] }
 0x711   :  { %3704 = vst.msk [vmem:[#allocation5 + $0x30] sm:$0xff] %vm3687_vm0, %v3700_v58 }
 0x713   :  { %4886 = vmatpush3.bf16.msra.mxu0 %v5064_v19 }
 0x714   :  { %v3725_v30 = vpop.permute.xlu0 %3724  ;;  %4887 = vmatprep.subr.bf16.mxu0 %v5065_v20 }
 0x715   :  { %3727 = vst.msk [vmem:[#allocation5 + $0x18] sm:$0xff] %vm3687_vm0, %v3725_v30 }
 0x717   :  { %4888 = vmatpush3.bf16.msra.mxu0 %v5066_v52 }
 0x718   :  { %v3716_v45 = vpop.permute.xlu0 %3715  ;;  %v3738_v63 = vld [vmem:[#allocation5 + $0x30] sm:$0xff]  ;;  %4889 = vmatprep.subr.bf16.mxu0 %v5067_v60 }
 0x719   :  { %3720 = vst.msk [vmem:[#allocation5 + $0x38] sm:$0xff] %vm3687_vm0, %v3716_v45  ;;  %4083 = vmatprep.mubr.bf16.mxu0 %v3738_v63 }
 0x71a   :  { %4084 = vmatmul.mubr.bf16.gmra.mrb[84].mxu0 %v3737_v48 }
 0x71b   :  { %4890 = vmatpush3.bf16.msra.mxu0 %v5068_v42 }
 0x71c   :  { %4891 = vmatprep.subr.bf16.mxu0 %v5069_v16  ;;  %v3735_v31 = vld [vmem:[#allocation5 + $0x18] sm:$0xff] }
 0x71d   :  { %4124 = vmatprep.mubr.bf16.mxu0 %v3735_v31 }
 0x71f   :  { %4892 = vmatpush3.bf16.msra.mxu0 %v5070_v47 }
 0x720   :  { %4893 = vmatprep.subr.bf16.mxu0 %v5071_v40  ;;  %v3739_v35 = vld [vmem:[#allocation5 + $0x38] sm:$0xff] }
 0x723   :  { %4894 = vmatpush3.bf16.msra.mxu0 %v5072_v7 }
 0x724   :  { %4895 = vmatprep.subr.bf16.mxu0 %v5073_v4 }
 0x727   :  { %4896 = vmatpush3.bf16.msra.mxu0 %v5074_v34 }
 0x728   :  { %4944 = vmatprep.subr.bf16.mxu0 %v5075_v21 }
 0x72a   :  { %4125 = vmatmul.mubr.bf16.vlgmr.msra.gmra.mrb[88].mxu0 %v3734_v55 }
 0x72b   :  { %4132 = vmatprep.mubr.bf16.mxu0 %v3740_v26  ;;  %4945 = vmatpush3.bf16.msra.mxu0 %v5075_v21 }
 0x72c   :  { %4946 = vmatprep.subr.bf16.mxu0 %v5076_v0 }
 0x72f   :  { %4947 = vmatpush3.bf16.msra.mxu0 %v5076_v0 }
 0x730   :  { %4948 = vmatprep.subr.bf16.mxu0 %v5077_v61 }
 0x732   :  { %4133 = vmatmul.mubr.bf16.gmra.mrb[92].mxu0 %v3739_v35  ;;  %v4670_v35 = vld [vmem:[%s7385_s10] ss:$0 sm:$0xff] }
 0x733   :  { %4949 = vmatpush3.bf16.msra.mxu0 %v5077_v61  ;;  %4952 = vmatprep.mubr.msk.bf16.mxu0 %vm3678_vm15, %v3736_v8 }
 0x734   :  { %4950 = vmatprep.subr.bf16.mxu0 %v5078_v3 }
 0x737   :  { %4951 = vmatpush3.bf16.msra.mxu0 %v5078_v3 }
 0x738   :  { %4956 = vmatprep.subr.bf16.mxu0 %v5098_v33 }
 0x73a   :  { %4953 = vmatmul.mubr.msk.bf16.vlgmr.msra.gmra.mrb[96].mxu0 %vm3678_vm15, %v3741_v50 }
 0x73b   :  { %4957 = vmatpush3.bf16.msra.mxu0 %v5079_v44  ;;  %4972 = vmatprep.mubr.msk.bf16.mxu0 %vm5099_vm3, %v5098_v33 }
 0x73c   :  { %4958 = vmatprep.subr.bf16.mxu0 %v5098_v33 }
 0x73f   :  { %4959 = vmatpush3.bf16.msra.mxu0 %v5080_v54 }
 0x740   :  { %4960 = vmatprep.subr.bf16.mxu0 %v5098_v33 }
 0x743   :  { %4961 = vmatpush3.bf16.msra.mxu0 %v5081_v53 }
 0x744   :  { %4962 = vmatprep.subr.bf16.mxu0 %v5098_v33 }
 0x747   :  { %4963 = vmatpush3.bf16.msra.mxu0 %v5082_v51 }
 0x748   :  { %4964 = vmatprep.subr.bf16.mxu0 %v5098_v33 }
 0x74b   :  { %4965 = vmatpush3.bf16.msra.mxu0 %v5083_v9 }
 0x74c   :  { %4966 = vmatprep.subr.bf16.mxu0 %v5098_v33 }
 0x74f   :  { %4967 = vmatpush3.bf16.msra.mxu0 %v5084_v6 }
 0x750   :  { %4968 = vmatprep.subr.bf16.mxu0 %v5098_v33 }
 0x753   :  { %4969 = vmatpush3.bf16.msra.mxu0 %v5085_v39 }
 0x754   :  { %4970 = vmatprep.subr.bf16.mxu0 %v5098_v33 }
 0x757   :  { %4971 = vmatpush3.bf16.msra.mxu0 %v5086_v5 }
 0x7dd   :  { %v4869_v25 = vpop.f32.mrb[80].mxu0 }
 0x7de   :  { %v4870_v43 = vpop.f32.mrb[81].mxu0 }
 0x7df   :  { %v4871_v57 = vadd.f32 %v4870_v43, %v4869_v25  ;;  %v4872_v49 = vpop.f32.mrb[82].mxu0 }
 0x7e0   :  { %v4873_v28 = vpop.f32.mrb[83].mxu0 }
 0x7e1   :  { %v4874_v14 = vadd.f32 %v4873_v28, %v4872_v49  ;;  %v4078_v62 = vadd.f32 %v4871_v57, %v4627_v13 }
 0x7e3   :  { %v4081_v38 = vadd.f32 %v4874_v14, %v4627_v13 }
 0x7ed   :  { %v4875_v22 = vpop.f32.mrb[84].mxu0 }
 0x7ee   :  { %v4876_v12 = vpop.f32.mrb[85].mxu0 }
 0x7ef   :  { %v4877_v11 = vadd.f32 %v4876_v12, %v4875_v22  ;;  %v4878_v18 = vpop.f32.mrb[86].mxu0 }
 0x7f0   :  { %v4879_v29 = vpop.f32.mrb[87].mxu0 }
 0x7f1   :  { %v4880_v36 = vadd.f32 %v4879_v29, %v4878_v18  ;;  %v4086_v46 = vadd.f32 %v4877_v11, %v4627_v13 }
 0x7f3   :  { %v4089_v19 = vadd.f32 %v4880_v36, %v4627_v13 }
 0x7fd   :  { %v4897_v24 = vpop.f32.mrb[88].mxu0 }
 0x7fe   :  { %v4898_v23 = vpop.f32.mrb[89].mxu0 }
 0x7ff   :  { %v4899_v32 = vadd.f32 %v4898_v23, %v4897_v24  ;;  %v4900_v27 = vpop.f32.mrb[90].mxu0 }
 0x800   :  { %v4901_v56 = vpop.f32.mrb[91].mxu0 }
 0x801   :  { %v4902_v59 = vadd.f32 %v4901_v56, %v4900_v27  ;;  %v4127_v17 = vadd.f32 %v4899_v32, %v4078_v62 }
 0x803   :  { %v4130_v2 = vadd.f32 %v4902_v59, %v4081_v38 }
 0x805   :  { %v4903_v37 = vpop.f32.mrb[92].mxu0 }
 0x806   :  { %v4904_v15 = vpop.f32.mrb[93].mxu0 }
 0x807   :  { %v4905_v10 = vadd.f32 %v4904_v15, %v4903_v37  ;;  %v4906_v41 = vpop.f32.mrb[94].mxu0 }
 0x808   :  { %v4907_v1 = vpop.f32.mrb[95].mxu0 }
 0x809   :  { %v4908_v58 = vadd.f32 %v4907_v1, %v4906_v41  ;;  %v4135_v20 = vadd.f32 %v4905_v10, %v4086_v46 }
 0x80b   :  { %v4138_v52 = vadd.f32 %v4908_v58, %v4089_v19 }
 0x80d   :  { %v4954_v30 = vpop.f32.mrb[96].mxu0 }
 0x80e   :  { %v4184_v60 = vadd.f32 %v4954_v30, %v4135_v20  ;;  %v4175_v42 = vpop.f32.mrb[97].mxu0 }
 0x80f   :  { %v4176_v45 = vadd.f32 %v4175_v42, %v4127_v17  ;;  %v4955_v63 = vpop.f32.mrb[98].mxu0 }
 0x810   :  { %v4192_v16 = vmax.f32 %v4184_v60, 0.0  ;;  %v4187_v48 = vadd.f32 %v4955_v63, %v4138_v52  ;;  %v4178_v47 = vpop.f32.mrb[99].mxu0 }
 0x811   :  { %v4190_v31 = vmax.f32 %v4176_v45, 0.0  ;;  %v4179_v40 = vadd.f32 %v4178_v47, %v4130_v2 }
 0x812   :  { %v4777_v7 = vpack.c.bf16 %v4192_v16, %v4192_v16  ;;  %v4193_v4 = vmax.f32 %v4187_v48, 0.0 }
 0x813   :  { %v4775_v34 = vpack.c.bf16 %v4190_v31, %v4190_v31  ;;  %v4191_v21 = vmax.f32 %v4179_v40, 0.0 }
 0x814   :  { %v4778_v0 = vpack.c.bf16 %v4193_v4, %v4193_v4 }
 0x815   :  { %v4210_v55 = vmax.bf16 %v4777_v7, %v4775_v34  ;;  %v4776_v26 = vpack.c.bf16 %v4191_v21, %v4191_v21 }
 0x817   :  { %v4211_v61 = vmax.bf16 %v4778_v0, %v4776_v26 }
 0x819   :  { %v4212_v3 = vmax.bf16 %v4211_v61, %v4210_v55 }
 0x81b   :  { %4973 = vmatmul.mubr.bf16.vlgmr.msra.gmra.mrb[100].mxu0 %v4212_v3 }
 0x8ee   :  { %v4318_v8 = vpop.f32.mrb[100].mxu0 }
 0x8ef   :  { %v4319_v50 = vadd.f32 %v4670_v35, %v4318_v8  ;;  %v4974_v33 = vpop.f32.mrb[101].mxu0 }
 0x8f0   :  { %v4321_v44 = vpop.f32.mrb[102].mxu0 }
 0x8f1   :  { %4324 = vst [vmem:[%s7386_s11] sm:$0xff] %v4319_v50  ;;  %v4975_v54 = vpop.f32.mrb[103].mxu0 }

</bundles_post_ra>
